<compile_context>
chip_gen: v6e
topology: v6e:2x2x1
jax: 0.10.0
libtpu: 0.0.40
codegen_flags: <defaults>
</compile_context>

<pallas_src>
import jax
import jax.numpy as jnp
from jax import lax
from jax.experimental import pallas as pl
from jax.experimental.pallas import tpu as pltpu


_SHIFTS = ((0, 0), (0, 1), (1, 0), (1, 1))


def fused_dis_block_kernel(xs_ref, w1_ref, b1_ref, w2_ref, b2_ref, out_ref, s_ref):
    """One batch tile per grid step; everything at pooled resolution.

    xs_ref : (NB, Ho+1, Wo+1, 4*Cin) bf16   zero-padded input, 2x2 parity packed on lanes:
                                            xs[n,i,j,(s*2+r)*Cin+c] = xpad[n,2i+s,2j+r,c]
    w1_ref : (16*Cin, 5*Cp)          bf16   per-shift [conv1 (4 output parities) | shortcut]
    b1_ref : (1, 4*Cp)               f32    conv1 bias, tiled per parity
    w2_ref : (16*Cp, Cp)             bf16   per-shift conv2*avgpool (4x4/stride-2) weights
    b2_ref : (1, Cp)                 f32    b2 + bsc
    out_ref: (NB, Ho, Wo, Cp)        f32
    s_ref  : VMEM (NB, Ho+1, Wo+1, 4*Cp) bf16   zero-halo, parity-packed ReLU(conv1)
    """
    NB, Hp2, Wp2, cin4 = xs_ref.shape
    Ho, Wo = Hp2 - 1, Wp2 - 1
    Cp = out_ref.shape[3]
    M = NB * Ho * Wo

    # ---- stage 1: conv1 for all 4 output parities + pooled 1x1 shortcut ----------------
    # Four unit-stride shifted reads of the parity-packed input feed four accumulated MXU
    # matmuls (K = 4*Cin each); no im2col scratch, no masked stores.
    acc1 = jnp.zeros((M, 5 * Cp), jnp.float32)
    for si, (di, dj) in enumerate(_SHIFTS):
        xslab = xs_ref[:, pl.ds(di, Ho), pl.ds(dj, Wo), :].reshape(M, cin4)
        acc1 = acc1 + jnp.dot(xslab, w1_ref[pl.ds(si * cin4, cin4), :],
                              preferred_element_type=jnp.float32)
    h1 = jnp.maximum(acc1[:, :4 * Cp] + b1_ref[...], 0.0).astype(s_ref.dtype)
    sc = acc1[:, 4 * Cp:]                                    # pooled shortcut, f32 (M, Cp)

    # ---- scatter ReLU(conv1) into the zero-halo parity-packed scratch ------------------
    # Zero only the 1-pixel halo (the interior is fully overwritten every grid step, so
    # this is correct even though s_ref persists across steps / megacore shards).
    zrow = jnp.zeros((NB, 1, Wp2, 4 * Cp), s_ref.dtype)
    zcol = jnp.zeros((NB, Hp2, 1, 4 * Cp), s_ref.dtype)
    s_ref[:, pl.ds(0, 1), :, :] = zrow
    s_ref[:, pl.ds(Ho, 1), :, :] = zrow
    s_ref[:, :, pl.ds(0, 1), :] = zcol
    s_ref[:, :, pl.ds(Wo, 1), :] = zcol

    h1_4d = h1.reshape(NB, Ho, Wo, 4 * Cp)
    for p in (0, 1):
        for q in (0, 1):
            lane0 = ((1 - p) * 2 + (1 - q)) * Cp             # parity inside the padded map
            s_ref[:, pl.ds(p, Ho), pl.ds(q, Wo), pl.ds(lane0, Cp)] = (
                h1_4d[:, :, :, (p * 2 + q) * Cp:(p * 2 + q + 1) * Cp])

    # ---- stage 2: conv2 fused with the 2x2 avg-pool (effective 4x4/stride-2 filter) ----
    acc = sc + b2_ref[...]
    for si, (da, db) in enumerate(_SHIFTS):
        sslab = s_ref[:, pl.ds(da, Ho), pl.ds(db, Wo), :].reshape(M, 4 * Cp)
        acc = acc + jnp.dot(sslab, w2_ref[pl.ds(si * 4 * Cp, 4 * Cp), :],
                            preferred_element_type=jnp.float32)
    out_ref[...] = acc.reshape(NB, Ho, Wo, Cp)


def _round_up(x, m):
    return (x + m - 1) // m * m


def _prepare_params(params, Cp, mm_dtype):
    """Fold pooling/shortcut into the conv weights and pad channels to Cp lanes (trace time)."""
    w1, b1, w2, b2, wsc, bsc = params
    Cin, Cout = w1.shape[2], w1.shape[3]

    # Stage-1 weight: rows = (shift (di,dj), source parity (s,r), cin),
    # cols = [conv1 output parity (p,q) blocks of Cp | pooled 1x1 shortcut block of Cp].
    W1 = jnp.zeros((4, 4, Cin, 5 * Cp), jnp.float32)
    for si, (di, dj) in enumerate(_SHIFTS):
        for s in range(2):
            for r in range(2):
                for p in range(2):
                    for q in range(2):
                        kh, kw = 2 * di + s - p, 2 * dj + r - q
                        if 0 <= kh < 3 and 0 <= kw < 3:
                            c0 = (p * 2 + q) * Cp
                            W1 = W1.at[si, s * 2 + r, :, c0:c0 + Cout].set(
                                w1[kh, kw].astype(jnp.float32))
        # avg-pool then 1x1 conv: the tap for shift (di,dj) lives at source parity (1-di,1-dj)
        W1 = W1.at[si, (1 - di) * 2 + (1 - dj), :, 4 * Cp:4 * Cp + Cout].set(
            0.25 * wsc.astype(jnp.float32))
    w1cat = W1.reshape(16 * Cin, 5 * Cp).astype(mm_dtype)

    b1p = jnp.zeros((1, Cp), jnp.float32).at[:, :Cout].set(
        b1.reshape(1, Cout).astype(jnp.float32))
    b1cat = jnp.tile(b1p, (1, 4))

    # conv2 followed by 2x2 average pooling == effective 4x4 stride-2 conv.
    w2eff = jnp.zeros((4, 4, Cout, Cout), jnp.float32)
    for dy in range(2):
        for dx in range(2):
            w2eff = w2eff.at[dy:dy + 3, dx:dx + 3].add(0.25 * w2.astype(jnp.float32))
    W2 = jnp.zeros((4, 4, Cp, Cp), jnp.float32)          # (shift, in-parity (u,v), Cp, Cp)
    for si, (da, db) in enumerate(_SHIFTS):
        for u in range(2):
            for v in range(2):
                W2 = W2.at[si, u * 2 + v, :Cout, :Cout].set(w2eff[2 * da + u, 2 * db + v])
    w2cat = W2.reshape(16 * Cp, Cp).astype(mm_dtype)

    b2sc = jnp.zeros((1, Cp), jnp.float32).at[:, :Cout].set(
        (b2 + bsc).reshape(1, Cout).astype(jnp.float32))
    return w1cat, b1cat, w2cat, b2sc


def optimized_dis_block(x_nchw, params, *, use_bf16=True, vmem_budget_bytes=20 * 2**20):
    """PyTorch-semantics forward. x: (N, Cin, H, W) f32 -> (N, Cout, H//2, W//2) f32."""
    w1, b1, w2, b2, wsc, bsc = params
    N, Cin, H, W = x_nchw.shape
    Cout = w1.shape[-1]
    assert H % 2 == 0 and W % 2 == 0, "even spatial dims required (2x2 avg-pool)"
    Ho, Wo = H // 2, W // 2
    Hp2, Wp2 = Ho + 1, Wo + 1
    Cp = _round_up(max(Cout, 128), 128)          # lane-dense matmul N dim / output slab
    mm_dtype = jnp.bfloat16 if use_bf16 else jnp.float32
    esz = jnp.dtype(mm_dtype).itemsize

    w1cat, b1cat, w2cat, b2sc = _prepare_params(params, Cp, mm_dtype)

    # NCHW -> NHWC, pad=1 for the 3x3 convs, then 2x2 space-to-depth parity packing so the
    # kernel only ever needs unit-stride slices plus static 128-aligned lane offsets.
    x = jnp.transpose(x_nchw, (0, 2, 3, 1)).astype(jnp.float32)
    xpad = jnp.pad(x, ((0, 0), (1, 1), (1, 1), (0, 0)))
    xs = (xpad.reshape(N, Hp2, 2, Wp2, 2, Cin)
              .transpose(0, 1, 3, 2, 4, 5)
              .reshape(N, Hp2, Wp2, 4 * Cin)).astype(mm_dtype)

    # Batch tile: largest divisor of N that fits the VMEM budget while keeping >= 2 grid
    # steps whenever N >= 2 (so the second v7x TensorCore has work).
    per_n = (2 * Hp2 * Wp2 * 4 * Cin * esz           # double-buffered xs block
             + 2 * Ho * Wo * Cp * 4                  # double-buffered out block
             + Hp2 * Wp2 * 4 * Cp * esz              # parity scratch
             + Ho * Wo * 6 * Cp * 4                  # f32 accumulators live in the kernel
             + Ho * Wo * 4 * Cp * esz)               # relu(conv1) value
    nb = 1
    for d in range(1, N + 1):
        if N % d == 0 and d * per_n <= vmem_budget_bytes and (N // d >= 2 or N == 1):
            nb = d
    grid = (N // nb,)

    w_bytes = (w1cat.size + w2cat.size) * esz + (b1cat.size + b2sc.size) * 4
    need = nb * per_n + 2 * w_bytes + (4 << 20)
    # Explicit scoped-VMEM limit (v5e defaults to 16 MiB); clamp well under v7x's 64 MiB.
    vmem_limit = int(min(100 * 2**20, max(need, 32 * 2**20)))

    flops = 2 * N * Ho * Wo * (16 * Cin * 5 * Cp + 16 * Cp * Cp)
    bytes_accessed = (xs.size * esz + (w1cat.size + w2cat.size) * esz
                      + (b1cat.size + b2sc.size) * 4 + N * Ho * Wo * Cp * 4)

    out_nhwc = pl.pallas_call(
        fused_dis_block_kernel,
        out_shape=jax.ShapeDtypeStruct((N, Ho, Wo, Cp), jnp.float32),
        grid=grid,
        in_specs=[
            pl.BlockSpec((nb, Hp2, Wp2, 4 * Cin), lambda n: (n, 0, 0, 0)),
            pl.BlockSpec((16 * Cin, 5 * Cp),      lambda n: (0, 0)),
            pl.BlockSpec((1, 4 * Cp),             lambda n: (0, 0)),
            pl.BlockSpec((16 * Cp, Cp),           lambda n: (0, 0)),
            pl.BlockSpec((1, Cp),                 lambda n: (0, 0)),
        ],
        out_specs=pl.BlockSpec((nb, Ho, Wo, Cp), lambda n: (n, 0, 0, 0)),
        scratch_shapes=[pltpu.VMEM((nb, Hp2, Wp2, 4 * Cp), mm_dtype)],
        compiler_params=pltpu.CompilerParams(
            dimension_semantics=("parallel",),
            vmem_limit_bytes=vmem_limit),
        cost_estimate=pl.CostEstimate(flops=flops, transcendentals=0,
                                      bytes_accessed=bytes_accessed),
    )(xs, w1cat, b1cat, w2cat, b2sc)

    out = out_nhwc[..., :Cout]                          # drop the lane padding
    return jnp.transpose(out, (0, 3, 1, 2))             # NHWC -> NCHW


def ref_forward(x_nchw, params):
    """Pure-JAX reference (lax.conv) with identical semantics, for verification."""
    w1, b1, w2, b2, wsc, bsc = params
    dn = ('NHWC', 'HWIO', 'NHWC')
    x = jnp.transpose(x_nchw, (0, 2, 3, 1)).astype(jnp.float32)
    h = lax.conv_general_dilated(x, w1, (1, 1), ((1, 1), (1, 1)),
                                 dimension_numbers=dn) + b1.reshape(1, 1, 1, -1)
    h = jnp.maximum(h, 0.0)
    h = lax.conv_general_dilated(h, w2, (1, 1), ((1, 1), (1, 1)),
                                 dimension_numbers=dn) + b2.reshape(1, 1, 1, -1)
    N, H, W, C = h.shape
    h = h.reshape(N, H // 2, 2, W // 2, 2, C).mean(axis=(2, 4))
    xp = x.reshape(N, H // 2, 2, W // 2, 2, x.shape[-1]).mean(axis=(2, 4))
    sc = jnp.einsum('nhwc,cd->nhwd', xp, wsc) + bsc.reshape(1, 1, 1, -1)
    return jnp.transpose(h + sc, (0, 3, 1, 2))


if __name__ == "__main__":
    N, Cin, Cout, H, W = 2, 4, 8, 16, 16

    key = jax.random.PRNGKey(0)
    k = jax.random.split(key, 7)
    # Deterministic synthetic parameters (HWIO conv weights, (1, Cout) biases).
    w1  = jax.random.normal(k[0], (3, 3, Cin, Cout),  jnp.float32) * 0.1
    b1  = jax.random.normal(k[1], (1, Cout),          jnp.float32) * 0.1
    w2  = jax.random.normal(k[2], (3, 3, Cout, Cout), jnp.float32) * 0.1
    b2  = jax.random.normal(k[3], (1, Cout),          jnp.float32) * 0.1
    wsc = jax.random.normal(k[4], (Cin, Cout),        jnp.float32) * 0.1
    bsc = jax.random.normal(k[5], (1, Cout),          jnp.float32) * 0.1
    params = (w1, b1, w2, b2, wsc, bsc)

    x = jax.random.normal(k[6], (N, Cin, H, W), jnp.float32)

    out = jax.block_until_ready(optimized_dis_block(x, params))
    ref = jax.block_until_ready(ref_forward(x, params))

    assert out.shape == (N, Cout, H // 2, W // 2), out.shape
    # bf16 MXU operands with f32 accumulation -> mixed-precision tolerance vs the f32 ref.
    max_err = float(jnp.max(jnp.abs(out - ref)))
    assert jnp.allclose(out, ref, rtol=3e-2, atol=3e-2), max_err

    print("KERNEL_OK")
</pallas_src>

<mosaic_0001>
module attributes {stable_mosaic.version = 11 : i64} {
  func.func @fused_dis_block_kernel(%arg0: i32, %arg1: memref<1x9x9x16xbf16, #tpu.memory_space<vmem>>, %arg2: memref<64x640xbf16, #tpu.memory_space<vmem>>, %arg3: memref<1x512xf32, #tpu.memory_space<vmem>>, %arg4: memref<2048x128xbf16, #tpu.memory_space<vmem>>, %arg5: memref<1x128xf32, #tpu.memory_space<vmem>>, %arg6: memref<1x8x8x128xf32, #tpu.memory_space<vmem>>, %arg7: memref<1x9x9x512xbf16, #tpu.memory_space<vmem>>) attributes {dimension_semantics = [#tpu.dimension_semantics<parallel>], iteration_bounds = array<i64: 2>, scalar_prefetch = 0 : i64, scratch_operands = 1 : i64, tpu.core_type = #tpu.core_type<tc>, window_params = [{transform_indices = @transform_0, window_bounds = array<i64: 1, 9, 9, 16>}, {pipeline_mode = #tpu.pipeline_mode<synchronous>, transform_indices = @transform_1, window_bounds = array<i64: 64, 640>}, {pipeline_mode = #tpu.pipeline_mode<synchronous>, transform_indices = @transform_2, window_bounds = array<i64: 1, 512>}, {pipeline_mode = #tpu.pipeline_mode<synchronous>, transform_indices = @transform_3, window_bounds = array<i64: 2048, 128>}, {pipeline_mode = #tpu.pipeline_mode<synchronous>, transform_indices = @transform_4, window_bounds = array<i64: 1, 128>}, {transform_indices = @transform_5, window_bounds = array<i64: 1, 8, 8, 128>}]} {
    %cst = arith.constant 0.000000e+00 : f32
    %0 = vector.broadcast %cst : f32 to vector<64x640xf32>
    %c0 = arith.constant 0 : index
    %c0_0 = arith.constant 0 : index
    %c0_1 = arith.constant 0 : index
    %c0_2 = arith.constant 0 : index
    %1 = vector.load %arg1[%c0, %c0_0, %c0_1, %c0_2] : memref<1x9x9x16xbf16, #tpu.memory_space<vmem>>, vector<1x8x8x16xbf16>
    %2 = vector.shape_cast %1 : vector<1x8x8x16xbf16> to vector<64x16xbf16>
    %c0_3 = arith.constant 0 : index
    %c0_4 = arith.constant 0 : index
    %3 = vector.load %arg2[%c0_3, %c0_4] : memref<64x640xbf16, #tpu.memory_space<vmem>>, vector<16x640xbf16>
    %cst_5 = arith.constant dense<0.000000e+00> : vector<64x640xf32>
    %4 = tpu.matmul %2, %3, %cst_5 {dimension_numbers = #tpu.dot_dimension_numbers<[1], [0], [0], [1], [0, 0, 1, 1], [], []>} : vector<64x16xbf16>, vector<16x640xbf16>, vector<64x640xf32> -> vector<64x640xf32>
    %5 = arith.addf %0, %4 : vector<64x640xf32>
    %c0_6 = arith.constant 0 : index
    %c0_7 = arith.constant 0 : index
    %c1 = arith.constant 1 : index
    %c0_8 = arith.constant 0 : index
    %6 = vector.load %arg1[%c0_6, %c0_7, %c1, %c0_8] : memref<1x9x9x16xbf16, #tpu.memory_space<vmem>>, vector<1x8x8x16xbf16>
    %7 = vector.shape_cast %6 : vector<1x8x8x16xbf16> to vector<64x16xbf16>
    %c16 = arith.constant 16 : index
    %c0_9 = arith.constant 0 : index
    %8 = vector.load %arg2[%c16, %c0_9] : memref<64x640xbf16, #tpu.memory_space<vmem>>, vector<16x640xbf16>
    %cst_10 = arith.constant dense<0.000000e+00> : vector<64x640xf32>
    %9 = tpu.matmul %7, %8, %cst_10 {dimension_numbers = #tpu.dot_dimension_numbers<[1], [0], [0], [1], [0, 0, 1, 1], [], []>} : vector<64x16xbf16>, vector<16x640xbf16>, vector<64x640xf32> -> vector<64x640xf32>
    %10 = arith.addf %5, %9 : vector<64x640xf32>
    %c0_11 = arith.constant 0 : index
    %c1_12 = arith.constant 1 : index
    %c0_13 = arith.constant 0 : index
    %c0_14 = arith.constant 0 : index
    %11 = vector.load %arg1[%c0_11, %c1_12, %c0_13, %c0_14] : memref<1x9x9x16xbf16, #tpu.memory_space<vmem>>, vector<1x8x8x16xbf16>
    %12 = vector.shape_cast %11 : vector<1x8x8x16xbf16> to vector<64x16xbf16>
    %c32 = arith.constant 32 : index
    %c0_15 = arith.constant 0 : index
    %13 = vector.load %arg2[%c32, %c0_15] : memref<64x640xbf16, #tpu.memory_space<vmem>>, vector<16x640xbf16>
    %cst_16 = arith.constant dense<0.000000e+00> : vector<64x640xf32>
    %14 = tpu.matmul %12, %13, %cst_16 {dimension_numbers = #tpu.dot_dimension_numbers<[1], [0], [0], [1], [0, 0, 1, 1], [], []>} : vector<64x16xbf16>, vector<16x640xbf16>, vector<64x640xf32> -> vector<64x640xf32>
    %15 = arith.addf %10, %14 : vector<64x640xf32>
    %c0_17 = arith.constant 0 : index
    %c1_18 = arith.constant 1 : index
    %c1_19 = arith.constant 1 : index
    %c0_20 = arith.constant 0 : index
    %16 = vector.load %arg1[%c0_17, %c1_18, %c1_19, %c0_20] : memref<1x9x9x16xbf16, #tpu.memory_space<vmem>>, vector<1x8x8x16xbf16>
    %17 = vector.shape_cast %16 : vector<1x8x8x16xbf16> to vector<64x16xbf16>
    %c48 = arith.constant 48 : index
    %c0_21 = arith.constant 0 : index
    %18 = vector.load %arg2[%c48, %c0_21] : memref<64x640xbf16, #tpu.memory_space<vmem>>, vector<16x640xbf16>
    %cst_22 = arith.constant dense<0.000000e+00> : vector<64x640xf32>
    %19 = tpu.matmul %17, %18, %cst_22 {dimension_numbers = #tpu.dot_dimension_numbers<[1], [0], [0], [1], [0, 0, 1, 1], [], []>} : vector<64x16xbf16>, vector<16x640xbf16>, vector<64x640xf32> -> vector<64x640xf32>
    %20 = arith.addf %15, %19 : vector<64x640xf32>
    %21 = vector.extract_strided_slice %20 {offsets = [0, 0], sizes = [64, 512], strides = [1, 1]} : vector<64x640xf32> to vector<64x512xf32>
    %c0_23 = arith.constant 0 : index
    %c0_24 = arith.constant 0 : index
    %22 = vector.load %arg3[%c0_23, %c0_24] : memref<1x512xf32, #tpu.memory_space<vmem>>, vector<1x512xf32>
    %23 = vector.broadcast %22 : vector<1x512xf32> to vector<64x512xf32>
    %24 = arith.addf %21, %23 : vector<64x512xf32>
    %cst_25 = arith.constant 0.000000e+00 : f32
    %25 = vector.broadcast %cst_25 : f32 to vector<64x512xf32>
    %26 = arith.maximumf %24, %25 : vector<64x512xf32>
    %27 = arith.truncf %26 : vector<64x512xf32> to vector<64x512xbf16>
    %28 = vector.extract_strided_slice %20 {offsets = [0, 512], sizes = [64, 128], strides = [1, 1]} : vector<64x640xf32> to vector<64x128xf32>
    %cst_26 = arith.constant 0.000000e+00 : bf16
    %29 = vector.broadcast %cst_26 : bf16 to vector<1x1x9x512xbf16>
    %cst_27 = arith.constant 0.000000e+00 : bf16
    %30 = vector.broadcast %cst_27 : bf16 to vector<1x9x1x512xbf16>
    %c0_28 = arith.constant 0 : index
    %c0_29 = arith.constant 0 : index
    %c0_30 = arith.constant 0 : index
    %c0_31 = arith.constant 0 : index
    %31 = vector.load %arg7[%c0_28, %c0_29, %c0_30, %c0_31] : memref<1x9x9x512xbf16, #tpu.memory_space<vmem>>, vector<1x1x9x512xbf16>
    tpu.vector_store %arg7[%c0_28, %c0_29, %c0_30, %c0_31], %29 {strides = array<i32>} : memref<1x9x9x512xbf16, #tpu.memory_space<vmem>>, vector<1x1x9x512xbf16>,
    %c0_32 = arith.constant 0 : index
    %c8 = arith.constant 8 : index
    %c0_33 = arith.constant 0 : index
    %c0_34 = arith.constant 0 : index
    %32 = vector.load %arg7[%c0_32, %c8, %c0_33, %c0_34] : memref<1x9x9x512xbf16, #tpu.memory_space<vmem>>, vector<1x1x9x512xbf16>
    tpu.vector_store %arg7[%c0_32, %c8, %c0_33, %c0_34], %29 {strides = array<i32>} : memref<1x9x9x512xbf16, #tpu.memory_space<vmem>>, vector<1x1x9x512xbf16>,
    %c0_35 = arith.constant 0 : index
    %c0_36 = arith.constant 0 : index
    %c0_37 = arith.constant 0 : index
    %c0_38 = arith.constant 0 : index
    %33 = vector.load %arg7[%c0_35, %c0_36, %c0_37, %c0_38] : memref<1x9x9x512xbf16, #tpu.memory_space<vmem>>, vector<1x9x1x512xbf16>
    tpu.vector_store %arg7[%c0_35, %c0_36, %c0_37, %c0_38], %30 {strides = array<i32>} : memref<1x9x9x512xbf16, #tpu.memory_space<vmem>>, vector<1x9x1x512xbf16>,
    %c0_39 = arith.constant 0 : index
    %c0_40 = arith.constant 0 : index
    %c8_41 = arith.constant 8 : index
    %c0_42 = arith.constant 0 : index
    %34 = vector.load %arg7[%c0_39, %c0_40, %c8_41, %c0_42] : memref<1x9x9x512xbf16, #tpu.memory_space<vmem>>, vector<1x9x1x512xbf16>
    tpu.vector_store %arg7[%c0_39, %c0_40, %c8_41, %c0_42], %30 {strides = array<i32>} : memref<1x9x9x512xbf16, #tpu.memory_space<vmem>>, vector<1x9x1x512xbf16>,
    %35 = vector.shape_cast %27 : vector<64x512xbf16> to vector<1x8x8x512xbf16>
    %36 = vector.extract_strided_slice %35 {offsets = [0, 0, 0, 0], sizes = [1, 8, 8, 128], strides = [1, 1, 1, 1]} : vector<1x8x8x512xbf16> to vector<1x8x8x128xbf16>
    %c0_43 = arith.constant 0 : index
    %c0_44 = arith.constant 0 : index
    %c0_45 = arith.constant 0 : index
    %c384 = arith.constant 384 : index
    %37 = vector.load %arg7[%c0_43, %c0_44, %c0_45, %c384] : memref<1x9x9x512xbf16, #tpu.memory_space<vmem>>, vector<1x8x8x128xbf16>
    tpu.vector_store %arg7[%c0_43, %c0_44, %c0_45, %c384], %36 {strides = array<i32>} : memref<1x9x9x512xbf16, #tpu.memory_space<vmem>>, vector<1x8x8x128xbf16>,
    %38 = vector.extract_strided_slice %35 {offsets = [0, 0, 0, 128], sizes = [1, 8, 8, 128], strides = [1, 1, 1, 1]} : vector<1x8x8x512xbf16> to vector<1x8x8x128xbf16>
    %c0_46 = arith.constant 0 : index
    %c0_47 = arith.constant 0 : index
    %c1_48 = arith.constant 1 : index
    %c256 = arith.constant 256 : index
    %39 = vector.load %arg7[%c0_46, %c0_47, %c1_48, %c256] : memref<1x9x9x512xbf16, #tpu.memory_space<vmem>>, vector<1x8x8x128xbf16>
    tpu.vector_store %arg7[%c0_46, %c0_47, %c1_48, %c256], %38 {strides = array<i32>} : memref<1x9x9x512xbf16, #tpu.memory_space<vmem>>, vector<1x8x8x128xbf16>,
    %40 = vector.extract_strided_slice %35 {offsets = [0, 0, 0, 256], sizes = [1, 8, 8, 128], strides = [1, 1, 1, 1]} : vector<1x8x8x512xbf16> to vector<1x8x8x128xbf16>
    %c0_49 = arith.constant 0 : index
    %c1_50 = arith.constant 1 : index
    %c0_51 = arith.constant 0 : index
    %c128 = arith.constant 128 : index
    %41 = vector.load %arg7[%c0_49, %c1_50, %c0_51, %c128] : memref<1x9x9x512xbf16, #tpu.memory_space<vmem>>, vector<1x8x8x128xbf16>
    tpu.vector_store %arg7[%c0_49, %c1_50, %c0_51, %c128], %40 {strides = array<i32>} : memref<1x9x9x512xbf16, #tpu.memory_space<vmem>>, vector<1x8x8x128xbf16>,
    %42 = vector.extract_strided_slice %35 {offsets = [0, 0, 0, 384], sizes = [1, 8, 8, 128], strides = [1, 1, 1, 1]} : vector<1x8x8x512xbf16> to vector<1x8x8x128xbf16>
    %c0_52 = arith.constant 0 : index
    %c1_53 = arith.constant 1 : index
    %c1_54 = arith.constant 1 : index
    %c0_55 = arith.constant 0 : index
    %43 = vector.load %arg7[%c0_52, %c1_53, %c1_54, %c0_55] : memref<1x9x9x512xbf16, #tpu.memory_space<vmem>>, vector<1x8x8x128xbf16>
    tpu.vector_store %arg7[%c0_52, %c1_53, %c1_54, %c0_55], %42 {strides = array<i32>} : memref<1x9x9x512xbf16, #tpu.memory_space<vmem>>, vector<1x8x8x128xbf16>,
    %c0_56 = arith.constant 0 : index
    %c0_57 = arith.constant 0 : index
    %44 = vector.load %arg5[%c0_56, %c0_57] : memref<1x128xf32, #tpu.memory_space<vmem>>, vector<1x128xf32>
    %45 = vector.broadcast %44 : vector<1x128xf32> to vector<64x128xf32>
    %46 = arith.addf %28, %45 : vector<64x128xf32>
    %c0_58 = arith.constant 0 : index
    %c0_59 = arith.constant 0 : index
    %c0_60 = arith.constant 0 : index
    %c0_61 = arith.constant 0 : index
    %47 = vector.load %arg7[%c0_58, %c0_59, %c0_60, %c0_61] : memref<1x9x9x512xbf16, #tpu.memory_space<vmem>>, vector<1x8x8x512xbf16>
    %48 = vector.shape_cast %47 : vector<1x8x8x512xbf16> to vector<64x512xbf16>
    %c0_62 = arith.constant 0 : index
    %c0_63 = arith.constant 0 : index
    %49 = vector.load %arg4[%c0_62, %c0_63] : memref<2048x128xbf16, #tpu.memory_space<vmem>>, vector<512x128xbf16>
    %cst_64 = arith.constant dense<0.000000e+00> : vector<64x128xf32>
    %50 = tpu.matmul %48, %49, %cst_64 {dimension_numbers = #tpu.dot_dimension_numbers<[1], [0], [0], [1], [0, 0, 1, 1], [], []>} : vector<64x512xbf16>, vector<512x128xbf16>, vector<64x128xf32> -> vector<64x128xf32>
    %51 = arith.addf %46, %50 : vector<64x128xf32>
    %c0_65 = arith.constant 0 : index
    %c0_66 = arith.constant 0 : index
    %c1_67 = arith.constant 1 : index
    %c0_68 = arith.constant 0 : index
    %52 = vector.load %arg7[%c0_65, %c0_66, %c1_67, %c0_68] : memref<1x9x9x512xbf16, #tpu.memory_space<vmem>>, vector<1x8x8x512xbf16>
    %53 = vector.shape_cast %52 : vector<1x8x8x512xbf16> to vector<64x512xbf16>
    %c512 = arith.constant 512 : index
    %c0_69 = arith.constant 0 : index
    %54 = vector.load %arg4[%c512, %c0_69] : memref<2048x128xbf16, #tpu.memory_space<vmem>>, vector<512x128xbf16>
    %cst_70 = arith.constant dense<0.000000e+00> : vector<64x128xf32>
    %55 = tpu.matmul %53, %54, %cst_70 {dimension_numbers = #tpu.dot_dimension_numbers<[1], [0], [0], [1], [0, 0, 1, 1], [], []>} : vector<64x512xbf16>, vector<512x128xbf16>, vector<64x128xf32> -> vector<64x128xf32>
    %56 = arith.addf %51, %55 : vector<64x128xf32>
    %c0_71 = arith.constant 0 : index
    %c1_72 = arith.constant 1 : index
    %c0_73 = arith.constant 0 : index
    %c0_74 = arith.constant 0 : index
    %57 = vector.load %arg7[%c0_71, %c1_72, %c0_73, %c0_74] : memref<1x9x9x512xbf16, #tpu.memory_space<vmem>>, vector<1x8x8x512xbf16>
    %58 = vector.shape_cast %57 : vector<1x8x8x512xbf16> to vector<64x512xbf16>
    %c1024 = arith.constant 1024 : index
    %c0_75 = arith.constant 0 : index
    %59 = vector.load %arg4[%c1024, %c0_75] : memref<2048x128xbf16, #tpu.memory_space<vmem>>, vector<512x128xbf16>
    %cst_76 = arith.constant dense<0.000000e+00> : vector<64x128xf32>
    %60 = tpu.matmul %58, %59, %cst_76 {dimension_numbers = #tpu.dot_dimension_numbers<[1], [0], [0], [1], [0, 0, 1, 1], [], []>} : vector<64x512xbf16>, vector<512x128xbf16>, vector<64x128xf32> -> vector<64x128xf32>
    %61 = arith.addf %56, %60 : vector<64x128xf32>
    %c0_77 = arith.constant 0 : index
    %c1_78 = arith.constant 1 : index
    %c1_79 = arith.constant 1 : index
    %c0_80 = arith.constant 0 : index
    %62 = vector.load %arg7[%c0_77, %c1_78, %c1_79, %c0_80] : memref<1x9x9x512xbf16, #tpu.memory_space<vmem>>, vector<1x8x8x512xbf16>
    %63 = vector.shape_cast %62 : vector<1x8x8x512xbf16> to vector<64x512xbf16>
    %c1536 = arith.constant 1536 : index
    %c0_81 = arith.constant 0 : index
    %64 = vector.load %arg4[%c1536, %c0_81] : memref<2048x128xbf16, #tpu.memory_space<vmem>>, vector<512x128xbf16>
    %cst_82 = arith.constant dense<0.000000e+00> : vector<64x128xf32>
    %65 = tpu.matmul %63, %64, %cst_82 {dimension_numbers = #tpu.dot_dimension_numbers<[1], [0], [0], [1], [0, 0, 1, 1], [], []>} : vector<64x512xbf16>, vector<512x128xbf16>, vector<64x128xf32> -> vector<64x128xf32>
    %66 = arith.addf %61, %65 : vector<64x128xf32>
    %67 = vector.shape_cast %66 : vector<64x128xf32> to vector<1x8x8x128xf32>
    %c0_83 = arith.constant 0 : index
    %c0_84 = arith.constant 0 : index
    %c0_85 = arith.constant 0 : index
    %c0_86 = arith.constant 0 : index
    %68 = vector.load %arg6[%c0_83, %c0_84, %c0_85, %c0_86] : memref<1x8x8x128xf32, #tpu.memory_space<vmem>>, vector<1x8x8x128xf32>
    tpu.vector_store %arg6[%c0_83, %c0_84, %c0_85, %c0_86], %67 {strides = array<i32>} : memref<1x8x8x128xf32, #tpu.memory_space<vmem>>, vector<1x8x8x128xf32>,
    return
  }
  func.func @transform_0(%arg0: i32) -> (i32, i32, i32, i32) {
    %c0_i32 = arith.constant 0 : i32
    %c0_i32_0 = arith.constant 0 : i32
    %c0_i32_1 = arith.constant 0 : i32
    %c0_i32_2 = arith.constant 0 : i32
    return %arg0, %c0_i32, %c0_i32_0, %c0_i32_1 : i32, i32, i32, i32
  }
  func.func @transform_1(%arg0: i32) -> (i32, i32) {
    %c0_i32 = arith.constant 0 : i32
    %c0_i32_0 = arith.constant 0 : i32
    %c0_i32_1 = arith.constant 0 : i32
    return %c0_i32, %c0_i32_0 : i32, i32
  }
  func.func @transform_2(%arg0: i32) -> (i32, i32) {
    %c0_i32 = arith.constant 0 : i32
    %c0_i32_0 = arith.constant 0 : i32
    %c0_i32_1 = arith.constant 0 : i32
    return %c0_i32, %c0_i32_0 : i32, i32
  }
  func.func @transform_3(%arg0: i32) -> (i32, i32) {
    %c0_i32 = arith.constant 0 : i32
    %c0_i32_0 = arith.constant 0 : i32
    %c0_i32_1 = arith.constant 0 : i32
    return %c0_i32, %c0_i32_0 : i32, i32
  }
  func.func @transform_4(%arg0: i32) -> (i32, i32) {
    %c0_i32 = arith.constant 0 : i32
    %c0_i32_0 = arith.constant 0 : i32
    %c0_i32_1 = arith.constant 0 : i32
    return %c0_i32, %c0_i32_0 : i32, i32
  }
  func.func @transform_5(%arg0: i32) -> (i32, i32, i32, i32) {
    %c0_i32 = arith.constant 0 : i32
    %c0_i32_0 = arith.constant 0 : i32
    %c0_i32_1 = arith.constant 0 : i32
    %c0_i32_2 = arith.constant 0 : i32
    return %arg0, %c0_i32, %c0_i32_0, %c0_i32_1 : i32, i32, i32, i32
  }
}

</mosaic_0001>

<bundles_post_ra>
// kernel: tpu_custom_call.1
= control target key start
LH: loop header
LB: loop body
LE: loop exit
PB: predicated region body
PF: predicated region fallthrough
CT: control target
= control target key end

     0   :  { %10 = vsyncpa [#allocation4], 0  ;;  %s7352_s0 = inlined_call_operand.vmem [shape: bf16[2,9,9,16], index: 0, kind: input, shape index: {}]   ;;  %s7353_s1 = inlined_call_operand.vmem [shape: bf16[64,640], index: 1, kind: input, shape index: {}]   ;;  %s7354_s2 = inlined_call_operand.vmem [shape: f32[1,512], index: 2, kind: input, shape index: {}]   ;;  %s7355_s3 = inlined_call_operand.hbm [shape: bf16[2048,128], index: 3, kind: input, shape index: {}]   ;;  %s7356_s4 = inlined_call_operand.vmem [shape: f32[1,128], index: 4, kind: input, shape index: {}]   ;;  %s7357_s5 = inlined_call_operand.hbm [shape: f32[2,8,8,128], index: 5, kind: output, shape index: {}]  }
   0x1   :  { %11 = vsyncpa [#allocation5], 0 }
   0x2   :  { %13 = vsyncpa [#allocation5 + $0x1], 0  ;;  %s5908_s18 = smov 0   ;;  %s5910_s19 = smov 0  }
   0x3   :  { %s5912_s20 = smov 0   ;;  %s5914_s21 = smov 0  }
   0x4 LB: > { %s5929_s22 = sadd.s32 4294967295, %s5869_s21   ;;  %s4813_s23 = sadd.s32 4294967294, %s5869_s21   ;;  %s5869_s21 = sphi %s5914_s21, %s7467_s21   ;;  %s5865_s20 = sphi %s5912_s20, %s7466_s20   ;;  %s5861_s19 = sphi %s5910_s19, %s7465_s19   ;;  %s5857_s18 = sphi %s5908_s18, %s7464_s18  }
   0x5   : > { %s5933_s24 = sadd.s32 1, %s5869_s21   ;;  %s136_s25 = sadd.s32 1, %s5865_s20 }
   0x6   : > { %s133_s26 = ssub.s32 %s5869_s21, %s5933_s24  ;;  %p146_p0 = scmp.ne.s32.totalorder %s5865_s20, %s5861_s19 }
   0x7   : > { %p134_p1 = scmp.eq.s32.totalorder %s133_s26, 0  ;;  %p147_p2 = scmp.eq.s32.totalorder %s5929_s22, 1 }
   0x8   : > { %p152_p3 = scmp.ne.s32.totalorder %s5861_s19, %s5857_s18  ;;  %p153_p4 = scmp.eq.s32.totalorder %s4813_s23, 1 }
   0x9   : > { %s5944_s27 = scalar_select %p134_p1, %s5865_s20, %s136_s25  }
   0xa   : > { %p5946_p5 = por %p147_p2, %p146_p0  ;;  %p5950_p6 = por %p153_p4, %p152_p3 }
   0xb   : > { %p4814_p7 = scmp.ge.s32.totalorder %s5869_s21, 1  ;;  %p160_p8 = scmp.lt.s32.totalorder %s5869_s21, 3 }
   0xc   : > { %s7361_s29 = scalar_select %p5950_p6, 1, 0 }
   0xd   : > { %p5573_p9 = scmp.eq.s32.totalorder %s5929_s22, 0  ;;  %p5957_p10 = pnand %p4814_p7, %p160_p8 }
   0xe   : > { %s5871_s6 = smov [#allocation3]  }
   0xf   : > { %s178_s7 = sshll.u32 %s5871_s6, 4  ;;  %p5565_p11 = pneg %p5957_p10  ;;  %s179_s7 = int_to_ptr.vmem [resolvable:$true] %s178_s7 }
  0x10   : > { %s5790_s8 = scalar_lea.vmem %s179_s7, 16384  ;;  %p5798_p3 = scmp.lt.s32.totalorder %s179_s7, %s179_s7 }
  0x11   : > { %p5566_p12 = pnand %p5573_p9, %p5565_p11  ;;  %p5791_p0 = scmp.ne.s32.totalorder %s179_s7, %s5790_s8 }
  0x12   : > { %p5799_p4 = scmp.lt.s32.totalorder %s5790_s8, %s5790_s8 }
  0x13   : > { %p5781_p13 = pneg %p5566_p12 }
  0x14   : > { %p5800_p6 = por %p5799_p4, %p5798_p3 }
  0x15   : > { %p5793_p1 = pnand %p5791_p0, %p5781_p13 }
  0x17   : > { %p5794_p2 = pneg %p5793_p1 }
  0x19   : > { %p5801_p7 = pnand %p5800_p6, %p5794_p2 }
  0x1b   : > { %5804 = shalt.err (!%p5801_p7)
}
  0x1c   : > { %s5872_s9 = smov 64   ;;  %s5873_s10 = smov 4  }
  0x1d   : > { %5568 = dma.hbm_to_vmem [thread:$0]  (!%p5566_p12), %s7355_s3, 16384, %s179_s7, [#allocation4], %s5872_s9, %s5872_s9, %s5873_s10  }
  0x1e   : > { %205 = sbr.rel (%p5957_p10) target bundleno = 771 (0x303), region = 40 }
  0x23   : > { %5848 = dma.done.wait (%p5573_p9), [#allocation4], 16384  }
  0x24   : > { %5850 = vsyncadd (%p5573_p9), [#allocation4], 4294950912  ;;  %p233_p8 = scmp.lt.s32.totalorder %s5929_s22, 1  ;;  %v5874_v0 = vmov 0   ;;  %v5614_v1 = vld [vmem:[%s7353_s1 + $0x2c] ss:$20 sps:$4 sm:$0xff]  }
  0x25   : > { %465 = vmatprep.mubr.bf16.mxu0 %v5874_v0  ;;  %1774 = vst [vmem:[#allocation2] sm:$0xff] %v5874_v0  ;;  %1775 = vst [vmem:[#allocation2 + $0x8] sm:$0xff] %v5874_v0  ;;  %548 = vmatprep.mubr.bf16.mxu1 %v5874_v0  ;;  %vm261_vm0 = vsmask.f32 3328  ;;  %v5616_v2 = vld [vmem:[%s7353_s1 + $0x28] ss:$20 sps:$4 sm:$0xff]  }
  0x26   : > { %1790 = vst [vmem:[#allocation2 + $0x100] sm:$0xff] %v5874_v0  ;;  %1791 = vst [vmem:[#allocation2 + $0x108] sm:$0xff] %v5874_v0  ;;  %s234_s13 = scalar_select %p233_p8, %s5929_s22, 1  ;;  %vm262_vm1 = vsmask.f32 7440  ;;  %447 = vmatprep.subr.bf16.mxu0 %v5614_v1  ;;  %vm420_vm2 = vcmask 130048  }
  0x27   : > { %v5617_v3 = vld [vmem:[%s7353_s1 + $0x34] ss:$20 sps:$4 sm:$0xff]   ;;  %v5999_v4 = vld [vmem:[%s7353_s1 + $0x30] ss:$20 sps:$4 sm:$0xff]   ;;  %448 = vmatpush1.bf16.msra.mxu0 %v5616_v2  ;;  %vm6031_vm3 = vmor %vm261_vm0, %vm262_vm1  ;;  %v7363_v32 = vmov 0  ;;  %vm1776_vm4 = vcmask 1040384  }
  0x28   : > { %s5558_s14 = smul.u32 72, %s234_s13  ;;  %5556 = vmatprep.subr.bf16.mxu1 %v5617_v3  ;;  %520 = vmatprep.subr.bf16.mxu0 %v5617_v3  ;;  %v7364_v32 = vsel %vm6031_vm3, 4294967295, %v7363_v32  ;;  %v5620_v63 = vld [vmem:[%s7353_s1] ss:$20 sps:$4 sm:$0xff]   ;;  %vm1777_vm5 = vsmask.f32 256 }
  0x29   : > { %5557 = vmatpush1.bf16.msra.mxu1 %v5999_v4  ;;  %7365 = vst [vmem:[#allocation9_spill] sm:$0xff] %v7364_v32  ;;  %vm1779_vm6 = vcmask 1044484   ;;  %vm1780_vm7 = vsmask.f32 4352  ;;  %vm6325_vm8 = vmand %vm1776_vm4, %vm1777_vm5  ;;  %vm2090_vm11 = vcmask 1043456   ;;  %s230_s15 = sand.u32 1, %s5861_s19  }
  0x2a   : > { %s5985_s17 = scalar_lea.vmem %s7352_s0, %s5558_s14  ;;  %vm1781_vm9 = vmand %vm1779_vm6, %vm1780_vm7  ;;  %vm2091_vm12 = vsmask.f32 7938  ;;  %s4819_s16 = sshll.u32 %s230_s15, 6 }
  0x2b   : > { %v6002_v5 = vld [vmem:[%s5985_s17] sm:$0xf]  ;;  %v6005_v6 = vld [vmem:[%s5985_s17 + $0x8] sm:$0xf]  ;;  %v253_v7 = vld [vmem:[%s5985_s17 + $0x4] sm:$0x1] }
  0x2c   : > { %v254_v8 = vld [vmem:[%s5985_s17 + $0xc] sm:$0x1]  ;;  %v265_v9 = vshrl.u32 %v6002_v5, 16  ;;  %v268_v10 = vshll.u32 %v6002_v5, 16  ;;  %v274_v11 = vshll.u32 %v253_v7, 16  ;;  %v279_v12 = vshrl.u32 %v6005_v6, 16  ;;  %vm6331_vm10 = vmor %vm1781_vm9, %vm6325_vm8 }
  0x2d   : > { %v6013_v13 = vld [vmem:[%s5985_s17 + $0x10] sm:$0xf]  ;;  %v282_v14 = vshll.u32 %v6005_v6, 16  ;;  %v288_v15 = vshll.u32 %v254_v8, 16  ;;  %v6018_v16 = vld [vmem:[%s5985_s17 + $0x18] sm:$0xf]  ;;  %vm6670_vm13 = vmand %vm2090_vm11, %vm2091_vm12 }
  0x2e   : > { %v255_v17 = vld [vmem:[%s5985_s17 + $0x14] sm:$0x1]  ;;  %v267_v18 = vrot.slane %v265_v9, 4  ;;  %v270_v19 = vrot.slane %v268_v10, 5  ;;  %v276_v20 = vrot.slane %v274_v11, 5  ;;  %v281_v21 = vrot.slane %v279_v12, 4 }
  0x2f   : > { %v256_v22 = vld [vmem:[%s5985_s17 + $0x1c] sm:$0x1]  ;;  %v284_v23 = vrot.slane %v282_v14, 5  ;;  %v290_v24 = vrot.slane %v288_v15, 5  ;;  %v293_v25 = vshrl.u32 %v6013_v13, 16  ;;  %v296_v26 = vshll.u32 %v6013_v13, 16 }
  0x30   : > { %v271_v27 = vor.u32 %v270_v19, %v267_v18  ;;  %v302_v28 = vshll.u32 %v255_v17, 16  ;;  %v307_v29 = vshrl.u32 %v6018_v16, 16  ;;  %v310_v30 = vshll.u32 %v6018_v16, 16  ;;  %v6027_v31 = vld [vmem:[%s5985_s17 + $0x20] sm:$0xf]  ;;  %s7248_s23 = scalar_lea.vmem [#allocation6], %s4819_s16 }
  0x31   : > { %v285_v33 = vor.u32 %v284_v23, %v281_v21  ;;  %v295_v34 = vrot.slane %v293_v25, 4  ;;  %v298_v35 = vrot.slane %v296_v26, 5  ;;  %v316_v36 = vshll.u32 %v256_v22, 16  ;;  %v257_v37 = vld [vmem:[%s5985_s17 + $0x24] sm:$0x1]  ;;  %s5175_s25 = sshll.u32 %s5929_s22, 10 }
  0x32   : > { %v272_v38 = vrot.slane %v271_v27, 4  ;;  %v304_v39 = vrot.slane %v302_v28, 5  ;;  %v309_v40 = vrot.slane %v307_v29, 4  ;;  %v312_v41 = vrot.slane %v310_v30, 5  ;;  %v6037_v42 = vld [vmem:[%s5985_s17 + $0x28] sm:$0xf]  ;;  %s7305_s7 = scalar_lea.hbm %s7357_s5, %s5175_s25 }
  0x33   : > { %v286_v43 = vrot.slane %v285_v33, 4  ;;  %v299_v44 = vor.u32 %v298_v35, %v295_v34  ;;  %v318_v45 = vrot.slane %v316_v36, 5  ;;  %v321_v46 = vshrl.u32 %v6027_v31, 16  ;;  %v258_v49 = vld [vmem:[%s5985_s17 + $0x2c] sm:$0x1]  ;;  %s4739_s26 = sshll.u32 %s7248_s23, 4  ;;  %s7307_s26 = int_to_ptr.vmem [resolvable:$true] %s4739_s26 }
  0x34   : > { %v277_v47 = vsel %vm6031_vm3, %v272_v38, %v276_v20  ;;  %v313_v48 = vor.u32 %v312_v41, %v309_v40  ;;  %v324_v50 = vshll.u32 %v6027_v31, 16  ;;  %v330_v51 = vshll.u32 %v257_v37, 16  ;;  %v6045_v52 = vld [vmem:[%s5985_s17 + $0x30] sm:$0xf]  ;;  %v6051_v57 = vld [vmem:[%s5985_s17 + $0x38] sm:$0xf] }
  0x35   : > { %v291_v53 = vsel %vm6031_vm3, %v286_v43, %v290_v24  ;;  %v300_v54 = vrot.slane %v299_v44, 4  ;;  %v323_v55 = vrot.slane %v321_v46, 4  ;;  %v335_v56 = vshrl.u32 %v6037_v42, 16  ;;  %v259_v61 = vld [vmem:[%s5985_s17 + $0x34] sm:$0x1]  ;;  %s7312_s8 = scalar_lea.sflag [#allocation5], %s230_s15 }
  0x36   : > { %v6053_v58 = vcombine.low %v277_v47, %v291_v53  ;;  %v314_v59 = vrot.slane %v313_v48, 4  ;;  %v326_v60 = vrot.slane %v324_v50, 5  ;;  %v260_v62 = vld [vmem:[%s5985_s17 + $0x3c] sm:$0x1]  ;;  %v338_v3 = vshll.u32 %v6037_v42, 16  ;;  %s5805_s22 = scalar_lea.vmem %s7307_s26, 1024 }
  0x37   : > { %v305_v1 = vsel %vm6031_vm3, %v300_v54, %v304_v39  ;;  %v337_v2 = vrot.slane %v335_v56, 4  ;;  %v344_v7 = vshll.u32 %v258_v49, 16  ;;  %v5622_v8 = vld [vmem:[%s7353_s1 + $0x4] ss:$20 sps:$4 sm:$0xff]   ;;  %v349_v11 = vshrl.u32 %v6045_v52, 16  ;;  %p5806_p6 = scmp.ne.s32.totalorder %s7307_s26, %s5805_s22  ;;  %s5875_s9 = smov [#allocation6]  }
  0x38   : > { %4830 = vmatmul.mubr.msk.bf16.vlgmr.msra.gmra.mxu0 %vm420_vm2, %v6053_v58  ;;  %v319_v9 = vsel %vm6031_vm3, %v314_v59, %v318_v45  ;;  %v327_v10 = vor.u32 %v326_v60, %v323_v55  ;;  %v352_v12 = vshll.u32 %v6045_v52, 16  ;;  %v332_v15 = vrot.slane %v330_v51, 5  ;;  %v6079_v19 = vld [vmem:[%s7353_s1 + $0x38] ss:$20 sps:$4 sm:$0xff]   ;;  %716 = vmatprep.subr.bf16.mxu1 %v5622_v8  ;;  %v6092_v34 = vld [vmem:[%s7353_s1 + $0x10] ss:$20 sps:$4 sm:$0xff]  }
  0x39   : > { %521 = vmatpush1.bf16.msra.mxu0 %v5999_v4  ;;  %v6073_v14 = vcombine.low %v305_v1, %v319_v9  ;;  %475 = vmatprep.mubr.bf16.mxu0 %v5874_v0  ;;  %v340_v17 = vrot.slane %v338_v3, 5  ;;  %v346_v18 = vrot.slane %v344_v7, 5  ;;  %v351_v21 = vrot.slane %v349_v11, 4  ;;  %v4892_v45 = vld [vmem:[%s5985_s17 + $0x8] sm:$0xf]  ;;  %p5807_p9 = pnand %p5806_p6, %p5946_p5 }
  0x3a   : > { %v328_v20 = vrot.slane %v327_v10, 4  ;;  %v354_v22 = vrot.slane %v352_v12, 5  ;;  %v363_v23 = vshrl.u32 %v6051_v57, 16  ;;  %v358_v24 = vshll.u32 %v259_v61, 16  ;;  %5516 = vmatprep.subr.bf16.mxu0 %v6079_v19  ;;  %v4893_v46 = vld [vmem:[%s5985_s17 + $0xc] sm:$0x1] }
  0x3b   : > { %4835 = vmatmul.mubr.msk.bf16.vlgmr.msra.gmra.mxu1 %vm420_vm2, %v6073_v14  ;;  %v341_v4 = vor.u32 %v340_v17, %v337_v2  ;;  %v366_v25 = vshll.u32 %v6051_v57, 16  ;;  %v372_v26 = vshll.u32 %v260_v62, 16  ;;  %v4894_v47 = vld [vmem:[%s5985_s17 + $0x10] sm:$0xf]  ;;  %v1254_v49 = vshrl.u32 %v4892_v45, 16  ;;  %p5808_p10 = pneg %p5807_p9 }
  0x3c   : > { %558 = vmatprep.mubr.bf16.mxu1 %v5874_v0  ;;  %v355_v27 = vor.u32 %v354_v22, %v351_v21  ;;  %v365_v28 = vrot.slane %v363_v23, 4  ;;  %717 = vmatpush1.bf16.msra.mxu1 %v5620_v63  ;;  %v333_v29 = vsel %vm6031_vm3, %v328_v20, %v332_v15  ;;  %v360_v36 = vrot.slane %v358_v24, 5  ;;  %v4896_v53 = vld [vmem:[%s5985_s17 + $0x18] sm:$0xf]  ;;  %v4895_v54 = vld [vmem:[%s5985_s17 + $0x14] sm:$0x1] }
  0x3d   : > { %v342_v30 = vrot.slane %v341_v4, 4  ;;  %v368_v33 = vrot.slane %v366_v25, 5  ;;  %5526 = vmatprep.subr.bf16.mxu1 %v6092_v34  ;;  %v374_v40 = vrot.slane %v372_v26, 5  ;;  %v1257_v50 = vshll.u32 %v4892_v45, 16  ;;  %v4898_v56 = vld [vmem:[%s5985_s17 + $0x20] sm:$0xf] }
  0x3e   : > { %v356_v39 = vrot.slane %v355_v27, 4  ;;  %v1268_v51 = vshrl.u32 %v4894_v47, 16  ;;  %v1271_v55 = vshll.u32 %v4894_v47, 16  ;;  %v1256_v59 = vrot.slane %v1254_v49, 4  ;;  %v4897_v62 = vld [vmem:[%s5985_s17 + $0x1c] sm:$0x1] }
  0x3f   : > { %v347_v35 = vsel %vm6031_vm3, %v342_v30, %v346_v18  ;;  %v369_v37 = vor.u32 %v368_v33, %v365_v28  ;;  %v1259_v60 = vrot.slane %v1257_v50, 5  ;;  %v1263_v63 = vshll.u32 %v4893_v46, 16  ;;  %v4899_v12 = vld [vmem:[%s5985_s17 + $0x24] sm:$0x1]  ;;  %v4900_v17 = vld [vmem:[%s5985_s17 + $0x28] sm:$0xf] }
  0x40   : > { %4831 = vmatmul.mubr.msk.bf16.gmra.mxu0 %vm420_vm2, %v6073_v14  ;;  %v6099_v38 = vcombine.low %v333_v29, %v347_v35  ;;  %v361_v43 = vsel %vm6031_vm3, %v356_v39, %v360_v36  ;;  %v1270_v61 = vrot.slane %v1268_v51, 4  ;;  %v1273_v1 = vrot.slane %v1271_v55, 5  ;;  %v4902_v24 = vld [vmem:[%s5985_s17 + $0x30] sm:$0xf]  ;;  %v4901_v27 = vld [vmem:[%s5985_s17 + $0x2c] sm:$0x1] }
  0x41   : > { %485 = vmatprep.mubr.bf16.mxu0 %v5874_v0  ;;  %v370_v41 = vrot.slane %v369_v37, 4  ;;  %v1282_v2 = vshrl.u32 %v4896_v53, 16  ;;  %v1285_v3 = vshll.u32 %v4896_v53, 16  ;;  %v1277_v7 = vshll.u32 %v4895_v54, 16  ;;  %v5637_v35 = vld [vmem:[%s7353_s1 + $0x5c] ss:$20 sps:$4 sm:$0xff]  }
  0x42   : > { %v1296_v8 = vshrl.u32 %v4898_v56, 16  ;;  %v1299_v9 = vshll.u32 %v4898_v56, 16  ;;  %v1260_v10 = vor.u32 %v1259_v60, %v1256_v59  ;;  %v1274_v11 = vor.u32 %v1273_v1, %v1270_v61  ;;  %v4903_v39 = vld [vmem:[%s5985_s17 + $0x34] sm:$0x1]  ;;  %v4904_v45 = vld [vmem:[%s5985_s17 + $0x38] sm:$0xf] }
  0x43   : > { %4836 = vmatmul.mubr.msk.bf16.gmra.mxu1 %vm420_vm2, %v6099_v38  ;;  %v375_v44 = vsel %vm6031_vm3, %v370_v41, %v374_v40  ;;  %v1291_v15 = vshll.u32 %v4897_v62, 16  ;;  %v1284_v18 = vrot.slane %v1282_v2, 4  ;;  %v1287_v20 = vrot.slane %v1285_v3, 5  ;;  %v6153_v47 = vld [vmem:[%s5985_s17 + $0x3c] sm:$0x1] }
  0x44   : > { %568 = vmatprep.mubr.bf16.mxu1 %v5874_v0  ;;  %v6112_v48 = vcombine.low %v361_v43, %v375_v44  ;;  %v1298_v21 = vrot.slane %v1296_v8, 4  ;;  %v1301_v22 = vrot.slane %v1299_v9, 5  ;;  %v6128_v23 = vcombine.low %v6002_v5, %v6005_v6  ;;  %v4906_v49 = vld [vmem:[%s5985_s17 + $0x40] sm:$0xf] }
  0x45   : > { %v6130_v4 = vrot.slane %v1263_v63, 5  ;;  %v6133_v25 = vrot.slane %v1277_v7, 5  ;;  %v1305_v26 = vshll.u32 %v4899_v12, 16  ;;  %v1310_v28 = vshrl.u32 %v4900_v17, 16  ;;  %v5628_v50 = vld [vmem:[%s7353_s1 + $0xc] ss:$20 sps:$4 sm:$0xff]  }
  0x46   : > { %v1313_v29 = vshll.u32 %v4900_v17, 16  ;;  %v6138_v30 = vrot.slane %v1260_v10, 4  ;;  %v6140_v33 = vrot.slane %v1274_v11, 4  ;;  %v6142_v5 = vrot.slane %v1291_v15, 5  ;;  %v6170_v63 = vld [vmem:[%s5985_s17 + $0x44] sm:$0x1] }
  0x47   : > { %v1324_v6 = vshrl.u32 %v4902_v24, 16  ;;  %v1288_v36 = vor.u32 %v1287_v20, %v1284_v18  ;;  %v1302_v37 = vor.u32 %v1301_v22, %v1298_v21  ;;  %v1312_v40 = vrot.slane %v1310_v28, 4  ;;  %v5626_v12 = vld [vmem:[%s7353_s1 + $0x8] ss:$20 sps:$4 sm:$0xff]   ;;  %v5639_v20 = vld [vmem:[%s5985_s17 + $0x18] ss:$8 sps:$4 sm:$0xff]  }
  0x48   : > { %4832 = vmatmul.mubr.msk.bf16.gmra.mxu0 %vm420_vm2, %v6099_v38  ;;  %v1315_v41 = vrot.slane %v1313_v29, 5  ;;  %v1319_v43 = vshll.u32 %v4901_v27, 16  ;;  %v1327_v44 = vshll.u32 %v4902_v24, 16  ;;  %v6161_v51 = vrot.slane %v1305_v26, 5  ;;  %v5648_v21 = vld [vmem:[%s7353_s1 + $0x84] ss:$20 sps:$4 sm:$0xff]  }
  0x49   : > { %495 = vmatprep.mubr.bf16.mxu0 %v5874_v0  ;;  %v1326_v53 = vrot.slane %v1324_v6, 4  ;;  %v1333_v55 = vshll.u32 %v4903_v39, 16  ;;  %v6163_v56 = vrot.slane %v1288_v36, 4  ;;  %v6165_v59 = vrot.slane %v1302_v37, 4  ;;  %v5641_v22 = vld [vmem:[%s5985_s17 + $0x28] ss:$8 sps:$4 sm:$0xff]  }
  0x4a   : > { %v1316_v46 = vor.u32 %v1315_v41, %v1312_v40  ;;  %v1329_v54 = vrot.slane %v1327_v44, 5  ;;  %v1338_v60 = vshrl.u32 %v4904_v45, 16  ;;  %v1341_v61 = vshll.u32 %v4904_v45, 16  ;;  %v5778_v24 = vld [vmem:[#allocation2] sm:$0xff] }
  0x4b   : > { %4837 = vmatmul.mubr.msk.bf16.gmra.mxu1 %vm420_vm2, %v6112_v48  ;;  %v6167_v62 = vrot.slane %v1319_v43, 5  ;;  %v1352_v1 = vshrl.u32 %v4906_v49, 16  ;;  %v1347_v3 = vshll.u32 %v6153_v47, 16  ;;  %v6179_v8 = vrot.slane %v1333_v55, 5  ;;  %v5646_v6 = vld [vmem:[%s7353_s1 + $0x80] ss:$20 sps:$4 sm:$0xff]  }
  0x4c   : > { %734 = vmatprep.mubr.bf16.mxu1 %v5874_v0  ;;  %v6174_v2 = vrot.slane %v1316_v46, 4  ;;  %v1330_v7 = vor.u32 %v1329_v54, %v1326_v53  ;;  %v1355_v9 = vshll.u32 %v4906_v49, 16  ;;  %v6184_v10 = vrot.slane %v1338_v60, 4  ;;  %v1786_v46 = vld [vmem:[#allocation2 + $0x18] sm:$0x11]  ;;  %v5652_v53 = vld [vmem:[#allocation3 + $0xf0] sm:$0xff]  }
  0x4d   : > { %v6186_v11 = vrot.slane %v1341_v61, 5  ;;  %v4844_v17 = vcombine.low %v6027_v31, %v6037_v42  ;;  %v4845_v18 = vcombine.low %v6045_v52, %v6051_v57  ;;  %v5632_v31 = vld [vmem:[%s7353_s1 + $0x50] ss:$20 sps:$4 sm:$0xff]   ;;  %v5640_v42 = vld [vmem:[%s7353_s1 + $0x60] ss:$20 sps:$4 sm:$0xff]   ;;  %v1266_v26 = vsel %vm6031_vm3, %v6138_v30, %v6130_v4 }
  0x4e   : > { %v6201_v15 = vrot.slane %v1355_v9, 5  ;;  %v5635_v52 = vld [vmem:[%s7353_s1 + $0x58] ss:$20 sps:$4 sm:$0xff]   ;;  %v5645_v57 = vld [vmem:[%s7353_s1 + $0x7c] ss:$20 sps:$4 sm:$0xff]   ;;  %v1280_v27 = vsel %vm6031_vm3, %v6140_v33, %v6133_v25  ;;  %v1308_v4 = vsel %vm6031_vm3, %v6165_v59, %v6161_v51  ;;  %v1322_v25 = vsel %vm6031_vm3, %v6174_v2, %v6167_v62  ;;  %v5657_v9 = vld [vmem:[#allocation3 + $0xa0] sm:$0xff]  }
  0x4f   : > { %v4908_v28 = vcombine.low %v1266_v26, %v1280_v27  ;;  %v1344_v33 = vor.u32 %v6186_v11, %v6184_v10  ;;  %v1349_v37 = vrot.slane %v1347_v3, 5  ;;  %v1787_v49 = vsel %vm6331_vm10, 0, %v1786_v46  ;;  %v5651_v51 = vld [vmem:[#allocation3 + $0xb8] sm:$0xff]   ;;  %v5653_v55 = vld [vmem:[#allocation3 + $0xb0] sm:$0xff]   ;;  %v1813_v10 = vld [vmem:[#allocation2 + $0x48] sm:$0x11] }
  0x50   : > { %4833 = vmatmul.mubr.msk.bf16.gmra.mxu0 %vm420_vm2, %v6112_v48  ;;  %1788 = vst [vmem:[#allocation2 + $0x18] sm:$0x11] %v1787_v49  ;;  %v1861_v61 = vld [vmem:[#allocation2 + $0x38] sm:$0x11]  ;;  %v1814_v11 = vsel %vm6331_vm10, 0, %v1813_v10  ;;  %v5672_v10 = vld [vmem:[#allocation3 + $0x68] sm:$0xff]  }
  0x51   : > { %538 = vmatprep.mubr.bf16.mxu0 %v5874_v0  ;;  %v1345_v36 = vrot.slane %v1344_v33, 4  ;;  %v1862_v62 = vsel %vm6331_vm10, 0, %v1861_v61  ;;  %v1867_v3 = vld [vmem:[#allocation2 + $0x58] sm:$0x11]  ;;  %1815 = vst [vmem:[#allocation2 + $0x48] sm:$0x11] %v1814_v11 }
  0x52   : > { %1863 = vst [vmem:[#allocation2 + $0x38] sm:$0x11] %v1862_v62  ;;  %v1891_v33 = vld [vmem:[#allocation2 + $0xd8] sm:$0x11]  ;;  %v1858_v61 = vld [vmem:[#allocation2 + $0x30] sm:$0x11] }
  0x53   : > { %4851 = vmatmul.mubr.msk.bf16.vlgmr.msra.gmra.mxu1 %vm420_vm2, %v6128_v23  ;;  %v1350_v41 = vsel %vm6031_vm3, %v1345_v36, %v1349_v37  ;;  %v1892_v36 = vsel %vm6331_vm10, 0, %v1891_v33  ;;  %v5665_v37 = vld [vmem:[#allocation3 + $0x38] sm:$0xff]  }
  0x54   : > { %744 = vmatprep.mubr.bf16.mxu1 %v5874_v0  ;;  %5527 = vmatpush3.bf16.msra.mxu1 %v6092_v34  ;;  %v4843_v34 = vcombine.low %v6013_v13, %v6018_v16  ;;  %v6188_v13 = vrot.slane %v1352_v1, 4  ;;  %v1361_v16 = vshll.u32 %v6170_v63, 16  ;;  %v5654_v63 = vld [vmem:[#allocation3 + $0xe8] sm:$0xff]   ;;  %1893 = vst [vmem:[#allocation2 + $0xd8] sm:$0x11] %v1892_v36  ;;  %v5670_v62 = vld [vmem:[#allocation3 + $0x1f8] sm:$0xff]  }
  0x55   : > { %1073 = vmatprep.subr.bf16.mxu1 %v5637_v35  ;;  %v5655_v1 = vld [vmem:[#allocation3 + $0xa8] sm:$0xff]   ;;  %v1897_v49 = vld [vmem:[#allocation2 + $0xf8] sm:$0x11] }
  0x56   : > { %v1363_v40 = vrot.slane %v1361_v16, 5  ;;  %v5658_v16 = vld [vmem:[#allocation3 + $0xd8] sm:$0xff]  }
  0x57   : > { %v1855_v54 = vld [vmem:[#allocation2 + $0x18] sm:$0x11] }
  0x58   : > { %4834 = vmatmul.mubr.msk.bf16.vlgmr.msra.gmra.mxu0 %vm420_vm2, %v6053_v58  ;;  %v1856_v59 = vsel %vm6331_vm10, 0, %v1855_v54  ;;  %v5680_v36 = vld [vmem:[#allocation3 + $0x58] sm:$0xff]  }
  0x59   : > { %5517 = vmatpush3.bf16.msra.mxu0 %v6079_v19  ;;  %5518 = vmatprep.mubr.msk.bf16.mxu0 %vm420_vm2, %v6053_v58  ;;  %v5634_v58 = vld [vmem:[%s7353_s1 + $0x54] ss:$20 sps:$4 sm:$0xff]   ;;  %v6199_v19 = vrot.slane %v1330_v7, 4  ;;  %1857 = vst [vmem:[#allocation2 + $0x18] sm:$0x11] %v1856_v59  ;;  %v5656_v7 = vld [vmem:[#allocation3 + $0xe0] sm:$0xff]  }
  0x5a   : > { %789 = vmatprep.subr.bf16.mxu0 %v5628_v50  ;;  %v5650_v50 = vld [vmem:[#allocation3 + $0xf8] sm:$0xff]  }
  0x5b   : > { %4852 = vmatmul.mubr.msk.bf16.gmra.mxu1 %vm420_vm2, %v4843_v34  ;;  %v1336_v30 = vsel %vm6031_vm3, %v6199_v19, %v6179_v8  ;;  %v1868_v8 = vsel %vm6331_vm10, 0, %v1867_v3 }
  0x5c   : > { %754 = vmatprep.mubr.bf16.mxu1 %v5874_v0  ;;  %v4910_v35 = vcombine.low %v1322_v25, %v1336_v30  ;;  %1869 = vst [vmem:[#allocation2 + $0x58] sm:$0x11] %v1868_v8 }
  0x60   : > { %5519 = vmatmul.mubr.msk.bf16.vlgmr.msra.gmra.mxu0 %vm420_vm2, %v6073_v14  ;;  %v5638_v14 = vld [vmem:[%s5985_s17 + $0x8] ss:$8 sps:$4 sm:$0xff]  }
  0x61   : > { %790 = vmatpush1.bf16.msra.mxu0 %v5626_v12  ;;  %5522 = vmatprep.mubr.msk.bf16.mxu0 %vm420_vm2, %v6099_v38  ;;  %v5643_v38 = vld [vmem:[%s7353_s1 + $0x78] ss:$20 sps:$4 sm:$0xff]  }
  0x62   : > { %1000 = vmatprep.subr.bf16.mxu0 %v5634_v58  ;;  %v5659_v58 = vld [vmem:[#allocation3 + $0x98] sm:$0xff]  }
  0x63   : > { %4853 = vmatmul.mubr.msk.bf16.gmra.mxu1 %vm420_vm2, %v4844_v17 }
  0x64   : > { %764 = vmatprep.mubr.bf16.mxu1 %v5874_v0 }
  0x68   : > { %5523 = vmatmul.mubr.msk.bf16.gmra.mxu0 %vm420_vm2, %v6112_v48  ;;  %v5649_v48 = vld [vmem:[%s7353_s1 + $0x88] ss:$20 sps:$4 sm:$0xff]  }
  0x69   : > { %807 = vmatprep.mubr.bf16.mxu0 %v5874_v0 }
  0x6b   : > { %4854 = vmatmul.mubr.msk.bf16.gmra.mxu1 %vm420_vm2, %v4845_v18 }
  0x6c   : > { %5528 = vmatprep.mubr.msk.bf16.mxu1 %vm420_vm2, %v6128_v23 }
  0x70   : > { %4855 = vmatmul.mubr.msk.bf16.vlgmr.msra.gmra.mxu0 %vm420_vm2, %v6128_v23  ;;  %v5642_v23 = vld [vmem:[%s5985_s17 + $0x38] ss:$8 sps:$4 sm:$0xff]   ;;  %s5809_s17 = sshll.u32 %s5875_s9, 4  ;;  %s5810_s17 = int_to_ptr.vmem [resolvable:$false] %s5809_s17 }
  0x71   : > { %1001 = vmatpush1.bf16.msra.mxu0 %v5632_v31  ;;  %817 = vmatprep.mubr.bf16.mxu0 %v5874_v0  ;;  %v1879_v31 = vld [vmem:[#allocation2 + $0x98] sm:$0x11]  ;;  %s5811_s10 = scalar_lea.vmem %s5810_s17, 2048  ;;  %p5812_p11 = scmp.lt.s32.totalorder %s7307_s26, %s5810_s17 }
  0x72   : > { %5536 = vmatprep.subr.bf16.mxu0 %v5640_v42  ;;  %p5813_p12 = scmp.lt.s32.totalorder %s5811_s10, %s5805_s22 }
  0x73   : > { %5529 = vmatmul.mubr.msk.bf16.vlgmr.msra.gmra.mxu1 %vm420_vm2, %v4843_v34 }
  0x74   : > { %5532 = vmatprep.mubr.msk.bf16.mxu1 %vm420_vm2, %v4844_v17  ;;  %1074 = vmatpush1.bf16.msra.mxu1 %v5635_v52  ;;  %p5814_p13 = por %p5813_p12, %p5812_p11 }
  0x75   : > { %1435 = vmatprep.subr.bf16.mxu1 %v5645_v57  ;;  %v1880_v57 = vsel %vm6331_vm10, 0, %v1879_v31 }
  0x76   : > { %1881 = vst [vmem:[#allocation2 + $0x98] sm:$0x11] %v1880_v57  ;;  %p5815_p0 = pnand %p5814_p13, %p5808_p10 }
  0x78   : > { %4856 = vmatmul.mubr.msk.bf16.gmra.mxu0 %vm420_vm2, %v4843_v34  ;;  %v1807_v34 = vld [vmem:[#allocation2 + $0x28] sm:$0x11] }
  0x79   : > { %827 = vmatprep.mubr.bf16.mxu0 %v5874_v0  ;;  %v1808_v2 = vsel %vm6331_vm10, 0, %v1807_v34  ;;  %v5669_v34 = vld [vmem:[#allocation3 + $0x30] sm:$0xff]  }
  0x7a   : > { %1809 = vst [vmem:[#allocation2 + $0x28] sm:$0x11] %v1808_v2 }
  0x7b   : > { %5533 = vmatmul.mubr.msk.bf16.gmra.mxu1 %vm420_vm2, %v4845_v18 }
  0x7c   : > { %1091 = vmatprep.mubr.bf16.mxu1 %v5874_v0 }
  0x80   : > { %4857 = vmatmul.mubr.msk.bf16.gmra.mxu0 %vm420_vm2, %v4844_v17 }
  0x81   : > { %837 = vmatprep.mubr.bf16.mxu0 %v5874_v0 }
  0x83   : > { %4884 = vmatmul.mubr.msk.bf16.vlgmr.msra.gmra.mxu1 %vm420_vm2, %v5638_v14 }
  0x84   : > { %1101 = vmatprep.mubr.bf16.mxu1 %v5874_v0  ;;  %1436 = vmatpush1.bf16.msra.mxu1 %v5643_v38 }
  0x85   : > { %5546 = vmatprep.subr.bf16.mxu1 %v5649_v48 }
  0x88   : > { %4858 = vmatmul.mubr.msk.bf16.gmra.mxu0 %vm420_vm2, %v4845_v18 }
  0x89   : > { %1018 = vmatprep.mubr.bf16.mxu0 %v5874_v0 }
  0x8b   : > { %4885 = vmatmul.mubr.msk.bf16.gmra.mxu1 %vm420_vm2, %v5639_v20 }
  0x8c   : > { %1111 = vmatprep.mubr.bf16.mxu1 %v5874_v0 }
  0x90   : > { %4880 = vmatmul.mubr.msk.bf16.vlgmr.msra.gmra.mxu0 %vm420_vm2, %v5638_v14 }
  0x91   : > { %5537 = vmatpush3.bf16.msra.mxu0 %v5640_v42  ;;  %1028 = vmatprep.mubr.bf16.mxu0 %v5874_v0  ;;  %v5660_v42 = vld [vmem:[#allocation3 + $0xd0] sm:$0xff]  }
  0x92   : > { %1508 = vmatprep.subr.bf16.mxu0 %v5648_v21 }
  0x93   : > { %4886 = vmatmul.mubr.msk.bf16.gmra.mxu1 %vm420_vm2, %v5641_v22 }
  0x94   : > { %1121 = vmatprep.mubr.bf16.mxu1 %v5874_v0 }
  0x98   : > { %4881 = vmatmul.mubr.msk.bf16.gmra.mxu0 %vm420_vm2, %v5639_v20 }
  0x99   : > { %1038 = vmatprep.mubr.bf16.mxu0 %v5874_v0  ;;  %v1294_v0 = vsel %vm6031_vm3, %v6163_v56, %v6142_v5  ;;  %v1358_v5 = vor.u32 %v6201_v15, %v6188_v13  ;;  %v1801_v56 = vld [vmem:[#allocation2 + $0x8] sm:$0x11]  ;;  %v1873_v13 = vld [vmem:[#allocation2 + $0x78] sm:$0x11] }
  0x9a   : > { %v4909_v29 = vcombine.low %v1294_v0, %v1308_v4  ;;  %v1802_v60 = vsel %vm6331_vm10, 0, %v1801_v56  ;;  %v1874_v12 = vsel %vm6331_vm10, 0, %v1873_v13  ;;  %v1819_v15 = vld [vmem:[#allocation2 + $0x68] sm:$0x11] }
  0x9b   : > { %4887 = vmatmul.mubr.msk.bf16.gmra.mxu1 %vm420_vm2, %v5642_v23  ;;  %v1359_v39 = vrot.slane %v1358_v5, 4  ;;  %1803 = vst [vmem:[#allocation2 + $0x8] sm:$0x11] %v1802_v60  ;;  %1875 = vst [vmem:[#allocation2 + $0x78] sm:$0x11] %v1874_v12  ;;  %v1820_v17 = vsel %vm6331_vm10, 0, %v1819_v15 }
  0x9c   : > { %1453 = vmatprep.mubr.bf16.mxu1 %v5778_v24  ;;  %1821 = vst [vmem:[#allocation2 + $0x68] sm:$0x11] %v1820_v17  ;;  %v5664_v5 = vld [vmem:[#allocation3 + $0x78] sm:$0xff]   ;;  %v1843_v56 = vld [vmem:[#allocation2 + $0xe8] sm:$0x11]  ;;  %v5676_v17 = vld [vmem:[#allocation3 + $0x60] sm:$0xff]  }
  0x9d   : > { %v1364_v43 = vsel %vm6031_vm3, %v1359_v39, %v1363_v40  ;;  %v5667_v39 = vld [vmem:[#allocation3 + $0x80] sm:$0xff]   ;;  %v1844_v60 = vsel %vm6331_vm10, 0, %v1843_v56  ;;  %v5673_v13 = vld [vmem:[#allocation3 + $0x28] sm:$0xff]   ;;  %v1864_v15 = vld [vmem:[#allocation2 + $0x50] sm:$0x11] }
  0x9e   : > { %v4911_v44 = vcombine.low %v1350_v41, %v1364_v43  ;;  %v1837_v43 = vld [vmem:[#allocation2 + $0xc8] sm:$0x11]  ;;  %1845 = vst [vmem:[#allocation2 + $0xe8] sm:$0x11] %v1844_v60  ;;  %v5684_v56 = vld [vmem:[#allocation3 + $0x50] sm:$0xff]  }
  0x9f   : > { %v1838_v46 = vsel %vm6331_vm10, 0, %v1837_v43  ;;  %v5681_v43 = vld [vmem:[#allocation3 + $0x18] sm:$0xff]  }
  0xa0   : > { %4882 = vmatmul.mubr.msk.bf16.gmra.mxu0 %vm420_vm2, %v5641_v22  ;;  %1839 = vst [vmem:[#allocation2 + $0xc8] sm:$0x11] %v1838_v46 }
  0xa1   : > { %1048 = vmatprep.mubr.bf16.mxu0 %v5778_v24 }
  0xa3   : > { %4917 = vmatmul.mubr.msk.bf16.vlgmr.msra.gmra.mxu1 %vm420_vm2, %v4908_v28 }
  0xa4   : > { %1463 = vmatprep.mubr.bf16.mxu1 %v5778_v24  ;;  %5547 = vmatpush3.bf16.msra.mxu1 %v5649_v48 }
  0xa5   : > { %5236 = vmatprep.subr.bf16.mxu1 %v5650_v50 }
  0xa8   : > { %4883 = vmatmul.mubr.msk.bf16.gmra.mxu0 %vm420_vm2, %v5642_v23 }
  0xa9   : > { %5538 = vmatprep.mubr.msk.bf16.mxu0 %vm420_vm2, %v5638_v14  ;;  %v5661_v14 = vld [vmem:[#allocation3 + $0x90] sm:$0xff]  }
  0xab   : > { %4918 = vmatmul.mubr.msk.bf16.gmra.mxu1 %vm420_vm2, %v4909_v29 }
  0xac   : > { %1473 = vmatprep.mubr.bf16.mxu1 %v5778_v24 }
  0xb0   : > { %5539 = vmatmul.mubr.msk.bf16.vlgmr.msra.gmra.mxu0 %vm420_vm2, %v5639_v20  ;;  %v1825_v20 = vld [vmem:[#allocation2 + $0x88] sm:$0x11] }
  0xb1   : > { %1509 = vmatpush1.bf16.msra.mxu0 %v5646_v6  ;;  %5542 = vmatprep.mubr.msk.bf16.mxu0 %vm420_vm2, %v5641_v22  ;;  %v1826_v22 = vsel %vm6331_vm10, 0, %v1825_v20  ;;  %v5666_v6 = vld [vmem:[#allocation3 + $0xc0] sm:$0xff]  }
  0xb2   : > { %1827 = vst [vmem:[#allocation2 + $0x88] sm:$0x11] %v1826_v22  ;;  %5196 = vmatprep.subr.bf16.mxu0 %v5664_v5  ;;  %v5677_v20 = vld [vmem:[#allocation3 + $0x20] sm:$0xff]  }
  0xb3   : > { %4919 = vmatmul.mubr.msk.bf16.gmra.mxu1 %vm420_vm2, %v4910_v35 }
  0xb4   : > { %1483 = vmatprep.mubr.bf16.mxu1 %v5778_v24 }
  0xb8   : > { %5543 = vmatmul.mubr.msk.bf16.gmra.mxu0 %vm420_vm2, %v5642_v23  ;;  %v1885_v23 = vld [vmem:[#allocation2 + $0xb8] sm:$0x11] }
  0xb9   : > { %1526 = vmatprep.mubr.bf16.mxu0 %v5778_v24  ;;  %v1886_v27 = vsel %vm6331_vm10, 0, %v1885_v23  ;;  %v1810_v23 = vld [vmem:[#allocation2 + $0x40] sm:$0x11] }
  0xba   : > { %1887 = vst [vmem:[#allocation2 + $0xb8] sm:$0x11] %v1886_v27 }
  0xbb   : > { %4920 = vmatmul.mubr.msk.bf16.gmra.mxu1 %vm420_vm2, %v4911_v44 }
  0xbc   : > { %5548 = vmatprep.mubr.msk.bf16.mxu1 %vm420_vm2, %v4908_v28 }
  0xc0   : > { %4921 = vmatmul.mubr.msk.bf16.vlgmr.msra.gmra.mxu0 %vm420_vm2, %v4908_v28  ;;  %v5663_v28 = vld [vmem:[#allocation3 + $0x88] sm:$0xff]  }
  0xc1   : > { %1536 = vmatprep.mubr.bf16.mxu0 %v5778_v24  ;;  %5197 = vmatpush3.bf16.msra.mxu0 %v5665_v37 }
  0xc3   : > { %5549 = vmatmul.mubr.msk.bf16.vlgmr.msra.gmra.mxu1 %vm420_vm2, %v4909_v29 }
  0xc4   : > { %5552 = vmatprep.mubr.msk.bf16.mxu1 %vm420_vm2, %v4910_v35  ;;  %5237 = vmatpush3.bf16.msra.mxu1 %v5651_v51  ;;  %v1898_v51 = vsel %vm6331_vm10, 0, %v1897_v49 }
  0xc5   : > { %5238 = vmatprep.subr.bf16.mxu1 %v5652_v53  ;;  %v5668_v53 = vld [vmem:[#allocation3 + $0x70] sm:$0xff]   ;;  %1899 = vst [vmem:[#allocation2 + $0xf8] sm:$0x11] %v1898_v51 }
  0xc6   : > { %5198 = vmatprep.subr.bf16.mxu0 %v5668_v53  ;;  %v1876_v53 = vld [vmem:[#allocation2 + $0x90] sm:$0x11] }
  0xc7   : > { %5199 = vmatpush3.bf16.msra.mxu0 %v5669_v34 }
  0xc8   : > { %4922 = vmatmul.mubr.msk.bf16.gmra.mxu0 %vm420_vm2, %v4909_v29  ;;  %5239 = vmatpush3.bf16.msra.mxu1 %v5653_v55  ;;  %v1831_v29 = vld [vmem:[#allocation2 + $0xa8] sm:$0x11] }
  0xc9   : > { %1546 = vmatprep.mubr.bf16.mxu0 %v5778_v24  ;;  %5240 = vmatprep.subr.bf16.mxu1 %v5654_v63  ;;  %v1832_v30 = vsel %vm6331_vm10, 0, %v1831_v29  ;;  %v1870_v29 = vld [vmem:[#allocation2 + $0x70] sm:$0x11] }
  0xca   : > { %1833 = vst [vmem:[#allocation2 + $0xa8] sm:$0x11] %v1832_v30  ;;  %5200 = vmatprep.subr.bf16.mxu0 %v5672_v10 }
  0xcb   : > { %5553 = vmatmul.mubr.msk.bf16.gmra.mxu1 %vm420_vm2, %v4911_v44  ;;  %5201 = vmatpush3.bf16.msra.mxu0 %v5673_v13  ;;  %v1882_v13 = vld [vmem:[#allocation2 + $0xb0] sm:$0x11] }
  0xcc   : > { %5241 = vmatpush3.bf16.msra.mxu1 %v5655_v1  ;;  %v1859_v1 = vsel %vm6331_vm10, 0, %v1858_v61  ;;  %5202 = vmatprep.subr.bf16.mxu0 %v5676_v17 }
  0xcd   : > { %5242 = vmatprep.subr.bf16.mxu1 %v5656_v7  ;;  %1860 = vst [vmem:[#allocation2 + $0x30] sm:$0x11] %v1859_v1  ;;  %v1804_v7 = vld [vmem:[#allocation2 + $0x20] sm:$0x11]  ;;  %v5685_v1 = vld [vmem:[#allocation3 + $0x10] sm:$0xff]  }
  0xcf   : > { %5203 = vmatpush3.bf16.msra.mxu0 %v5677_v20 }
  0xd0   : > { %4923 = vmatmul.mubr.msk.bf16.gmra.mxu0 %vm420_vm2, %v4910_v35  ;;  %5243 = vmatpush3.bf16.msra.mxu1 %v5657_v9  ;;  %v1805_v9 = vsel %vm6331_vm10, 0, %v1804_v7 }
  0xd1   : > { %1556 = vmatprep.mubr.bf16.mxu0 %v5778_v24  ;;  %5244 = vmatprep.subr.bf16.mxu1 %v5658_v16  ;;  %v5662_v24 = vld [vmem:[#allocation3 + $0xc8] sm:$0xff]   ;;  %1806 = vst [vmem:[#allocation2 + $0x20] sm:$0x11] %v1805_v9  ;;  %v1822_v9 = vld [vmem:[#allocation2 + $0x80] sm:$0x11] }
  0xd2   : > { %5204 = vmatprep.subr.bf16.mxu0 %v5680_v36 }
  0xd3   : > { %5205 = vmatpush3.bf16.msra.mxu0 %v5681_v43 }
  0xd4   : > { %5245 = vmatpush3.bf16.msra.mxu1 %v5659_v58  ;;  %5206 = vmatprep.subr.bf16.mxu0 %v5684_v56 }
  0xd5   : > { %5246 = vmatprep.subr.bf16.mxu1 %v5660_v42  ;;  %v1865_v42 = vsel %vm6331_vm10, 0, %v1864_v15  ;;  %v5688_v15 = vld [vmem:[#allocation3 + $0x48] sm:$0xff]  }
  0xd6   : > { %1866 = vst [vmem:[#allocation2 + $0x50] sm:$0x11] %v1865_v42  ;;  %v5689_v42 = vld [vmem:[#allocation3 + $0x8] sm:$0xff]  }
  0xd7   : > { %5207 = vmatpush3.bf16.msra.mxu0 %v5685_v1 }
  0xd8   : > { %4924 = vmatmul.mubr.msk.bf16.gmra.mxu0 %vm420_vm2, %v4911_v44  ;;  %5247 = vmatpush3.bf16.msra.mxu1 %v5661_v14 }
  0xd9   : > { %5248 = vmatprep.subr.bf16.mxu1 %v5662_v24  ;;  %5208 = vmatprep.subr.bf16.mxu0 %v5688_v15 }
  0xdb   : > { %5209 = vmatpush3.bf16.msra.mxu0 %v5689_v42 }
  0xdc   : > { %5249 = vmatpush3.bf16.msra.mxu1 %v5663_v28  ;;  %v1811_v28 = vsel %vm6331_vm10, 0, %v1810_v23  ;;  %v1828_v23 = vld [vmem:[#allocation2 + $0xa0] sm:$0x11] }
  0xdd   : > { %5250 = vmatprep.subr.bf16.mxu1 %v5666_v6  ;;  %1812 = vst [vmem:[#allocation2 + $0x40] sm:$0x11] %v1811_v28  ;;  %v1816_v6 = vld [vmem:[#allocation2 + $0x60] sm:$0x11] }
  0xe0   : > { %5251 = vmatpush3.bf16.msra.mxu1 %v5667_v39  ;;  %v1817_v39 = vsel %vm6331_vm10, 0, %v1816_v6 }
  0xe1   : > { %5316 = vmatprep.subr.bf16.mxu1 %v5670_v62  ;;  %1818 = vst [vmem:[#allocation2 + $0x60] sm:$0x11] %v1817_v39  ;;  %v1877_v62 = vsel %vm6331_vm10, 0, %v1876_v53  ;;  %v1834_v53 = vld [vmem:[#allocation2 + $0xc0] sm:$0x11] }
  0xe2   : > { %1878 = vst [vmem:[#allocation2 + $0x90] sm:$0x11] %v1877_v62  ;;  %v1894_v62 = vld [vmem:[#allocation2 + $0xf0] sm:$0x11] }
  0xf8   : > { %v6351_v19 = vpop.f32.mrf.mxu0 }
  0xfa   : > { %v6355_v18 = vpop.f32.mrf.mxu0 }
  0xfb   : > { %v6357_v52 = vpop.f32.mrf.mxu1 }
  0xfc   : > { %v6361_v38 = vpop.f32.mrf.mxu0 }
  0xfd   : > { %v6363_v48 = vpop.f32.mrf.mxu1 }
  0xfe   : > { %v6365_v21 = vpop.f32.mrf.mxu0 }
  0xff   : > { %v6369_v26 = vpop.f32.mrf.mxu1 }
 0x100   : > { %v6373_v0 = vpop.f32.mrf.mxu0 }
 0x101   : > { %v6375_v4 = vpop.f32.mrf.mxu1 }
 0x102   : > { %v6377_v25 = vpop.f32.mrf.mxu0 }
 0x103   : > { %v6381_v35 = vpop.f32.mrf.mxu1 }
 0x104   : > { %v6385_v40 = vpop.f32.mrf.mxu0 }
 0x105   : > { %v6387_v41 = vpop.f32.mrf.mxu1 }
 0x106   : > { %v6389_v44 = vpop.f32.mrf.mxu0 }
 0x107   : > { %v6393_v50 = vpop.f32.mrf.mxu1 }
 0x108   : > { %v6397_v54 = vpop.f32.mrf.mxu0 }
 0x109   : > { %v6399_v55 = vpop.f32.mrf.mxu1 }
 0x10a   : > { %v6401_v59 = vpop.f32.mrf.mxu0 }
 0x10b   : > { %v6405_v63 = vpop.f32.mrf.mxu1 }
 0x10c   : > { %v6409_v2 = vpop.f32.mrf.mxu0 }
 0x10d   : > { %v6411_v3 = vpop.f32.mrf.mxu1 }
 0x10e   : > { %v6413_v8 = vpop.f32.mrf.mxu0 }
 0x10f   : > { %v6417_v11 = vpop.f32.mrf.mxu1 }
 0x110   : > { %v6419_v16 = vpop.f32.mrf.mxu0 }
 0x111   : > { %v6421_v12 = vpop.f32.mrf.mxu1 }
 0x112   : > { %v6423_v58 = vpop.f32.mrf.mxu0 }
 0x113   : > { %v736_v31 = vpop.f32.mrf.mxu1 }
 0x114   : > { %v6428_v57 = vadd.f32 %v736_v31, %v6351_v19  ;;  %v6430_v14 = vpop.f32.mrf.mxu0  ;;  %v1871_v19 = vsel %vm6331_vm10, 0, %v1870_v29  ;;  %v1883_v31 = vsel %vm6331_vm10, 0, %v1882_v13  ;;  %v1829_v29 = vsel %vm6331_vm10, 0, %v1828_v23  ;;  %v1840_v13 = vld [vmem:[#allocation2 + $0xe0] sm:$0x11] }
 0x115   : > { %v738_v22 = vpop.f32.mrf.mxu1  ;;  %1872 = vst [vmem:[#allocation2 + $0x70] sm:$0x11] %v1871_v19  ;;  %1884 = vst [vmem:[#allocation2 + $0xb0] sm:$0x11] %v1883_v31  ;;  %v5692_v19 = vld [vmem:[#allocation3 + $0x40] sm:$0xff]   ;;  %v1841_v31 = vsel %vm6331_vm10, 0, %v1840_v13 }
 0x116   : > { %v6433_v24 = vadd.f32 %v738_v22, %v6355_v18  ;;  %v6435_v27 = vpop.f32.mrf.mxu0  ;;  %1830 = vst [vmem:[#allocation2 + $0xa0] sm:$0x11] %v1829_v29  ;;  %5210 = vmatprep.subr.bf16.mxu0 %v5692_v19  ;;  %1842 = vst [vmem:[#allocation2 + $0xe0] sm:$0x11] %v1841_v31 }
 0x117   : > { %v740_v30 = vpop.f32.mrf.mxu1 }
 0x118   : > { %v6442_v33 = vadd.f32 %v740_v30, %v6361_v38  ;;  %v6444_v5 = vpop.f32.mrf.mxu0  ;;  %v1888_v30 = vld [vmem:[#allocation2 + $0xd0] sm:$0x11] }
 0x119   : > { %v6446_v18 = vpop.f32.mrf.mxu1  ;;  %v1889_v39 = vsel %vm6331_vm10, 0, %v1888_v30 }
 0x11a   : > { %v6448_v37 = vpop.f32.mrf.mxu0  ;;  %1890 = vst [vmem:[#allocation2 + $0xd0] sm:$0x11] %v1889_v39 }
 0x11b   : > { %v746_v46 = vpop.f32.mrf.mxu1 }
 0x11c   : > { %v6453_v49 = vadd.f32 %v746_v46, %v6373_v0  ;;  %v6455_v38 = vpop.f32.mrf.mxu0 }
 0x11d   : > { %v748_v51 = vpop.f32.mrf.mxu1 }
 0x11e   : > { %v6458_v60 = vadd.f32 %v748_v51, %v6377_v25  ;;  %v6460_v61 = vpop.f32.mrf.mxu0  ;;  %v1823_v25 = vsel %vm6331_vm10, 0, %v1822_v9 }
 0x11f   : > { %v750_v34 = vpop.f32.mrf.mxu1  ;;  %1824 = vst [vmem:[#allocation2 + $0x80] sm:$0x11] %v1823_v25 }
 0x120   : > { %v6465_v0 = vadd.f32 %v750_v34, %v6385_v40  ;;  %v5520_v7 = vpop.f32.mrf.mxu0  ;;  %v1895_v34 = vsel %vm6331_vm10, 0, %v1894_v62 }
 0x121   : > { %v6467_v10 = vpop.f32.mrf.mxu1  ;;  %1896 = vst [vmem:[#allocation2 + $0xf0] sm:$0x11] %v1895_v34 }
 0x122   : > { %v613_v17 = vpop.f32.mrf.mxu0 }
 0x123   : > { %v756_v20 = vpop.f32.mrf.mxu1 }
 0x124   : > { %v6474_v40 = vadd.f32 %v756_v20, %v6397_v54  ;;  %v5521_v22 = vpop.f32.mrf.mxu0  ;;  %v5693_v54 = vld [vmem:[#allocation3] sm:$0xff]  }
 0x125   : > { %v758_v28 = vpop.f32.mrf.mxu1  ;;  %5211 = vmatpush3.bf16.msra.mxu0 %v5693_v54 }
 0x126   : > { %v6479_v6 = vadd.f32 %v758_v28, %v6401_v59  ;;  %v6481_v36 = vpop.f32.mrf.mxu0  ;;  %v1835_v59 = vsel %vm6331_vm10, 0, %v1834_v53  ;;  %v1792_v53 = vld [vmem:[#allocation2 + $0x110] sm:$0x11] }
 0x127   : > { %v760_v43 = vpop.f32.mrf.mxu1  ;;  %1836 = vst [vmem:[#allocation2 + $0xc0] sm:$0x11] %v1835_v59  ;;  %v1846_v59 = vld [vmem:[#allocation2 + $0x100] sm:$0x11] }
 0x128   : > { %v6486_v46 = vadd.f32 %v760_v43, %v6409_v2  ;;  %v5524_v51 = vpop.f32.mrf.mxu0 }
 0x129   : > { %v6488_v56 = vpop.f32.mrf.mxu1 }
 0x12a   : > { %v629_v1 = vpop.f32.mrf.mxu0 }
 0x12b   : > { %v766_v9 = vpop.f32.mrf.mxu1 }
 0x12c   : > { %v6495_v25 = vadd.f32 %v766_v9, %v6419_v16  ;;  %v5525_v2 = vpop.f32.mrf.mxu0  ;;  %v1847_v9 = vsel %vm6331_vm10, 0, %v1846_v59 }
 0x12d   : > { %v768_v15 = vpop.f32.mrf.mxu1  ;;  %1848 = vst [vmem:[#allocation2 + $0x100] sm:$0x11] %v1847_v9 }
 0x12e   : > { %v6500_v42 = vadd.f32 %v768_v15, %v6423_v58  ;;  %v6502_v20 = vpop.f32.mrf.mxu0 }
 0x12f   : > { %v770_v23 = vpop.f32.mrf.mxu1 }
 0x130   : > { %v6505_v28 = vadd.f32 %v770_v23, %v6430_v14  ;;  %v809_v29 = vpop.f32.mrf.mxu0  ;;  %v1793_v14 = vsel %vm6331_vm10, 0, %v1792_v53 }
 0x131   : > { %v6507_v30 = vpop.f32.mrf.mxu1  ;;  %v810_v16 = vadd.f32 %v809_v29, %v6444_v5  ;;  %1794 = vst [vmem:[#allocation2 + $0x110] sm:$0x11] %v1793_v14  ;;  %v1798_v14 = vld [vmem:[#allocation2] sm:$0x11] }
 0x132   : > { %v811_v19 = vpop.f32.mrf.mxu0 }
 0x133   : > { %v5530_v39 = vpop.f32.mrf.mxu1  ;;  %v6511_v54 = vadd.f32 %v811_v19, %v6448_v37 }
 0x134   : > { %v6513_v43 = vadd.f32 %v5530_v39, %v5520_v7  ;;  %v813_v58 = vpop.f32.mrf.mxu0 }
 0x135   : > { %v882_v62 = vpop.f32.mrf.mxu1  ;;  %v814_v34 = vadd.f32 %v813_v58, %v6455_v38  ;;  %v1783_v58 = vld [vmem:[#allocation2 + $0x10] sm:$0x11] }
 0x136   : > { %v6520_v5 = vadd.f32 %v882_v62, %v613_v17  ;;  %v6522_v13 = vpop.f32.mrf.mxu0 }
 0x137   : > { %v5531_v37 = vpop.f32.mrf.mxu1 }
 0x138   : > { %v6524_v7 = vadd.f32 %v5531_v37, %v5521_v22  ;;  %v819_v15 = vpop.f32.mrf.mxu0  ;;  %v1900_v62 = vld [vmem:[#allocation2 + $0x110] sm:$0x11]  ;;  %v1799_v37 = vsel %vm6331_vm10, 0, %v1798_v14 }
 0x139   : > { %v6526_v31 = vpop.f32.mrf.mxu1  ;;  %v820_v38 = vadd.f32 %v819_v15, %v6357_v52  ;;  %v1901_v52 = vsel %vm6331_vm10, 0, %v1900_v62  ;;  %1800 = vst [vmem:[#allocation2] sm:$0x11] %v1799_v37 }
 0x13a   : > { %7370 = vst [vmem:[#allocation10_spill] sm:$0xff] %v6524_v7  ;;  %v821_v23 = vpop.f32.mrf.mxu0  ;;  %1902 = vst [vmem:[#allocation2 + $0x110] sm:$0x11] %v1901_v52 }
 0x13b   : > { %v5534_v29 = vpop.f32.mrf.mxu1  ;;  %v822_v19 = vadd.f32 %v821_v23, %v6363_v48  ;;  %v5696_v48 = vld [vmem:[#allocation3 + $0x178] sm:$0xff]  }
 0x13c   : > { %v6530_v39 = vadd.f32 %v5534_v29, %v5524_v51  ;;  %v823_v17 = vpop.f32.mrf.mxu0  ;;  %v1784_v51 = vsel %vm6331_vm10, 0, %v1783_v58  ;;  %5276 = vmatprep.subr.bf16.mxu0 %v5696_v48 }
 0x13d   : > { %v898_v53 = vpop.f32.mrf.mxu1  ;;  %v824_v59 = vadd.f32 %v823_v17, %v6369_v26  ;;  %1785 = vst [vmem:[#allocation2 + $0x10] sm:$0x11] %v1784_v51 }
 0x13e   : > { %7371 = vst [vmem:[#allocation11_spill] sm:$0xff] %v6530_v39  ;;  %v6533_v22 = vadd.f32 %v898_v53, %v629_v1  ;;  %v6535_v9 = vpop.f32.mrf.mxu0 }
 0x13f   : > { %v5535_v15 = vpop.f32.mrf.mxu1 }
 0x140   : > { %7372 = vst [vmem:[#allocation12_spill] sm:$0xff] %v6533_v22  ;;  %v6543_v26 = vadd.f32 %v5535_v15, %v5525_v2  ;;  %v829_v1 = vpop.f32.mrf.mxu0  ;;  %v1795_v22 = vld [vmem:[#allocation2 + $0x118] sm:$0x11] }
 0x141   : > { %v6545_v23 = vpop.f32.mrf.mxu1  ;;  %v830_v29 = vadd.f32 %v829_v1, %v6381_v35 }
 0x142   : > { %7373 = vst [vmem:[#allocation13_spill] sm:$0xff] %v6543_v26  ;;  %v831_v17 = vpop.f32.mrf.mxu0 }
 0x143   : > { %v1093_v53 = vpop.f32.mrf.mxu1  ;;  %v832_v62 = vadd.f32 %v831_v17, %v6387_v41 }
 0x144   : > { %v6549_v14 = vadd.f32 %v1093_v53, %v810_v16  ;;  %v833_v32 = vpop.f32.mrf.mxu0  ;;  %v1852_v2 = vld [vmem:[#allocation2 + $0x10] sm:$0x11] }
 0x145   : > { %v6551_v58 = vpop.f32.mrf.mxu1  ;;  %v834_v52 = vadd.f32 %v833_v32, %v6393_v50  ;;  %v1853_v48 = vsel %vm6331_vm10, 0, %v1852_v2  ;;  %v1849_v2 = vld [vmem:[#allocation2 + $0x108] sm:$0x11] }
 0x146   : > { %7374 = vst [vmem:[#allocation14_spill] sm:$0xff] %v6549_v14  ;;  %v835_v37 = vpop.f32.mrf.mxu0  ;;  %1854 = vst [vmem:[#allocation2 + $0x10] sm:$0x11] %v1853_v48  ;;  %v1850_v48 = vsel %vm6331_vm10, 0, %v1849_v2 }
 0x147   : > { %v1097_v51 = vpop.f32.mrf.mxu1  ;;  %1851 = vst [vmem:[#allocation2 + $0x108] sm:$0x11] %v1850_v48  ;;  %v836_v2 = vadd.f32 %v835_v37, %v6399_v55  ;;  %v1672_v55 = vld [vmem:[%s7354_s2] sm:$0xf] }
 0x148   : > { %v6556_v15 = vadd.f32 %v1097_v51, %v814_v34  ;;  %v839_v35 = vpop.f32.mrf.mxu0 }
 0x149   : > { %v6558_v1 = vpop.f32.mrf.mxu1  ;;  %v840_v41 = vadd.f32 %v839_v35, %v6405_v63 }
 0x14a   : > { %7375 = vst [vmem:[#allocation15_spill] sm:$0xff] %v6556_v15  ;;  %7376 = vst [vmem:[#allocation16_spill] sm:$0xff] %v6558_v1  ;;  %v841_v16 = vpop.f32.mrf.mxu0 }
 0x14b   : > { %v1103_v17 = vpop.f32.mrf.mxu1  ;;  %v6562_v53 = vadd.f32 %v841_v16, %v6411_v3 }
 0x14c   : > { %v6564_v32 = vadd.f32 %v1103_v17, %v820_v38  ;;  %v843_v50 = vpop.f32.mrf.mxu0 }
 0x14d   : > { %7377 = vst [vmem:[#allocation17_spill] sm:$0xff] %v6562_v53  ;;  %v1105_v14 = vpop.f32.mrf.mxu1  ;;  %v844_v26 = vadd.f32 %v843_v50, %v6417_v11 }
 0x14e   : > { %7378 = vst [vmem:[#allocation18_spill] sm:$0xff] %v6564_v32  ;;  %v6567_v34 = vadd.f32 %v1105_v14, %v822_v19  ;;  %v845_v51 = vpop.f32.mrf.mxu0  ;;  %v1674_v14 = vlaneseq }
 0x14f   : > { %v1107_v15 = vpop.f32.mrf.mxu1 }
 0x150   : > { %7379 = vst [vmem:[#allocation19_spill] sm:$0xff] %v6567_v34  ;;  %v6571_v63 = vadd.f32 %v1107_v15, %v824_v59  ;;  %v1020_v35 = vpop.f32.mrf.mxu0 }
 0x151   : > { %v6573_v3 = vpop.f32.mrf.mxu1 }
 0x152   : > { %7380 = vst [vmem:[#allocation20_spill] sm:$0xff] %v6571_v63  ;;  %7381 = vst [vmem:[#allocation21_spill] sm:$0xff] %v6573_v3  ;;  %v1022_v38 = vpop.f32.mrf.mxu0  ;;  %v1675_v3 = vshrl.u32 %v1674_v14, 7 }
 0x153   : > { %v1113_v16 = vpop.f32.mrf.mxu1  ;;  %v1198_v39 = vadd.f32 %v1022_v38, %v6433_v24 }
 0x154   : > { %v6575_v17 = vadd.f32 %v1113_v16, %v830_v29  ;;  %v1024_v53 = vpop.f32.mrf.mxu0 }
 0x155   : > { %v1115_v11 = vpop.f32.mrf.mxu1 }
 0x156   : > { %7382 = vst [vmem:[#allocation22_spill] sm:$0xff] %v6575_v17  ;;  %v6577_v50 = vadd.f32 %v1115_v11, %v832_v62  ;;  %v1026_v19 = vpop.f32.mrf.mxu0  ;;  %v1676_v11 = vsub.s32 0, %v1675_v3 }
 0x157   : > { %v1117_v34 = vpop.f32.mrf.mxu1 }
 0x158   : > { %7383 = vst [vmem:[#allocation23_spill] sm:$0xff] %v6577_v50  ;;  %v6580_v32 = vadd.f32 %v1117_v34, %v834_v52  ;;  %v1030_v59 = vpop.f32.mrf.mxu0  ;;  %v846_v52 = vadd.f32 %v845_v51, %v6421_v12  ;;  %v1796_v51 = vsel %vm6331_vm10, 0, %v1795_v22 }
 0x159   : > { %v1119_v15 = vpop.f32.mrf.mxu1  ;;  %1797 = vst [vmem:[#allocation2 + $0x118] sm:$0x11] %v1796_v51 }
 0x15a   : > { %7384 = vst [vmem:[#allocation24_spill] sm:$0xff] %v6580_v32  ;;  %v6582_v48 = vadd.f32 %v1119_v15, %v836_v2  ;;  %v1032_v63 = vpop.f32.mrf.mxu0  ;;  %v1680_v2 = vsub.s32 1, %v1675_v3  ;;  %v6597_v15 = vrot.slane %v1672_v55, %v1676_v11  ;;  %v1684_v32 = vsub.s32 2, %v1675_v3 }
 0x15b   : > { %v1123_v1 = vpop.f32.mrf.mxu1 }
 0x15c   : > { %7385 = vst [vmem:[#allocation25_spill] sm:$0xff] %v6582_v48  ;;  %v6584_v29 = vadd.f32 %v1123_v1, %v840_v41  ;;  %v1034_v16 = vpop.f32.mrf.mxu0  ;;  %v1197_v1 = vadd.f32 %v1020_v35, %v6428_v57  ;;  %v6600_v12 = vrot.slane %v1672_v55, %v1680_v2  ;;  %v743_v57 = vadd.f32 %v6446_v18, %v6365_v21 }
 0x15d   : > { %v6586_v17 = vpop.f32.mrf.mxu1  ;;  %v1202_v35 = vadd.f32 %v1024_v53, %v6442_v33  ;;  %v6608_v24 = vrot.slane %v1672_v55, %v1684_v32  ;;  %v763_v33 = vadd.f32 %v6488_v56, %v6413_v8  ;;  %v6629_v8 = vadd.f32 %v6526_v31, %v6481_v36 }
 0x15e   : > { %7386 = vst [vmem:[#allocation26_spill] sm:$0xff] %v6584_v29  ;;  %7387 = vst [vmem:[#allocation27_spill] sm:$0xff] %v6586_v17  ;;  %v1036_v62 = vpop.f32.mrf.mxu0  ;;  %v1688_v17 = vsub.s32 3, %v1675_v3  ;;  %v1203_v22 = vadd.f32 %v1026_v19, %v743_v57 }
 0x15f   : > { %v1127_v50 = vpop.f32.mrf.mxu1 }
 0x160   : > { %v6592_v37 = vadd.f32 %v1127_v50, %v844_v26  ;;  %v1040_v34 = vpop.f32.mrf.mxu0  ;;  %v6610_v38 = vrot.slane %v1672_v55, %v1688_v17 }
 0x161   : > { %v1129_v14 = vpop.f32.mrf.mxu1  ;;  %v1217_v51 = vadd.f32 %v1040_v34, %v6474_v40 }
 0x162   : > { %v6595_v41 = vadd.f32 %v1129_v14, %v846_v52  ;;  %v1042_v29 = vpop.f32.mrf.mxu0 }
 0x163   : > { %v1455_v48 = vpop.f32.mrf.mxu1  ;;  %v1218_v57 = vadd.f32 %v1042_v29, %v6479_v6 }
 0x164   : > { %v1632_v7 = vadd.f32 %v1455_v48, %v1197_v1  ;;  %v1044_v26 = vpop.f32.mrf.mxu0  ;;  %v753_v48 = vadd.f32 %v6467_v10, %v6389_v44  ;;  %v1207_v44 = vadd.f32 %v1030_v59, %v6453_v49  ;;  %v6641_v49 = vadd.f32 %v6551_v58, %v6511_v54  ;;  %v1903_v1 = vld [vmem:[#allocation2 + $0x118] sm:$0x11] }
 0x165   : > { %v1457_v50 = vpop.f32.mrf.mxu1 }
 0x166   : > { %v1694_v11 = vadd.f32 %v6597_v15, %v1632_v7  ;;  %v1633_v3 = vadd.f32 %v1457_v50, %v1198_v39  ;;  %v1046_v52 = vpop.f32.mrf.mxu0  ;;  %v6619_v7 = vadd.f32 %v6507_v30, %v6435_v27  ;;  %v6623_v39 = vadd.f32 %v6522_v13, %v6460_v61 }
 0x167   : > { %v1459_v14 = vpop.f32.mrf.mxu1  ;;  %v6633_v27 = vadd.f32 %v6535_v9, %v6375_v4  ;;  %v6637_v61 = vadd.f32 %v6545_v23, %v6502_v20  ;;  %v1208_v30 = vadd.f32 %v1032_v63, %v6458_v60  ;;  %v1212_v4 = vadd.f32 %v1034_v16, %v6465_v0 }
 0x168   : > { %v1695_v2 = vadd.f32 %v6600_v12, %v1633_v3  ;;  %v1637_v21 = vadd.f32 %v1459_v14, %v1202_v35  ;;  %v1050_v18 = vpop.f32.mrf.mxu0  ;;  %v1726_v53 = vmax.f32 %v1694_v11, 0.0  ;;  %v1213_v9 = vadd.f32 %v1036_v62, %v753_v48  ;;  %v2096_v35 = vld [vmem:[#allocation2 + $0x18] sm:$0x1] }
 0x169   : > { %v1461_v10 = vpop.f32.mrf.mxu1  ;;  %v1904_v23 = vsel %vm6331_vm10, 0, %v1903_v1  ;;  %v1222_v0 = vadd.f32 %v1044_v26, %v6486_v46  ;;  %v6654_v16 = vadd.f32 %v1046_v52, %v763_v33  ;;  %v6657_v48 = vadd.f32 %v1050_v18, %v6495_v25  ;;  %v2102_v18 = vld [vmem:[#allocation2 + $0x38] sm:$0x1] }
 0x16a   : > { %v1727_v32 = vmax.f32 %v1695_v2, 0.0  ;;  %v1698_v17 = vadd.f32 %v6597_v15, %v1637_v21  ;;  %v1638_v19 = vadd.f32 %v1461_v10, %v1203_v22  ;;  %v1052_v55 = vpop.f32.mrf.mxu0  ;;  %1905 = vst [vmem:[#allocation2 + $0x118] sm:$0x11] %v1904_v23 }
 0x16b   : > { %v1465_v56 = vpop.f32.mrf.mxu1  ;;  %v6660_v22 = vadd.f32 %v1052_v55, %v6500_v42  ;;  %v2093_v42 = vld [vmem:[#allocation2 + $0x8] sm:$0xf] }
 0x16c   : > { %v5159_v13 = vpack.c.bf16 %v1727_v32, %v1726_v53  ;;  %v1699_v59 = vadd.f32 %v6600_v12, %v1638_v19  ;;  %v1642_v36 = vadd.f32 %v1465_v56, %v1207_v44  ;;  %v1054_v31 = vpop.f32.mrf.mxu0  ;;  %v1730_v58 = vmax.f32 %v1698_v17, 0.0 }
 0x16d   : > { %v1467_v20 = vpop.f32.mrf.mxu1 }
 0x16e   : > { %1986 = vst [vmem:[#allocation2 + $0xc] sm:$0xf] %v5159_v13  ;;  %v1995_v54 = vshrl.u32 %v5159_v13, 16  ;;  %v1731_v50 = vmax.f32 %v1699_v59, 0.0  ;;  %v1702_v60 = vadd.f32 %v6597_v15, %v1642_v36  ;;  %v6650_v63 = vpop.f32.mrf.mxu0  ;;  %v1643_v40 = vadd.f32 %v1467_v20, %v1208_v30 }
 0x16f   : > { %v1469_v62 = vpop.f32.mrf.mxu1  ;;  %v1998_v34 = vshll.u32 %v5159_v13, 16  ;;  %v6679_v59 = vadd.f32 %v1054_v31, %v6505_v28 }
 0x170   : > { %v1997_v47 = vrot.slane %v1995_v54, 7  ;;  %v5161_v11 = vpack.c.bf16 %v1731_v50, %v1730_v58  ;;  %v1647_v3 = vadd.f32 %v1469_v62, %v1212_v4  ;;  %v5540_v14 = vpop.f32.mrf.mxu0  ;;  %v1703_v6 = vadd.f32 %v6600_v12, %v1643_v40  ;;  %v7390_v4 = vld [vmem:[#allocation10_spill] sm:$0xff] }
 0x171   : > { %v1471_v29 = vpop.f32.mrf.mxu1  ;;  %v6664_v46 = vadd.f32 %v5540_v14, %v6513_v43  ;;  %v1734_v21 = vmax.f32 %v1702_v60, 0.0  ;;  %v2099_v58 = vld [vmem:[#allocation2 + $0x28] sm:$0xf] }
 0x172   : > { %v2000_v26 = vor.u32 %v1998_v34, %v1997_v47  ;;  %v2097_v52 = vsel %vm6325_vm8, %v1997_v47, %v2096_v35  ;;  %1987 = vst [vmem:[#allocation2 + $0x2c] sm:$0xf] %v5161_v11  ;;  %v2003_v2 = vshrl.u32 %v5161_v11, 16  ;;  %v1166_v33 = vpop.f32.mrf.mxu0  ;;  %v1735_v44 = vmax.f32 %v1703_v6, 0.0  ;;  %v2108_v47 = vld [vmem:[#allocation2 + $0x58] sm:$0x1] }
 0x173   : > { %2098 = vst [vmem:[#allocation2 + $0x18] sm:$0x1] %v2097_v52  ;;  %v1706_v43 = vadd.f32 %v6597_v15, %v1647_v3  ;;  %v1648_v10 = vadd.f32 %v1471_v29, %v1213_v9  ;;  %v1475_v53 = vpop.f32.mrf.mxu1  ;;  %v6676_v32 = vadd.f32 %v1166_v33, %v6520_v5  ;;  %v2006_v55 = vshll.u32 %v5161_v11, 16  ;;  %v7391_v52 = vld [vmem:[#allocation11_spill] sm:$0xff] }
 0x174   : > { %v2058_v17 = vrot.slane %v2000_v26, 4  ;;  %v2005_v19 = vrot.slane %v2003_v2, 7  ;;  %v1652_v56 = vadd.f32 %v1475_v53, %v1217_v51  ;;  %v5541_v30 = vpop.f32.mrf.mxu0  ;;  %v5163_v13 = vpack.c.bf16 %v1735_v44, %v1734_v21  ;;  %v2105_v53 = vld [vmem:[#allocation2 + $0x48] sm:$0xf] }
 0x175   : > { %v1707_v36 = vadd.f32 %v6600_v12, %v1648_v10  ;;  %v1477_v1 = vpop.f32.mrf.mxu1  ;;  %v6683_v20 = vadd.f32 %v5541_v30, %v7390_v4  ;;  %v1738_v31 = vmax.f32 %v1706_v43, 0.0 }
 0x176   : > { %v2094_v9 = vsel %vm6670_vm13, %v2058_v17, %v2093_v42  ;;  %v2008_v5 = vor.u32 %v2006_v55, %v2005_v19  ;;  %v2103_v23 = vsel %vm6325_vm8, %v2005_v19, %v2102_v18  ;;  %v1710_v51 = vadd.f32 %v6597_v15, %v1652_v56  ;;  %v1169_v54 = vpop.f32.mrf.mxu0  ;;  %1988 = vst [vmem:[#allocation2 + $0x4c] sm:$0xf] %v5163_v13  ;;  %v2114_v17 = vld [vmem:[#allocation2 + $0x78] sm:$0x1] }
 0x177   : > { %2095 = vst [vmem:[#allocation2 + $0x8] sm:$0xf] %v2094_v9  ;;  %2104 = vst [vmem:[#allocation2 + $0x38] sm:$0x1] %v2103_v23  ;;  %v2011_v28 = vshrl.u32 %v5163_v13, 16  ;;  %v1739_v50 = vmax.f32 %v1707_v36, 0.0  ;;  %v1653_v60 = vadd.f32 %v1477_v1, %v1218_v57  ;;  %v1479_v35 = vpop.f32.mrf.mxu1  ;;  %v6691_v11 = vadd.f32 %v1169_v54, %v6629_v8 }
 0x178   : > { %v2060_v40 = vrot.slane %v2008_v5, 4  ;;  %v2014_v62 = vshll.u32 %v5163_v13, 16  ;;  %v1657_v34 = vadd.f32 %v1479_v35, %v1222_v0  ;;  %v5544_v3 = vpop.f32.mrf.mxu0  ;;  %v1742_v21 = vmax.f32 %v1710_v51, 0.0  ;;  %v7392_v1 = vld [vmem:[#allocation12_spill] sm:$0xff]  ;;  %v7393_v5 = vld [vmem:[#allocation13_spill] sm:$0xff] }
 0x179   : > { %v2013_v14 = vrot.slane %v2011_v28, 7  ;;  %v5165_v6 = vpack.c.bf16 %v1739_v50, %v1738_v31  ;;  %v1711_v29 = vadd.f32 %v6600_v12, %v1653_v60  ;;  %v1481_v26 = vpop.f32.mrf.mxu1  ;;  %v6695_v2 = vadd.f32 %v5544_v3, %v7391_v52 }
 0x17a   : > { %v2100_v57 = vsel %vm6670_vm13, %v2060_v40, %v2099_v58  ;;  %v1714_v33 = vadd.f32 %v6597_v15, %v1657_v34  ;;  %v1658_v0 = vadd.f32 %v1481_v26, %v6654_v16  ;;  %v1182_v42 = vpop.f32.mrf.mxu0 }
 0x17b   : > { %2101 = vst [vmem:[#allocation2 + $0x28] sm:$0xf] %v2100_v57  ;;  %v2016_v8 = vor.u32 %v2014_v62, %v2013_v14  ;;  %v2109_v18 = vsel %vm6325_vm8, %v2013_v14, %v2108_v47  ;;  %1989 = vst [vmem:[#allocation2 + $0x6c] sm:$0xf] %v5165_v6  ;;  %v2019_v44 = vshrl.u32 %v5165_v6, 16  ;;  %v2022_v43 = vshll.u32 %v5165_v6, 16  ;;  %v1485_v10 = vpop.f32.mrf.mxu1 }
 0x17c   : > { %2110 = vst [vmem:[#allocation2 + $0x58] sm:$0x1] %v2109_v18  ;;  %v1743_v19 = vmax.f32 %v1711_v29, 0.0  ;;  %v1746_v55 = vmax.f32 %v1714_v33, 0.0  ;;  %v1715_v56 = vadd.f32 %v6600_v12, %v1658_v0  ;;  %v1662_v30 = vadd.f32 %v1485_v10, %v6657_v48  ;;  %v5545_v16 = vpop.f32.mrf.mxu0  ;;  %v2111_v47 = vld [vmem:[#allocation2 + $0x68] sm:$0xf] }
 0x17d   : > { %v2062_v13 = vrot.slane %v2016_v8, 4  ;;  %v2021_v36 = vrot.slane %v2019_v44, 7  ;;  %v6706_v4 = vadd.f32 %v1182_v42, %v7392_v1  ;;  %v1487_v9 = vpop.f32.mrf.mxu1  ;;  %v6709_v23 = vadd.f32 %v5545_v16, %v7393_v5  ;;  %v2120_v29 = vld [vmem:[#allocation2 + $0x98] sm:$0x1] }
 0x17e   : > { %v5167_v51 = vpack.c.bf16 %v1743_v19, %v1742_v21  ;;  %v1747_v54 = vmax.f32 %v1715_v56, 0.0  ;;  %v1718_v58 = vadd.f32 %v6597_v15, %v1662_v30  ;;  %v1663_v28 = vadd.f32 %v1487_v9, %v6660_v22  ;;  %v1185_v31 = vpop.f32.mrf.mxu0  ;;  %v2126_v44 = vld [vmem:[#allocation2 + $0xb8] sm:$0x1]  ;;  %v2117_v30 = vld [vmem:[#allocation2 + $0x88] sm:$0xf] }
 0x17f   : > { %v2106_v48 = vsel %vm6670_vm13, %v2062_v13, %v2105_v53  ;;  %v2024_v50 = vor.u32 %v2022_v43, %v2021_v36  ;;  %v2115_v60 = vsel %vm6325_vm8, %v2021_v36, %v2114_v17  ;;  %v1489_v35 = vpop.f32.mrf.mxu1  ;;  %v6718_v40 = vadd.f32 %v1185_v31, %v6637_v61  ;;  %v7394_v61 = vld [vmem:[#allocation14_spill] sm:$0xff] }
 0x180   : > { %2107 = vst [vmem:[#allocation2 + $0x48] sm:$0xf] %v2106_v48  ;;  %v1233_v62 = vadd.f32 %v6650_v63, %v6619_v7  ;;  %2116 = vst [vmem:[#allocation2 + $0x78] sm:$0x1] %v2115_v60  ;;  %v2027_v22 = vshrl.u32 %v5167_v51, 16  ;;  %v2030_v34 = vshll.u32 %v5167_v51, 16  ;;  %v5169_v3 = vpack.c.bf16 %v1747_v54, %v1746_v55  ;;  %v1528_v14 = vpop.f32.mrf.mxu0 }
 0x181   : > { %1990 = vst [vmem:[#allocation2 + $0x8c] sm:$0xf] %v5167_v51  ;;  %v2064_v6 = vrot.slane %v2024_v50, 4  ;;  %v1719_v26 = vadd.f32 %v6600_v12, %v1663_v28  ;;  %v1667_v52 = vadd.f32 %v1489_v35, %v6679_v59  ;;  %v1491_v57 = vpop.f32.mrf.mxu1  ;;  %v1634_v21 = vadd.f32 %v1528_v14, %v7394_v61  ;;  %v7395_v28 = vld [vmem:[#allocation16_spill] sm:$0xff]  ;;  %v2123_v48 = vld [vmem:[#allocation2 + $0xa8] sm:$0xf] }
 0x182   : > { %v2029_v33 = vrot.slane %v2027_v22, 7  ;;  %1991 = vst [vmem:[#allocation2 + $0xac] sm:$0xf] %v5169_v3  ;;  %v2035_v0 = vshrl.u32 %v5169_v3, 16  ;;  %v1750_v7 = vmax.f32 %v1718_v58, 0.0  ;;  %v1668_v63 = vadd.f32 %v1491_v57, %v1233_v62  ;;  %v1530_v42 = vpop.f32.mrf.mxu0  ;;  %v6737_v58 = vld [vmem:[#allocation2 + $0x28] sm:$0xff] }
 0x183   : > { %v2112_v8 = vsel %vm6670_vm13, %v2064_v6, %v2111_v47  ;;  %v2038_v18 = vshll.u32 %v5169_v3, 16  ;;  %v1751_v43 = vmax.f32 %v1719_v26, 0.0  ;;  %v1722_v10 = vadd.f32 %v6597_v15, %v1667_v52  ;;  %v5550_v53 = vpop.f32.mrf.mxu1  ;;  %v2132_v22 = vld [vmem:[#allocation2 + $0xd8] sm:$0x1]  ;;  %v6747_v14 = vld [vmem:[#allocation2 + $0x8] sm:$0xff] }
 0x184   : > { %2113 = vst [vmem:[#allocation2 + $0x68] sm:$0xf] %v2112_v8  ;;  %v2032_v59 = vor.u32 %v2030_v34, %v2029_v33  ;;  %v2121_v17 = vsel %vm6325_vm8, %v2029_v33, %v2120_v29  ;;  %v2037_v19 = vrot.slane %v2035_v0, 7  ;;  %v1723_v55 = vadd.f32 %v6600_v12, %v1668_v63  ;;  %v1532_v56 = vpop.f32.mrf.mxu0  ;;  %v5671_v52 = vld [vmem:[#allocation3 + $0x1b8] sm:$0xff]   ;;  %v5674_v0 = vld [vmem:[#allocation3 + $0x1f0] sm:$0xff]  }
 0x185   : > { %2122 = vst [vmem:[#allocation2 + $0x98] sm:$0x1] %v2121_v17  ;;  %v5171_v16 = vpack.c.bf16 %v1751_v43, %v1750_v7  ;;  %v1754_v13 = vmax.f32 %v1722_v10, 0.0  ;;  %v1696_v36 = vadd.f32 %v6608_v24, %v1634_v21  ;;  %v6733_v1 = vadd.f32 %v5550_v53, %v6664_v46  ;;  %v1601_v15 = vpop.f32.mrf.mxu1  ;;  %v2138_v8 = vld [vmem:[#allocation2 + $0xf8] sm:$0x1]  ;;  %v6759_v53 = vld [vmem:[#allocation2] sm:$0xff] }
 0x186   : > { %v2066_v9 = vrot.slane %v2032_v59, 4  ;;  %v2040_v5 = vor.u32 %v2038_v18, %v2037_v19  ;;  %v2127_v51 = vsel %vm6325_vm8, %v2037_v19, %v2126_v44  ;;  %v1755_v54 = vmax.f32 %v1723_v55, 0.0  ;;  %v1534_v12 = vpop.f32.mrf.mxu0  ;;  %v7396_v44 = vld [vmem:[#allocation15_spill] sm:$0xff]  ;;  %v2129_v59 = vld [vmem:[#allocation2 + $0xc8] sm:$0xf] }
 0x187   : > { %v1205_v31 = vadd.f32 %v7395_v28, %v6623_v39  ;;  %2128 = vst [vmem:[#allocation2 + $0xb8] sm:$0x1] %v2127_v51  ;;  %1992 = vst [vmem:[#allocation2 + $0xcc] sm:$0xf] %v5171_v16  ;;  %v2043_v50 = vshrl.u32 %v5171_v16, 16  ;;  %v2046_v60 = vshll.u32 %v5171_v16, 16  ;;  %v1635_v46 = vadd.f32 %v1530_v42, %v6641_v49  ;;  %v5551_v35 = vpop.f32.mrf.mxu1 }
 0x188   : > { %v2118_v62 = vsel %vm6670_vm13, %v2066_v9, %v2117_v30  ;;  %v2068_v47 = vrot.slane %v2040_v5, 4  ;;  %v5173_v34 = vpack.c.bf16 %v1755_v54, %v1754_v13  ;;  %v6745_v3 = vadd.f32 %v1601_v15, %v6676_v32  ;;  %v1538_v39 = vpop.f32.mrf.mxu0  ;;  %v5675_v5 = vld [vmem:[#allocation3 + $0x1b0] sm:$0xff]   ;;  %v5678_v28 = vld [vmem:[#allocation3 + $0x1e8] sm:$0xff]  }
 0x189   : > { %2119 = vst [vmem:[#allocation2 + $0x88] sm:$0xf] %v2118_v62  ;;  %v2045_v6 = vrot.slane %v2043_v50, 7  ;;  %v1697_v29 = vadd.f32 %v6610_v38, %v1635_v46  ;;  %v4964_v49 = vcombine.low %v6747_v14, %v6737_v58  ;;  %v4965_v26 = vcombine.high %v6747_v14, %v6737_v58  ;;  %v1604_v57 = vpop.f32.mrf.mxu1  ;;  %v2135_v50 = vld [vmem:[#allocation2 + $0xe8] sm:$0xf] }
 0x18a   : > { %v2124_v61 = vsel %vm6670_vm13, %v2068_v47, %v2123_v48  ;;  %1993 = vst [vmem:[#allocation2 + $0xec] sm:$0xf] %v5173_v34  ;;  %v2051_v32 = vshrl.u32 %v5173_v34, 16  ;;  %v2054_v21 = vshll.u32 %v5173_v34, 16  ;;  %v1728_v33 = vmax.f32 %v1696_v36, 0.0  ;;  %v1540_v7 = vpop.f32.mrf.mxu0 }
 0x18b   : > { %2125 = vst [vmem:[#allocation2 + $0xa8] sm:$0xf] %v2124_v61  ;;  %v2048_v63 = vor.u32 %v2046_v60, %v2045_v6  ;;  %v2133_v42 = vsel %vm6325_vm8, %v2045_v6, %v2132_v22  ;;  %v1729_v18 = vmax.f32 %v1697_v29, 0.0  ;;  %2758 = vmatprep.mubr.bf16.mxu1 %v4965_v26  ;;  %v1639_v43 = vadd.f32 %v1532_v56, %v7396_v44  ;;  %v5554_v10 = vpop.f32.mrf.mxu1  ;;  %v7397_v56 = vld [vmem:[#allocation18_spill] sm:$0xff]  ;;  %v2249_v22 = vld [vmem:[#allocation2 + $0x30] sm:$0x1] }
 0x18c   : > { %2134 = vst [vmem:[#allocation2 + $0xd8] sm:$0x1] %v2133_v42  ;;  %v2053_v17 = vrot.slane %v2051_v32, 7  ;;  %2759 = vmatmul.mubr.bf16.vlgmr.msra.gmra.mxu1 %v4964_v49  ;;  %v6762_v19 = vadd.f32 %v5551_v35, %v6683_v20  ;;  %v1640_v55 = vadd.f32 %v1534_v12, %v1205_v31  ;;  %v6765_v30 = vadd.f32 %v1604_v57, %v6691_v11  ;;  %v1542_v16 = vpop.f32.mrf.mxu0  ;;  %v6775_v35 = vld [vmem:[#allocation2 + $0x68] sm:$0xff] }
 0x18d   : > { %v2070_v13 = vrot.slane %v2048_v63, 4  ;;  %v5160_v36 = vpack.c.bf16 %v1729_v18, %v1728_v33  ;;  %v1700_v15 = vadd.f32 %v6608_v24, %v1639_v43  ;;  %5317 = vmatpush3.bf16.msra.mxu1 %v5671_v52  ;;  %v1644_v9 = vadd.f32 %v1538_v39, %v7397_v56  ;;  %v1617_v12 = vpop.f32.mrf.mxu1  ;;  %v7398_v52 = vld [vmem:[#allocation19_spill] sm:$0xff]  ;;  %v6786_v32 = vld [vmem:[#allocation2 + $0x48] sm:$0xff] }
 0x18e   : > { %v2056_v51 = vor.u32 %v2054_v21, %v2053_v17  ;;  %v2139_v54 = vsel %vm6325_vm8, %v2053_v17, %v2138_v8  ;;  %v1701_v20 = vadd.f32 %v6610_v38, %v1640_v55  ;;  %5318 = vmatprep.subr.bf16.mxu1 %v5674_v0  ;;  %v1544_v11 = vpop.f32.mrf.mxu0  ;;  %v2832_v31 = vshrl.u32 %v6759_v53, 16  ;;  %v5679_v21 = vld [vmem:[#allocation3 + $0x1a8] sm:$0xff]   ;;  %v2246_v17 = vld [vmem:[#allocation2 + $0x20] sm:$0xf] }
 0x18f   : > { %v2130_v48 = vsel %vm6670_vm13, %v2070_v13, %v2129_v59  ;;  %2140 = vst [vmem:[#allocation2 + $0xf8] sm:$0x1] %v2139_v54  ;;  %2142 = vst [vmem:[#allocation2 + $0x24] sm:$0xf] %v5160_v36  ;;  %v2151_v60 = vshrl.u32 %v5160_v36, 16  ;;  %v2154_v46 = vshll.u32 %v5160_v36, 16  ;;  %v1704_v6 = vadd.f32 %v6608_v24, %v1644_v9  ;;  %v5555_v42 = vpop.f32.mrf.mxu1 }
 0x190   : > { %v2835_v62 = vshll.u32 %v6759_v53, 16  ;;  %2131 = vst [vmem:[#allocation2 + $0xc8] sm:$0xf] %v2130_v48  ;;  %v2072_v47 = vrot.slane %v2056_v51, 4  ;;  %v1732_v34 = vmax.f32 %v1700_v15, 0.0  ;;  %v1733_v39 = vmax.f32 %v1701_v20, 0.0  ;;  %v1548_v29 = vpop.f32.mrf.mxu0 }
 0x191   : > { %v2153_v49 = vrot.slane %v2151_v60, 7  ;;  %v6780_v26 = vadd.f32 %v5554_v10, %v6695_v2  ;;  %5319 = vmatpush3.bf16.msra.mxu1 %v5675_v5  ;;  %v1645_v57 = vadd.f32 %v1540_v7, %v7398_v52  ;;  %v6784_v61 = vadd.f32 %v1617_v12, %v6706_v4  ;;  %v5682_v2 = vld [vmem:[#allocation3 + $0x1e0] sm:$0xff]   ;;  %v2255_v9 = vld [vmem:[#allocation2 + $0x50] sm:$0x1]  ;;  %v7400_v51 = vld [vmem:[#allocation20_spill] sm:$0xff] }
 0x192   : > { %v2136_v33 = vsel %vm6670_vm13, %v2072_v47, %v2135_v50  ;;  %v5162_v0 = vpack.c.bf16 %v1733_v39, %v1732_v34  ;;  %v4969_v63 = vcombine.high %v6786_v32, %v6775_v35  ;;  %5320 = vmatprep.subr.bf16.mxu1 %v5678_v28  ;;  %v1550_v8 = vpop.f32.mrf.mxu0  ;;  %v6792_v18 = vrot.slane %v2832_v31, 4  ;;  %v7399_v10 = vld [vmem:[#allocation21_spill] sm:$0xff]  ;;  %v7401_v48 = vld [vmem:[#allocation22_spill] sm:$0xff]  ;;  %v5686_v60 = vld [vmem:[#allocation3 + $0x1d8] sm:$0xff]  }
 0x193   : > { %2137 = vst [vmem:[#allocation2 + $0xe8] sm:$0xf] %v2136_v33  ;;  %v2156_v7 = vor.u32 %v2154_v46, %v2153_v49  ;;  %v2250_v4 = vsel %vm6325_vm8, %v2153_v49, %v2249_v22  ;;  %v1705_v44 = vadd.f32 %v6610_v38, %v1645_v57  ;;  %v6797_v43 = vrot.slane %v2835_v62, 5  ;;  %v6811_v22 = vld [vmem:[#allocation2 + $0xa8] sm:$0xff]  ;;  %v7403_v49 = vld [vmem:[#allocation27_spill] sm:$0xff] }
 0x194   : > { %v1215_v59 = vadd.f32 %v7399_v10, %v6633_v27  ;;  %2251 = vst [vmem:[#allocation2 + $0x30] sm:$0x1] %v2250_v4  ;;  %2143 = vst [vmem:[#allocation2 + $0x44] sm:$0xf] %v5162_v0  ;;  %v2159_v55 = vshrl.u32 %v5162_v0, 16  ;;  %v1736_v13 = vmax.f32 %v1704_v6, 0.0  ;;  %2766 = vmatprep.mubr.bf16.mxu1 %v4969_v63  ;;  %v4968_v36 = vcombine.low %v6786_v32, %v6775_v35  ;;  %v1552_v15 = vpop.f32.mrf.mxu0 }
 0x195   : > { %v2214_v56 = vrot.slane %v2156_v7, 4  ;;  %v1737_v5 = vmax.f32 %v1705_v44, 0.0  ;;  %v1649_v54 = vadd.f32 %v1542_v16, %v7400_v51  ;;  %v6805_v20 = vadd.f32 %v5555_v42, %v6709_v23  ;;  %5321 = vmatpush3.bf16.msra.mxu1 %v5679_v21  ;;  %v5683_v27 = vld [vmem:[#allocation3 + $0x1a0] sm:$0xff]   ;;  %v6821_v63 = vld [vmem:[#allocation2 + $0x88] sm:$0xff]  ;;  %v5687_v42 = vld [vmem:[#allocation3 + $0x198] sm:$0xff]  }
 0x196   : > { %v2161_v12 = vrot.slane %v2159_v55, 7  ;;  %v2162_v28 = vshll.u32 %v5162_v0, 16  ;;  %2767 = vmatmul.mubr.bf16.gmra.mxu1 %v4968_v36  ;;  %v1650_v31 = vadd.f32 %v1544_v11, %v1215_v59  ;;  %5322 = vmatprep.subr.bf16.mxu1 %v5682_v2  ;;  %v1654_v50 = vadd.f32 %v1548_v29, %v7401_v48  ;;  %v1554_v46 = vpop.f32.mrf.mxu0  ;;  %v7402_v29 = vld [vmem:[#allocation17_spill] sm:$0xff]  ;;  %v2261_v7 = vld [vmem:[#allocation2 + $0x70] sm:$0x1] }
 0x197   : > { %v2247_v62 = vsel %vm6670_vm13, %v2214_v56, %v2246_v17  ;;  %v5164_v47 = vpack.c.bf16 %v1737_v5, %v1736_v13  ;;  %v1708_v16 = vadd.f32 %v6608_v24, %v1649_v54  ;;  %v2838_v6 = vor.u32 %v6797_v43, %v6792_v18  ;;  %v2252_v57 = vld [vmem:[#allocation2 + $0x40] sm:$0xf]  ;;  %v7404_v44 = vld [vmem:[#allocation23_spill] sm:$0xff]  ;;  %v7405_v56 = vld [vmem:[#allocation24_spill] sm:$0xff] }
 0x198   : > { %2248 = vst [vmem:[#allocation2 + $0x20] sm:$0xf] %v2247_v62  ;;  %v2164_v23 = vor.u32 %v2162_v28, %v2161_v12  ;;  %v2256_v34 = vsel %vm6325_vm8, %v2161_v12, %v2255_v9  ;;  %v1709_v11 = vadd.f32 %v6610_v38, %v1650_v31  ;;  %v1558_v39 = vpop.f32.mrf.mxu0  ;;  %v1230_v52 = vadd.f32 %v7403_v49, %v7402_v29  ;;  %v5690_v17 = vld [vmem:[#allocation3 + $0x1d0] sm:$0xff]  }
 0x199   : > { %2257 = vst [vmem:[#allocation2 + $0x50] sm:$0x1] %v2256_v34  ;;  %2144 = vst [vmem:[#allocation2 + $0x64] sm:$0xf] %v5164_v47  ;;  %v2167_v21 = vshrl.u32 %v5164_v47, 16  ;;  %v1740_v33 = vmax.f32 %v1708_v16, 0.0  ;;  %v1712_v0 = vadd.f32 %v6608_v24, %v1654_v50  ;;  %5323 = vmatpush3.bf16.msra.mxu1 %v5683_v27  ;;  %v1655_v10 = vadd.f32 %v1550_v8, %v7404_v44 }
 0x19a   : > { %v2216_v2 = vrot.slane %v2164_v23, 4  ;;  %v1741_v4 = vmax.f32 %v1709_v11, 0.0  ;;  %v4973_v59 = vcombine.high %v6821_v63, %v6811_v22  ;;  %5324 = vmatprep.subr.bf16.mxu1 %v5686_v60  ;;  %v2170_v13 = vshll.u32 %v5164_v47, 16  ;;  %v7406_v8 = vld [vmem:[#allocation25_spill] sm:$0xff]  ;;  %v1560_v12 = vpop.f32.mrf.mxu0  ;;  %v7407_v50 = vld [vmem:[#allocation26_spill] sm:$0xff]  ;;  %v5691_v60 = vld [vmem:[#allocation3 + $0x190] sm:$0xff]  }
 0x19b   : > { %v2169_v55 = vrot.slane %v2167_v21, 7  ;;  %v4972_v36 = vcombine.low %v6821_v63, %v6811_v22  ;;  %v1659_v9 = vadd.f32 %v1552_v15, %v7405_v56  ;;  %v1713_v54 = vadd.f32 %v6610_v38, %v1655_v10  ;;  %v6837_v62 = vld [vmem:[#allocation2 + $0xe8] sm:$0xff]  ;;  %v2258_v47 = vld [vmem:[#allocation2 + $0x60] sm:$0xf] }
 0x19c   : > { %v2253_v5 = vsel %vm6670_vm13, %v2216_v2, %v2252_v57  ;;  %v5166_v51 = vpack.c.bf16 %v1741_v4, %v1740_v33  ;;  %2774 = vmatprep.mubr.bf16.mxu1 %v4973_v59  ;;  %v1660_v27 = vadd.f32 %v1554_v46, %v7406_v8  ;;  %v1664_v15 = vadd.f32 %v1558_v39, %v7407_v50  ;;  %v5694_v11 = vld [vmem:[#allocation3 + $0x1c8] sm:$0xff]   ;;  %v2267_v57 = vld [vmem:[#allocation2 + $0x90] sm:$0x1]  ;;  %v1562_v4 = vpop.f32.mrf.mxu0 }
 0x19d   : > { %2254 = vst [vmem:[#allocation2 + $0x40] sm:$0xf] %v2253_v5  ;;  %v2172_v28 = vor.u32 %v2170_v13, %v2169_v55  ;;  %v2262_v31 = vsel %vm6325_vm8, %v2169_v55, %v2261_v7  ;;  %v1716_v48 = vadd.f32 %v6608_v24, %v1659_v9  ;;  %5325 = vmatpush3.bf16.msra.mxu1 %v5687_v42  ;;  %v1744_v23 = vmax.f32 %v1712_v0, 0.0  ;;  %v6841_v33 = vld [vmem:[#allocation2 + $0xc8] sm:$0xff]  ;;  %v6852_v9 = vld [vmem:[#allocation2 + $0x18] sm:$0x11] }
 0x19e   : > { %2263 = vst [vmem:[#allocation2 + $0x70] sm:$0x1] %v2262_v31  ;;  %2145 = vst [vmem:[#allocation2 + $0x84] sm:$0xf] %v5166_v51  ;;  %v2175_v16 = vshrl.u32 %v5166_v51, 16  ;;  %v1745_v46 = vmax.f32 %v1713_v54, 0.0  ;;  %2775 = vmatmul.mubr.bf16.gmra.mxu1 %v4972_v36  ;;  %v1717_v34 = vadd.f32 %v6610_v38, %v1660_v27  ;;  %5326 = vmatprep.subr.bf16.mxu1 %v5690_v17 }
 0x19f   : > { %v2218_v29 = vrot.slane %v2172_v28, 4  ;;  %v2178_v49 = vshll.u32 %v5166_v51, 16  ;;  %v1720_v21 = vadd.f32 %v6608_v24, %v1664_v15  ;;  %v1665_v39 = vadd.f32 %v1560_v12, %v1230_v52  ;;  %v5695_v55 = vld [vmem:[#allocation3 + $0x188] sm:$0xff]   ;;  %v5698_v5 = vld [vmem:[#allocation3 + $0x1c0] sm:$0xff]   ;;  %v2273_v54 = vld [vmem:[#allocation2 + $0xb0] sm:$0x1] }
 0x1a0   : > { %v2177_v42 = vrot.slane %v2175_v16, 7  ;;  %v5168_v2 = vpack.c.bf16 %v1745_v46, %v1744_v23  ;;  %v1749_v7 = vmax.f32 %v1717_v34, 0.0  ;;  %v4977_v0 = vcombine.high %v6841_v33, %v6837_v62  ;;  %v2264_v51 = vld [vmem:[#allocation2 + $0x80] sm:$0xf] }
 0x1a1   : > { %v2259_v44 = vsel %vm6670_vm13, %v2218_v29, %v2258_v47  ;;  %v1748_v10 = vmax.f32 %v1716_v48, 0.0  ;;  %v1752_v59 = vmax.f32 %v1720_v21, 0.0  ;;  %5327 = vmatpush3.bf16.msra.mxu1 %v5691_v60  ;;  %v1721_v17 = vadd.f32 %v6610_v38, %v1665_v39  ;;  %v5699_v46 = vld [vmem:[#allocation3 + $0x180] sm:$0xff]  }
 0x1a2   : > { %2260 = vst [vmem:[#allocation2 + $0x60] sm:$0xf] %v2259_v44  ;;  %v2180_v52 = vor.u32 %v2178_v49, %v2177_v42  ;;  %v2268_v13 = vsel %vm6325_vm8, %v2177_v42, %v2267_v57  ;;  %2146 = vst [vmem:[#allocation2 + $0xa4] sm:$0xf] %v5168_v2  ;;  %v2183_v36 = vshrl.u32 %v5168_v2, 16  ;;  %2782 = vmatprep.mubr.bf16.mxu1 %v4977_v0  ;;  %5328 = vmatprep.subr.bf16.mxu1 %v5694_v11  ;;  %v5702_v57 = vld [vmem:[#allocation3 + $0x2f8] sm:$0xff]  }
 0x1a3   : > { %v4976_v56 = vcombine.low %v6841_v33, %v6837_v62  ;;  %2269 = vst [vmem:[#allocation2 + $0x90] sm:$0x1] %v2268_v13  ;;  %v5170_v8 = vpack.c.bf16 %v1749_v7, %v1748_v10  ;;  %v1753_v27 = vmax.f32 %v1721_v17, 0.0  ;;  %v1669_v12 = vadd.f32 %v1562_v4, %v6592_v37  ;;  %v2270_v11 = vld [vmem:[#allocation2 + $0xa0] sm:$0xf]  ;;  %v1564_v13 = vpop.f32.mrf.mxu0 }
 0x1a4   : > { %v2846_v28 = vshrl.u32 %v6747_v14, 16  ;;  %v2220_v31 = vrot.slane %v2180_v52, 4  ;;  %v2185_v48 = vrot.slane %v2183_v36, 7  ;;  %v2186_v50 = vshll.u32 %v5168_v2, 16  ;;  %v2279_v49 = vld [vmem:[#allocation2 + $0xd0] sm:$0x1] }
 0x1a5   : > { %v2849_v15 = vshll.u32 %v6747_v14, 16  ;;  %2147 = vst [vmem:[#allocation2 + $0xc4] sm:$0xf] %v5170_v8  ;;  %v2191_v60 = vshrl.u32 %v5170_v8, 16  ;;  %v5172_v47 = vpack.c.bf16 %v1753_v27, %v1752_v59  ;;  %v6858_v16 = vadd.f32 %v6608_v24, %v1669_v12  ;;  %5329 = vmatpush3.bf16.msra.mxu1 %v5695_v55  ;;  %v2806_v2 = vld [vmem:[#allocation2 + $0x38] sm:$0x11] }
 0x1a6   : > { %v2855_v23 = vshll.u32 %v6852_v9, 16  ;;  %v2265_v37 = vsel %vm6670_vm13, %v2220_v31, %v2264_v51  ;;  %v2188_v34 = vor.u32 %v2186_v50, %v2185_v48  ;;  %v2274_v29 = vsel %vm6325_vm8, %v2185_v48, %v2273_v54  ;;  %2783 = vmatmul.mubr.bf16.gmra.mxu1 %v4976_v56  ;;  %5330 = vmatprep.subr.bf16.mxu1 %v5698_v5  ;;  %v2285_v0 = vld [vmem:[#allocation2 + $0xf0] sm:$0x1]  ;;  %v6870_v36 = vld [vmem:[#allocation2 + $0x20] sm:$0xff] }
 0x1a7   : > { %v2848_v14 = vrot.slane %v2846_v28, 4  ;;  %2266 = vst [vmem:[#allocation2 + $0x80] sm:$0xf] %v2265_v37  ;;  %2275 = vst [vmem:[#allocation2 + $0xb0] sm:$0x1] %v2274_v29  ;;  %v2193_v24 = vrot.slane %v2191_v60, 7  ;;  %v1670_v50 = vadd.f32 %v1564_v13, %v6595_v41  ;;  %v4963_v37 = vcombine.high %v6759_v53, %v6870_v36 }
 0x1a8   : > { %v2194_v21 = vshll.u32 %v5170_v8, 16  ;;  %2148 = vst [vmem:[#allocation2 + $0xe4] sm:$0xf] %v5172_v47  ;;  %v2199_v39 = vshrl.u32 %v5172_v47, 16  ;;  %v2202_v42 = vshll.u32 %v5172_v47, 16  ;;  %v2222_v7 = vrot.slane %v2188_v34, 4 }
 0x1a9   : > { %v1756_v4 = vmax.f32 %v6858_v16, 0.0  ;;  %v2851_v44 = vrot.slane %v2849_v15, 5  ;;  %v2874_v10 = vshrl.u32 %v6737_v58, 16  ;;  %v2280_v17 = vsel %vm6325_vm8, %v2193_v24, %v2279_v49  ;;  %5331 = vmatpush3.bf16.msra.mxu1 %v5699_v46  ;;  %v2276_v9 = vld [vmem:[#allocation2 + $0xc0] sm:$0xf]  ;;  %v5697_v34 = vld [vmem:[#allocation3 + $0x138] sm:$0xff]   ;;  %2693 = vmatprep.mubr.bf16.mxu0 %v4963_v37 }
 0x1aa   : > { %v2196_v59 = vor.u32 %v2194_v21, %v2193_v24  ;;  %v2201_v55 = vrot.slane %v2199_v39, 7  ;;  %v2877_v52 = vshll.u32 %v6737_v58, 16  ;;  %v2271_v56 = vsel %vm6670_vm13, %v2222_v7, %v2270_v11  ;;  %2281 = vst [vmem:[#allocation2 + $0xd0] sm:$0x1] %v2280_v17  ;;  %5396 = vmatprep.subr.bf16.mxu1 %v5702_v57  ;;  %v2282_v28 = vld [vmem:[#allocation2 + $0xe0] sm:$0xf] }
 0x1ab   : > { %v2852_v5 = vor.u32 %v2851_v44, %v2848_v14  ;;  %v2876_v51 = vrot.slane %v2874_v10, 4  ;;  %v2883_v54 = vshll.u32 %v2806_v2, 16  ;;  %2272 = vst [vmem:[#allocation2 + $0xa0] sm:$0xf] %v2271_v56  ;;  %v2857_v48 = vrot.slane %v2855_v23, 5  ;;  %v5700_v23 = vld [vmem:[#allocation3 + $0x170] sm:$0xff]  }
 0x1ac   : > { %v2224_v8 = vrot.slane %v2196_v59, 4  ;;  %v2204_v27 = vor.u32 %v2202_v42, %v2201_v55  ;;  %v2286_v12 = vsel %vm6325_vm8, %v2201_v55, %v2285_v0  ;;  %v2879_v58 = vrot.slane %v2877_v52, 5  ;;  %v2810_v60 = vld [vmem:[#allocation2 + $0x58] sm:$0x11]  ;;  %v6890_v7 = vld [vmem:[#allocation2 + $0x60] sm:$0xff]  ;;  %v5701_v10 = vld [vmem:[#allocation3 + $0x130] sm:$0xff]  }
 0x1ad   : > { %2287 = vst [vmem:[#allocation2 + $0xf0] sm:$0x1] %v2286_v12  ;;  %v2853_v31 = vrot.slane %v2852_v5, 4  ;;  %v4962_v15 = vcombine.low %v6759_v53, %v6870_v36  ;;  %v2885_v11 = vrot.slane %v2883_v54, 5  ;;  %v1725_v29 = vadd.f32 %v6610_v38, %v1670_v50  ;;  %v2814_v49 = vld [vmem:[#allocation2 + $0x78] sm:$0x11] }
 0x1ae   : > { %v2277_v47 = vsel %vm6670_vm13, %v2224_v8, %v2276_v9  ;;  %v2226_v16 = vrot.slane %v2204_v27, 4  ;;  %v2880_v46 = vor.u32 %v2879_v58, %v2876_v51  ;;  %v2902_v41 = vshrl.u32 %v6786_v32, 16  ;;  %v5703_v9 = vld [vmem:[#allocation3 + $0x2b8] sm:$0xff]   ;;  %v6896_v5 = vld [vmem:[#allocation2 + $0x40] sm:$0xff]  ;;  %v5704_v12 = vld [vmem:[#allocation3 + $0x168] sm:$0xff]  }
 0x1af   : > { %2278 = vst [vmem:[#allocation2 + $0xc0] sm:$0xf] %v2277_v47  ;;  %v2905_v14 = vshll.u32 %v6786_v32, 16  ;;  %v2911_v21 = vshll.u32 %v2810_v60, 16  ;;  %v2930_v39 = vshrl.u32 %v6775_v35, 16  ;;  %v1757_v53 = vmax.f32 %v1725_v29, 0.0  ;;  %2694 = vmatmul.mubr.bf16.vlgmr.msra.gmra.mxu0 %v4962_v15 }
 0x1b0   : > { %v2283_v57 = vsel %vm6670_vm13, %v2226_v16, %v2282_v28  ;;  %v2881_v24 = vrot.slane %v2880_v46, 4  ;;  %v2904_v42 = vrot.slane %v2902_v41, 4  ;;  %v2933_v38 = vshll.u32 %v6775_v35, 16  ;;  %5277 = vmatpush3.bf16.msra.mxu0 %v5697_v34  ;;  %v2818_v35 = vld [vmem:[#allocation2 + $0x98] sm:$0x11]  ;;  %v5706_v58 = vld [vmem:[#allocation3 + $0x2f0] sm:$0xff]  }
 0x1b1   : > { %2284 = vst [vmem:[#allocation2 + $0xe0] sm:$0xf] %v2283_v57  ;;  %v2907_v2 = vrot.slane %v2905_v14, 5  ;;  %v2858_v32 = vsel %vm6031_vm3, %v2853_v31, %v2857_v48  ;;  %v2932_v59 = vrot.slane %v2930_v39, 4  ;;  %v2939_v17 = vshll.u32 %v2814_v49, 16  ;;  %5278 = vmatprep.subr.bf16.mxu0 %v5700_v23  ;;  %v5705_v50 = vld [vmem:[#allocation3 + $0x128] sm:$0xff]  }
 0x1b2   : > { %v2886_v44 = vsel %vm6031_vm3, %v2881_v24, %v2885_v11  ;;  %v5174_v52 = vpack.c.bf16 %v1757_v53, %v1756_v4  ;;  %v2913_v56 = vrot.slane %v2911_v21, 5  ;;  %v2935_v54 = vrot.slane %v2933_v38, 5  ;;  %v2291_v31 = vld [vmem:[#allocation2 + $0x110] sm:$0x1]  ;;  %v2822_v16 = vld [vmem:[#allocation2 + $0xb8] sm:$0x11] }
 0x1b3   : > { %v5013_v55 = vcombine.high %v2858_v32, %v2886_v44  ;;  %v2908_v13 = vor.u32 %v2907_v2, %v2904_v42  ;;  %v5012_v51 = vcombine.low %v2858_v32, %v2886_v44  ;;  %v2941_v8 = vrot.slane %v2939_v17, 5  ;;  %v5707_v47 = vld [vmem:[#allocation3 + $0x2b0] sm:$0xff]   ;;  %v5708_v23 = vld [vmem:[#allocation3 + $0x160] sm:$0xff]   ;;  %v5710_v21 = vld [vmem:[#allocation3 + $0x2e8] sm:$0xff]  }
 0x1b4   : > { %v4967_v27 = vcombine.high %v6896_v5, %v6890_v7  ;;  %2149 = vst [vmem:[#allocation2 + $0x104] sm:$0xf] %v5174_v52  ;;  %v2207_v28 = vshrl.u32 %v5174_v52, 16  ;;  %v4966_v48 = vcombine.low %v6896_v5, %v6890_v7  ;;  %v2958_v15 = vshrl.u32 %v6821_v63, 16  ;;  %5279 = vmatpush3.bf16.msra.mxu0 %v5701_v10  ;;  %v6906_v14 = vld [vmem:[#allocation2 + $0xa0] sm:$0xff] }
 0x1b5   : > { %3472 = vmatprep.mubr.bf16.mxu1 %v5013_v55  ;;  %v2909_v4 = vrot.slane %v2908_v13, 4  ;;  %v2936_v60 = vor.u32 %v2935_v54, %v2932_v59  ;;  %v2961_v46 = vshll.u32 %v6821_v63, 16  ;;  %v2967_v37 = vshll.u32 %v2818_v35, 16  ;;  %5280 = vmatprep.subr.bf16.mxu0 %v5704_v12  ;;  %v6912_v44 = vld [vmem:[#allocation2 + $0x80] sm:$0xff]  ;;  %v5712_v35 = vld [vmem:[#allocation3 + $0x158] sm:$0xff]  }
 0x1b6   : > { %3473 = vmatmul.mubr.bf16.vlgmr.msra.gmra.mxu1 %v5012_v51  ;;  %v2986_v34 = vshrl.u32 %v6811_v22, 16  ;;  %v2209_v11 = vrot.slane %v2207_v28, 7  ;;  %v2210_v29 = vshll.u32 %v5174_v52, 16  ;;  %2701 = vmatprep.mubr.bf16.mxu0 %v4967_v27  ;;  %v2960_v49 = vrot.slane %v2958_v15, 4  ;;  %v5709_v59 = vld [vmem:[#allocation3 + $0x120] sm:$0xff]  }
 0x1b7   : > { %5397 = vmatpush3.bf16.msra.mxu1 %v5703_v9  ;;  %v2989_v41 = vshll.u32 %v6811_v22, 16  ;;  %v2914_v57 = vsel %vm6031_vm3, %v2909_v4, %v2913_v56  ;;  %v2937_v24 = vrot.slane %v2936_v60, 4  ;;  %v2963_v39 = vrot.slane %v2961_v46, 5  ;;  %2702 = vmatmul.mubr.bf16.gmra.mxu0 %v4966_v48  ;;  %v2288_v22 = vld [vmem:[#allocation2 + $0x100] sm:$0xf]  ;;  %v5711_v9 = vld [vmem:[#allocation3 + $0x2a8] sm:$0xff]  }
 0x1b8   : > { %5398 = vmatprep.subr.bf16.mxu1 %v5706_v58  ;;  %v2988_v53 = vrot.slane %v2986_v34, 4  ;;  %v2212_v42 = vor.u32 %v2210_v29, %v2209_v11  ;;  %v2292_v2 = vsel %vm6325_vm8, %v2209_v11, %v2291_v31  ;;  %v2995_v32 = vshll.u32 %v2822_v16, 16  ;;  %5281 = vmatpush3.bf16.msra.mxu0 %v5705_v50  ;;  %v2801_v54 = vld [vmem:[#allocation2 + $0x10] sm:$0x11]  ;;  %v5714_v12 = vld [vmem:[#allocation3 + $0x2e0] sm:$0xff]  }
 0x1b9   : > { %v2991_v38 = vrot.slane %v2989_v41, 5  ;;  %2293 = vst [vmem:[#allocation2 + $0x110] sm:$0x1] %v2292_v2  ;;  %v2942_v10 = vsel %vm6031_vm3, %v2937_v24, %v2941_v8  ;;  %v2964_v17 = vor.u32 %v2963_v39, %v2960_v49  ;;  %v2969_v55 = vrot.slane %v2967_v37, 5  ;;  %5282 = vmatprep.subr.bf16.mxu0 %v5708_v23  ;;  %v2826_v58 = vld [vmem:[#allocation2 + $0xd8] sm:$0x11] }
 0x1ba   : > { %v4971_v52 = vcombine.high %v6912_v44, %v6906_v14  ;;  %v2228_v13 = vrot.slane %v2212_v42, 4  ;;  %v5017_v45 = vcombine.high %v2914_v57, %v2942_v10  ;;  %v4970_v51 = vcombine.low %v6912_v44, %v6906_v14  ;;  %v2830_v15 = vld [vmem:[#allocation2 + $0xf8] sm:$0x11]  ;;  %v6926_v34 = vld [vmem:[#allocation2 + $0xe0] sm:$0xff]  ;;  %v5716_v49 = vld [vmem:[#allocation3 + $0x150] sm:$0xff]  }
 0x1bb   : > { %5399 = vmatpush3.bf16.msra.mxu1 %v5707_v47  ;;  %v2992_v56 = vor.u32 %v2991_v38, %v2988_v53  ;;  %v5016_v27 = vcombine.low %v2914_v57, %v2942_v10  ;;  %v2965_v8 = vrot.slane %v2964_v17, 4  ;;  %v3014_v28 = vshrl.u32 %v6841_v33, 16  ;;  %v5713_v47 = vld [vmem:[#allocation3 + $0x118] sm:$0xff]   ;;  %v5715_v23 = vld [vmem:[#allocation3 + $0x2a0] sm:$0xff]   ;;  %v2805_v2 = vld [vmem:[#allocation2 + $0x30] sm:$0x11] }
 0x1bc   : > { %5400 = vmatprep.subr.bf16.mxu1 %v5710_v21  ;;  %2709 = vmatprep.mubr.bf16.mxu0 %v4971_v52  ;;  %v3017_v31 = vshll.u32 %v6841_v33, 16  ;;  %v2289_v4 = vsel %vm6670_vm13, %v2228_v13, %v2288_v22  ;;  %v2997_v50 = vrot.slane %v2995_v32, 5  ;;  %v3042_v60 = vshrl.u32 %v6837_v62, 16  ;;  %v5718_v21 = vld [vmem:[#allocation3 + $0x2d8] sm:$0xff]   ;;  %v6932_v42 = vld [vmem:[#allocation2 + $0xc0] sm:$0xff]  ;;  %v5717_v10 = vld [vmem:[#allocation3 + $0x110] sm:$0xff]  }
 0x1bd   : > { %3480 = vmatprep.mubr.bf16.mxu1 %v5017_v45  ;;  %v2993_v48 = vrot.slane %v2992_v56, 4  ;;  %2290 = vst [vmem:[#allocation2 + $0x100] sm:$0xf] %v2289_v4  ;;  %5283 = vmatpush3.bf16.msra.mxu0 %v5709_v59  ;;  %v3016_v16 = vrot.slane %v3014_v28, 4  ;;  %v3045_v37 = vshll.u32 %v6837_v62, 16  ;;  %v2841_v11 = vshll.u32 %v2801_v54, 16 }
 0x1be   : > { %3481 = vmatmul.mubr.bf16.gmra.mxu1 %v5016_v27  ;;  %v3019_v46 = vrot.slane %v3017_v31, 5  ;;  %v2970_v25 = vsel %vm6031_vm3, %v2965_v8, %v2969_v55  ;;  %5284 = vmatprep.subr.bf16.mxu0 %v5712_v35  ;;  %v3023_v41 = vshll.u32 %v2826_v58, 16  ;;  %v3044_v57 = vrot.slane %v3042_v60, 4  ;;  %v5719_v45 = vld [vmem:[#allocation3 + $0x298] sm:$0xff]   ;;  %v5720_v56 = vld [vmem:[#allocation3 + $0x148] sm:$0xff]   ;;  %v5722_v54 = vld [vmem:[#allocation3 + $0x2d0] sm:$0xff]  }
 0x1bf   : > { %v2998_v29 = vsel %vm6031_vm3, %v2993_v48, %v2997_v50  ;;  %5401 = vmatpush3.bf16.msra.mxu1 %v5711_v9  ;;  %v3047_v62 = vrot.slane %v3045_v37, 5  ;;  %v3051_v53 = vshll.u32 %v2830_v15, 16  ;;  %2710 = vmatmul.mubr.bf16.gmra.mxu0 %v4970_v51  ;;  %v4975_v38 = vcombine.high %v6932_v42, %v6926_v34  ;;  %v5721_v50 = vld [vmem:[#allocation3 + $0x108] sm:$0xff]   ;;  %v2809_v60 = vld [vmem:[#allocation2 + $0x50] sm:$0x11] }
 0x1c0   : > { %v5021_v24 = vcombine.high %v2970_v25, %v2998_v29  ;;  %5402 = vmatprep.subr.bf16.mxu1 %v5714_v12  ;;  %v3020_v39 = vor.u32 %v3019_v46, %v3016_v16  ;;  %v2839_v32 = vrot.slane %v2838_v6, 4  ;;  %v2860_v22 = vshrl.u32 %v6870_v36, 16  ;;  %v2813_v12 = vld [vmem:[#allocation2 + $0x70] sm:$0x11] }
 0x1c1   : > { %5285 = vmatpush3.bf16.msra.mxu0 %v5713_v47  ;;  %v3048_v17 = vor.u32 %v3047_v62, %v3044_v57  ;;  %v2843_v55 = vrot.slane %v2841_v11, 5  ;;  %v2863_v52 = vshll.u32 %v6870_v36, 16  ;;  %v3025_v13 = vrot.slane %v3023_v41, 5  ;;  %2717 = vmatprep.mubr.bf16.mxu0 %v4975_v38  ;;  %v5723_v11 = vld [vmem:[#allocation3 + $0x290] sm:$0xff]   ;;  %v6958_v38 = vld [vmem:[#allocation2 + $0x48] sm:$0xff] }
 0x1c2   : > { %3488 = vmatprep.mubr.bf16.mxu1 %v5021_v24  ;;  %v3021_v59 = vrot.slane %v3020_v39, 4  ;;  %5286 = vmatprep.subr.bf16.mxu0 %v5716_v49  ;;  %v2862_v9 = vrot.slane %v2860_v22, 4  ;;  %v2869_v35 = vshll.u32 %v2805_v2, 16  ;;  %v2888_v18 = vshrl.u32 %v6896_v5, 16  ;;  %v5726_v49 = vld [vmem:[#allocation3 + $0x2c8] sm:$0xff]   ;;  %v5725_v2 = vld [vmem:[#allocation3 + $0x100] sm:$0xff]  }
 0x1c3   : > { %5403 = vmatpush3.bf16.msra.mxu1 %v5715_v23  ;;  %v5020_v43 = vcombine.low %v2970_v25, %v2998_v29  ;;  %v3049_v6 = vrot.slane %v3048_v17, 4  ;;  %v3053_v51 = vrot.slane %v3051_v53, 5  ;;  %v2865_v27 = vrot.slane %v2863_v52, 5  ;;  %v5724_v25 = vld [vmem:[#allocation3 + $0x140] sm:$0xff]   ;;  %v5727_v17 = vld [vmem:[#allocation3 + $0x288] sm:$0xff]  }
 0x1c4   : > { %5404 = vmatprep.subr.bf16.mxu1 %v5718_v21  ;;  %v4974_v8 = vcombine.low %v6932_v42, %v6926_v34  ;;  %v2890_v58 = vrot.slane %v2888_v18, 4  ;;  %v2891_v28 = vshll.u32 %v6896_v5, 16  ;;  %v2916_v31 = vshrl.u32 %v6890_v7, 16 }
 0x1c5   : > { %5287 = vmatpush3.bf16.msra.mxu0 %v5717_v10  ;;  %v3026_v4 = vsel %vm6031_vm3, %v3021_v59, %v3025_v13  ;;  %v3054_v48 = vsel %vm6031_vm3, %v3049_v6, %v3053_v51  ;;  %v2866_v15 = vor.u32 %v2865_v27, %v2862_v9  ;;  %v2919_v47 = vshll.u32 %v6890_v7, 16  ;;  %v2821_v13 = vld [vmem:[#allocation2 + $0xb0] sm:$0x11]  ;;  %v5730_v9 = vld [vmem:[#allocation3 + $0x2c0] sm:$0xff]  }
 0x1c6   : > { %3489 = vmatmul.mubr.bf16.gmra.mxu1 %v5020_v43  ;;  %v5025_v16 = vcombine.high %v3026_v4, %v3054_v48  ;;  %5288 = vmatprep.subr.bf16.mxu0 %v5720_v56  ;;  %v6953_v46 = vsel %vm6031_vm3, %v2839_v32, %v2843_v55  ;;  %v2871_v37 = vrot.slane %v2869_v35, 5  ;;  %v2893_v29 = vrot.slane %v2891_v28, 5  ;;  %v5728_v55 = vld [vmem:[#allocation3 + $0x278] sm:$0xff]   ;;  %v6962_v56 = vld [vmem:[#allocation2 + $0x28] sm:$0xff] }
 0x1c7   : > { %5405 = vmatpush3.bf16.msra.mxu1 %v5719_v45  ;;  %v2867_v23 = vrot.slane %v2866_v15, 4  ;;  %v2918_v41 = vrot.slane %v2916_v31, 4  ;;  %v2921_v57 = vrot.slane %v2919_v47, 5  ;;  %v2925_v24 = vshll.u32 %v2813_v12, 16  ;;  %2718 = vmatmul.mubr.bf16.gmra.mxu0 %v4974_v8  ;;  %v5729_v8 = vld [vmem:[#allocation3 + $0x238] sm:$0xff]   ;;  %v5731_v15 = vld [vmem:[#allocation3 + $0x280] sm:$0xff]  }
 0x1c8   : > { %5406 = vmatprep.subr.bf16.mxu1 %v5722_v54  ;;  %3496 = vmatprep.mubr.bf16.mxu1 %v5025_v16  ;;  %v2894_v21 = vor.u32 %v2893_v29, %v2890_v58  ;;  %v2897_v39 = vshll.u32 %v2809_v60, 16  ;;  %v2944_v62 = vshrl.u32 %v6912_v44, 16  ;;  %v2947_v22 = vshll.u32 %v6912_v44, 16  ;;  %v2817_v58 = vld [vmem:[#allocation2 + $0x90] sm:$0x11] }
 0x1c9   : > { %5289 = vmatpush3.bf16.msra.mxu0 %v5721_v50  ;;  %v2872_v53 = vsel %vm6031_vm3, %v2867_v23, %v2871_v37  ;;  %v2922_v32 = vor.u32 %v2921_v57, %v2918_v41  ;;  %v5024_v59 = vcombine.low %v3026_v4, %v3054_v48  ;;  %v2927_v18 = vrot.slane %v2925_v24, 5  ;;  %v5732_v60 = vld [vmem:[#allocation3 + $0x270] sm:$0xff]   ;;  %v5734_v37 = vld [vmem:[#allocation3 + $0x3f8] sm:$0xff]  }
 0x1ca   : > { %v5011_v10 = vcombine.high %v6953_v46, %v2872_v53  ;;  %5290 = vmatprep.subr.bf16.mxu0 %v5724_v25  ;;  %v2895_v52 = vrot.slane %v2894_v21, 4  ;;  %v2946_v45 = vrot.slane %v2944_v62, 4  ;;  %v2949_v43 = vrot.slane %v2947_v22, 5  ;;  %v5733_v41 = vld [vmem:[#allocation3 + $0x230] sm:$0xff]   ;;  %v5736_v62 = vld [vmem:[#allocation3 + $0x268] sm:$0xff]  }
 0x1cb   : > { %5407 = vmatpush3.bf16.msra.mxu1 %v5723_v11  ;;  %v2923_v35 = vrot.slane %v2922_v32, 4  ;;  %v2972_v6 = vshrl.u32 %v6906_v14, 16  ;;  %v5061_v51 = vcombine.high %v6962_v56, %v6958_v38  ;;  %v2899_v54 = vrot.slane %v2897_v39, 5  ;;  %v5735_v39 = vld [vmem:[#allocation3 + $0x3b8] sm:$0xff]  }
 0x1cc   : > { %5408 = vmatprep.subr.bf16.mxu1 %v5726_v49  ;;  %3407 = vmatprep.mubr.bf16.mxu0 %v5011_v10  ;;  %v2975_v27 = vshll.u32 %v6906_v14, 16  ;;  %v2950_v28 = vor.u32 %v2949_v43, %v2946_v45  ;;  %v2981_v4 = vshll.u32 %v2821_v13, 16  ;;  %v5010_v48 = vcombine.low %v6953_v46, %v2872_v53 }
 0x1cd   : > { %5291 = vmatpush3.bf16.msra.mxu0 %v5725_v2  ;;  %v2928_v12 = vsel %vm6031_vm3, %v2923_v35, %v2927_v18  ;;  %v2974_v31 = vrot.slane %v2972_v6, 4  ;;  %v2900_v50 = vsel %vm6031_vm3, %v2895_v52, %v2899_v54  ;;  %v3000_v11 = vshrl.u32 %v6932_v42, 16  ;;  %v5737_v35 = vld [vmem:[#allocation3 + $0x228] sm:$0xff]   ;;  %v2825_v18 = vld [vmem:[#allocation2 + $0xd0] sm:$0x11]  ;;  %v5740_v54 = vld [vmem:[#allocation3 + $0x260] sm:$0xff]  }
 0x1ce   : > { %3497 = vmatmul.mubr.bf16.gmra.mxu1 %v5024_v59  ;;  %v2977_v47 = vrot.slane %v2975_v27, 5  ;;  %5356 = vmatprep.subr.bf16.mxu0 %v5728_v55  ;;  %v5015_v16 = vcombine.high %v2900_v50, %v2928_v12  ;;  %v3003_v25 = vshll.u32 %v6932_v42, 16  ;;  %v2953_v29 = vshll.u32 %v2817_v58, 16  ;;  %v6979_v59 = vld [vmem:[#allocation2 + $0x68] sm:$0xff]  ;;  %v2829_v55 = vld [vmem:[#allocation2 + $0xf0] sm:$0x11] }
 0x1cf   : > { %5409 = vmatpush3.bf16.msra.mxu1 %v5727_v17  ;;  %3962 = vmatprep.mubr.bf16.mxu1 %v5061_v51  ;;  %v3028_v46 = vshrl.u32 %v6926_v34, 16  ;;  %v3031_v49 = vshll.u32 %v6926_v34, 16  ;;  %v2951_v57 = vrot.slane %v2950_v28, 4  ;;  %v2983_v24 = vrot.slane %v2981_v4, 5  ;;  %v5738_v17 = vld [vmem:[#allocation3 + $0x3f0] sm:$0xff]   ;;  %v5742_v28 = vld [vmem:[#allocation3 + $0x3e8] sm:$0xff]  }
 0x1d0   : > { %5410 = vmatprep.subr.bf16.mxu1 %v5730_v9  ;;  %3408 = vmatmul.mubr.bf16.vlgmr.msra.gmra.mxu0 %v5010_v48  ;;  %v2978_v23 = vor.u32 %v2977_v47, %v2974_v31  ;;  %v3002_v21 = vrot.slane %v3000_v11, 4  ;;  %v3005_v2 = vrot.slane %v3003_v25, 5  ;;  %v5060_v10 = vcombine.low %v6962_v56, %v6958_v38  ;;  %v5739_v51 = vld [vmem:[#allocation3 + $0x3b0] sm:$0xff]   ;;  %v5741_v48 = vld [vmem:[#allocation3 + $0x220] sm:$0xff]   ;;  %v5744_v11 = vld [vmem:[#allocation3 + $0x258] sm:$0xff]  }
 0x1d1   : > { %5357 = vmatpush3.bf16.msra.mxu0 %v5729_v8  ;;  %3415 = vmatprep.mubr.bf16.mxu0 %v5015_v16  ;;  %v3030_v32 = vrot.slane %v3028_v46, 4  ;;  %v3033_v22 = vrot.slane %v3031_v49, 5  ;;  %v5065_v52 = vcombine.high %v6979_v59, %v6821_v63  ;;  %v2955_v13 = vrot.slane %v2953_v29, 5  ;;  %v5746_v25 = vld [vmem:[#allocation3 + $0x3e0] sm:$0xff]  }
 0x1d2   : > { %5358 = vmatprep.subr.bf16.mxu0 %v5732_v60  ;;  %v2979_v53 = vrot.slane %v2978_v23, 4  ;;  %v5014_v43 = vcombine.low %v2900_v50, %v2928_v12  ;;  %v3006_v27 = vor.u32 %v3005_v2, %v3002_v21  ;;  %v3037_v8 = vshll.u32 %v2829_v55, 16  ;;  %v5743_v50 = vld [vmem:[#allocation3 + $0x3a8] sm:$0xff]   ;;  %v5750_v2 = vld [vmem:[#allocation3 + $0x3d8] sm:$0xff]  }
 0x1d3   : > { %5411 = vmatpush3.bf16.msra.mxu1 %v5731_v15  ;;  %v3034_v9 = vor.u32 %v3033_v22, %v3030_v32  ;;  %v2956_v6 = vsel %vm6031_vm3, %v2951_v57, %v2955_v13  ;;  %v3009_v31 = vshll.u32 %v2825_v18, 16  ;;  %v4078_v15 = vshrl.u32 %v6958_v38, 16  ;;  %v7004_v13 = vld [vmem:[#allocation2 + $0xe8] sm:$0xff]  ;;  %v4006_v18 = vld [vmem:[#allocation2 + $0x38] sm:$0x11] }
 0x1d4   : > { %5476 = vmatprep.subr.bf16.mxu1 %v5734_v37  ;;  %v2984_v45 = vsel %vm6031_vm3, %v2979_v53, %v2983_v24  ;;  %v4081_v12 = vshll.u32 %v6958_v38, 16  ;;  %v3007_v60 = vrot.slane %v3006_v27, 4  ;;  %v3039_v47 = vrot.slane %v3037_v8, 5  ;;  %v6991_v37 = vld [vmem:[#allocation2 + $0xa8] sm:$0xff]  ;;  %v5754_v27 = vld [vmem:[#allocation3 + $0x3d0] sm:$0xff]  }
 0x1d5   : > { %5359 = vmatpush3.bf16.msra.mxu0 %v5733_v41  ;;  %v5019_v58 = vcombine.high %v2956_v6, %v2984_v45  ;;  %v3035_v4 = vrot.slane %v3034_v9, 4  ;;  %v5064_v16 = vcombine.low %v6979_v59, %v6821_v63  ;;  %v4050_v29 = vshrl.u32 %v6962_v56, 16  ;;  %v5745_v63 = vld [vmem:[#allocation3 + $0x218] sm:$0xff]   ;;  %v4016_v24 = vld [vmem:[#allocation2 + $0x88] sm:$0xff] }
 0x1d6   : > { %3963 = vmatmul.mubr.bf16.vlgmr.msra.gmra.mxu1 %v5060_v10  ;;  %5360 = vmatprep.subr.bf16.mxu0 %v5736_v62  ;;  %v4053_v23 = vshll.u32 %v6962_v56, 16  ;;  %v5069_v38 = vcombine.high %v6991_v37, %v6841_v33  ;;  %v3011_v46 = vrot.slane %v3009_v31, 5  ;;  %v4080_v41 = vrot.slane %v4078_v15, 4  ;;  %v5748_v62 = vld [vmem:[#allocation3 + $0x250] sm:$0xff]   ;;  %v4010_v10 = vld [vmem:[#allocation2 + $0x58] sm:$0x11] }
 0x1d7   : > { %3970 = vmatprep.mubr.bf16.mxu1 %v5065_v52  ;;  %5477 = vmatpush3.bf16.msra.mxu1 %v5735_v39  ;;  %v6999_v49 = vsel %vm6031_vm3, %v3035_v4, %v3039_v47  ;;  %v4083_v57 = vrot.slane %v4081_v12, 5  ;;  %v5018_v21 = vcombine.low %v2956_v6, %v2984_v45  ;;  %v5747_v39 = vld [vmem:[#allocation3 + $0x3a0] sm:$0xff]   ;;  %v4052_v32 = vrot.slane %v4050_v29, 4  ;;  %v5749_v52 = vld [vmem:[#allocation3 + $0x210] sm:$0xff]   ;;  %v7006_v45 = vld [vmem:[#allocation2 + $0x108] sm:$0xff] }
 0x1d8   : > { %5478 = vmatprep.subr.bf16.mxu1 %v5738_v17  ;;  %3416 = vmatmul.mubr.bf16.gmra.mxu0 %v5014_v43  ;;  %v3012_v56 = vsel %vm6031_vm3, %v3007_v60, %v3011_v46  ;;  %v4055_v22 = vrot.slane %v4053_v23, 5  ;;  %v4134_v17 = vshrl.u32 %v4016_v24, 16  ;;  %v4137_v55 = vshll.u32 %v4016_v24, 16  ;;  %v5756_v60 = vld [vmem:[#allocation3 + $0x240] sm:$0xff]   ;;  %v4014_v46 = vld [vmem:[#allocation2 + $0x78] sm:$0x11] }
 0x1d9   : > { %5361 = vmatpush3.bf16.msra.mxu0 %v5737_v35  ;;  %3423 = vmatprep.mubr.bf16.mxu0 %v5019_v58  ;;  %v5023_v53 = vcombine.high %v3012_v56, %v6999_v49  ;;  %v4084_v9 = vor.u32 %v4083_v57, %v4080_v41  ;;  %v5751_v35 = vld [vmem:[#allocation3 + $0x398] sm:$0xff]   ;;  %v4106_v43 = vshrl.u32 %v6979_v59, 16  ;;  %v4109_v6 = vshll.u32 %v6979_v59, 16  ;;  %v5757_v57 = vld [vmem:[#allocation3 + $0x200] sm:$0xff]  }
 0x1da   : > { %5362 = vmatprep.subr.bf16.mxu0 %v5740_v54  ;;  %v5752_v54 = vld [vmem:[#allocation3 + $0x248] sm:$0xff]   ;;  %v4056_v8 = vor.u32 %v4055_v22, %v4052_v32  ;;  %v4087_v58 = vshll.u32 %v4010_v10, 16  ;;  %v4136_v31 = vrot.slane %v4134_v17, 4  ;;  %v4139_v4 = vrot.slane %v4137_v55, 5  ;;  %v5760_v10 = vld [vmem:[#allocation3 + $0x378] sm:$0xff]   ;;  %v5762_v17 = vld [vmem:[#allocation3 + $0x3c0] sm:$0xff]  }
 0x1db   : > { %5479 = vmatpush3.bf16.msra.mxu1 %v5739_v51  ;;  %v5068_v51 = vcombine.low %v6991_v37, %v6841_v33  ;;  %v4059_v15 = vshll.u32 %v4006_v18, 16  ;;  %v4085_v12 = vrot.slane %v4084_v9, 4  ;;  %v5022_v59 = vcombine.low %v3012_v56, %v6999_v49  ;;  %v5755_v33 = vld [vmem:[#allocation3 + $0x390] sm:$0xff]   ;;  %v5759_v56 = vld [vmem:[#allocation3 + $0x388] sm:$0xff]  }
 0x1dc   : > { %5480 = vmatprep.subr.bf16.mxu1 %v5742_v28  ;;  %v5073_v28 = vcombine.high %v7004_v13, %v7006_v45  ;;  %v4108_v47 = vrot.slane %v4106_v43, 4  ;;  %v4057_v29 = vrot.slane %v4056_v8, 4  ;;  %v4089_v23 = vrot.slane %v4087_v58, 5 }
 0x1dd   : > { %5363 = vmatpush3.bf16.msra.mxu0 %v5741_v48  ;;  %v5753_v48 = vld [vmem:[#allocation3 + $0x208] sm:$0xff]   ;;  %v4061_v24 = vrot.slane %v4059_v15, 5  ;;  %v5072_v32 = vcombine.low %v7004_v13, %v7006_v45  ;;  %v4115_v55 = vshll.u32 %v4014_v46, 16  ;;  %v5058_v43 = vcombine.low %v6870_v36, %v6896_v5 }
 0x1de   : > { %3971 = vmatmul.mubr.bf16.gmra.mxu1 %v5064_v16  ;;  %5364 = vmatprep.subr.bf16.mxu0 %v5744_v11  ;;  %v4111_v16 = vrot.slane %v4109_v6, 5  ;;  %v5059_v11 = vcombine.high %v6870_v36, %v6896_v5  ;;  %v4246_v6 = vshrl.u32 %v7006_v45, 16  ;;  %v4218_v36 = vshrl.u32 %v7004_v13, 16 }
 0x1df   : > { %3978 = vmatprep.mubr.bf16.mxu1 %v5069_v38  ;;  %5481 = vmatpush3.bf16.msra.mxu1 %v5743_v50  ;;  %v4024_v50 = vld [vmem:[#allocation2 + $0xc8] sm:$0xff]  ;;  %v4018_v38 = vld [vmem:[#allocation2 + $0x98] sm:$0x11]  ;;  %v4062_v22 = vsel %vm6031_vm3, %v4057_v29, %v4061_v24  ;;  %v4221_v5 = vshll.u32 %v7004_v13, 16 }
 0x1e0   : > { %5482 = vmatprep.subr.bf16.mxu1 %v5746_v25  ;;  %3424 = vmatmul.mubr.bf16.gmra.mxu0 %v5018_v21  ;;  %v5758_v25 = vld [vmem:[#allocation3 + $0x3c8] sm:$0xff]   ;;  %v4190_v41 = vshrl.u32 %v4024_v50, 16  ;;  %v4193_v49 = vshll.u32 %v4024_v50, 16  ;;  %v7019_v21 = vsel %vm6031_vm3, %v4085_v12, %v4089_v23  ;;  %v4022_v12 = vld [vmem:[#allocation2 + $0xb8] sm:$0x11]  ;;  %v4220_v46 = vrot.slane %v4218_v36, 4 }
 0x1e1   : > { %5365 = vmatpush3.bf16.msra.mxu0 %v5745_v63  ;;  %3431 = vmatprep.mubr.bf16.mxu0 %v5023_v53  ;;  %v4140_v63 = vor.u32 %v4139_v4, %v4136_v31  ;;  %v4162_v53 = vshrl.u32 %v6991_v37, 16  ;;  %v5063_v31 = vcombine.high %v6890_v7, %v6912_v44  ;;  %v4026_v4 = vld [vmem:[#allocation2 + $0xd8] sm:$0x11] }
 0x1e2   : > { %5366 = vmatprep.subr.bf16.mxu0 %v5748_v62  ;;  %v4143_v62 = vshll.u32 %v4018_v38, 16  ;;  %v4195_v18 = vrot.slane %v4193_v49, 5  ;;  %v4199_v29 = vshll.u32 %v4026_v4, 16  ;;  %v4171_v38 = vshll.u32 %v4022_v12, 16  ;;  %v4034_v49 = vld [vmem:[#allocation2 + $0x118] sm:$0x11] }
 0x1e3   : > { %5483 = vmatpush3.bf16.msra.mxu1 %v5747_v39  ;;  %v4112_v39 = vor.u32 %v4111_v16, %v4108_v47  ;;  %v4141_v9 = vrot.slane %v4140_v63, 4  ;;  %v4164_v58 = vrot.slane %v4162_v53, 4  ;;  %v4007_v47 = vld [vmem:[#allocation2 + $0x40] sm:$0xff]  ;;  %v5108_v16 = vcombine.low %v4062_v22, %v7019_v21 }
 0x1e4   : > { %5484 = vmatprep.subr.bf16.mxu1 %v5750_v2  ;;  %v4165_v2 = vshll.u32 %v6991_v37, 16  ;;  %v5761_v37 = vld [vmem:[#allocation3 + $0x338] sm:$0xff]   ;;  %v4145_v8 = vrot.slane %v4143_v62, 5  ;;  %v4003_v63 = vld [vmem:[#allocation2 + $0x20] sm:$0xff]  ;;  %v4064_v24 = vshrl.u32 %v4007_v47, 16 }
 0x1e5   : > { %5367 = vmatpush3.bf16.msra.mxu0 %v5749_v52  ;;  %v5109_v52 = vcombine.high %v4062_v22, %v7019_v21  ;;  %v5062_v21 = vcombine.low %v6890_v7, %v6912_v44  ;;  %v5768_v62 = vld [vmem:[#allocation3 + $0x360] sm:$0xff]   ;;  %v4036_v22 = vshrl.u32 %v4003_v63, 16 }
 0x1e6   : > { %3979 = vmatmul.mubr.bf16.gmra.mxu1 %v5068_v51  ;;  %5368 = vmatprep.subr.bf16.mxu0 %v5752_v54  ;;  %v5763_v51 = vld [vmem:[#allocation3 + $0x380] sm:$0xff]   ;;  %v5764_v54 = vld [vmem:[#allocation3 + $0x370] sm:$0xff]   ;;  %v7037_v15 = vsel %vm6031_vm3, %v4141_v9, %v4145_v8  ;;  %v4255_v9 = vshll.u32 %v4034_v49, 16 }
 0x1e7   : > { %3986 = vmatprep.mubr.bf16.mxu1 %v5073_v28  ;;  %5485 = vmatpush3.bf16.msra.mxu1 %v5751_v35  ;;  %v4192_v35 = vrot.slane %v4190_v41, 4  ;;  %v4167_v28 = vrot.slane %v4165_v2, 5  ;;  %v4201_v2 = vrot.slane %v4199_v29, 5 }
 0x1e8   : > { %5486 = vmatprep.subr.bf16.mxu1 %v5754_v27  ;;  %3432 = vmatmul.mubr.bf16.gmra.mxu0 %v5022_v59  ;;  %v4113_v27 = vrot.slane %v4112_v39, 4  ;;  %v4249_v59 = vshll.u32 %v7006_v45, 16  ;;  %v4223_v45 = vrot.slane %v4221_v5, 5  ;;  %v5767_v39 = vld [vmem:[#allocation3 + $0x328] sm:$0xff]   ;;  %v4257_v36 = vrot.slane %v4255_v9, 5 }
 0x1e9   : > { %5369 = vmatpush3.bf16.msra.mxu0 %v5753_v48  ;;  %3897 = vmatprep.mubr.bf16.mxu0 %v5059_v11  ;;  %v4117_v48 = vrot.slane %v4115_v55, 5  ;;  %v4196_v50 = vor.u32 %v4195_v18, %v4192_v35  ;;  %v5766_v11 = vld [vmem:[#allocation3 + $0x368] sm:$0xff]   ;;  %v4173_v55 = vrot.slane %v4171_v38, 5  ;;  %v4066_v35 = vrot.slane %v4064_v24, 4  ;;  %v4009_v5 = vld [vmem:[#allocation2 + $0x50] sm:$0x11] }
 0x1ea   : > { %5370 = vmatprep.subr.bf16.mxu0 %v5756_v60  ;;  %v4248_v60 = vrot.slane %v4246_v6, 4  ;;  %v4015_v6 = vld [vmem:[#allocation2 + $0x80] sm:$0xff] }
 0x1eb   : > { %5487 = vmatpush3.bf16.msra.mxu1 %v5755_v33  ;;  %v5765_v33 = vld [vmem:[#allocation3 + $0x330] sm:$0xff]   ;;  %v4118_v13 = vsel %vm6031_vm3, %v4113_v27, %v4117_v48  ;;  %v4197_v41 = vrot.slane %v4196_v50, 4  ;;  %v4038_v27 = vrot.slane %v4036_v22, 4  ;;  %v7056_v48 = vld [vmem:[#allocation2 + $0x100] sm:$0xff] }
 0x1ec   : > { %5488 = vmatprep.subr.bf16.mxu1 %v5758_v25  ;;  %v4168_v25 = vor.u32 %v4167_v28, %v4164_v58  ;;  %v5113_v23 = vcombine.high %v4118_v13, %v7037_v15  ;;  %v4011_v58 = vld [vmem:[#allocation2 + $0x60] sm:$0xff]  ;;  %v5112_v28 = vcombine.low %v4118_v13, %v7037_v15  ;;  %v4005_v50 = vld [vmem:[#allocation2 + $0x30] sm:$0x11]  ;;  %v5066_v15 = vcombine.low %v6906_v14, %v6932_v42 }
 0x1ed   : > { %5371 = vmatpush3.bf16.msra.mxu0 %v5757_v57  ;;  %v4251_v57 = vrot.slane %v4249_v59, 5  ;;  %v7050_v7 = vsel %vm6031_vm3, %v4197_v41, %v4201_v2  ;;  %v5772_v13 = vld [vmem:[#allocation3 + $0x350] sm:$0xff]   ;;  %v5071_v38 = vcombine.high %v6926_v34, %v7056_v48 }
 0x1ee   : > { %3987 = vmatmul.mubr.bf16.gmra.mxu1 %v5072_v32  ;;  %5436 = vmatprep.subr.bf16.mxu0 %v5760_v10  ;;  %v4169_v53 = vrot.slane %v4168_v25, 4  ;;  %v4030_v32 = vld [vmem:[#allocation2 + $0xf8] sm:$0x11]  ;;  %v4039_v10 = vshll.u32 %v4003_v63, 16  ;;  %v4095_v25 = vshll.u32 %v4011_v58, 16 }
 0x1ef   : > { %5489 = vmatpush3.bf16.msra.mxu1 %v5759_v56  ;;  %4676 = vmatprep.mubr.bf16.mxu1 %v5109_v52  ;;  %v4067_v56 = vshll.u32 %v4007_v47, 16  ;;  %v4224_v52 = vor.u32 %v4223_v45, %v4220_v46  ;;  %v4252_v44 = vor.u32 %v4251_v57, %v4248_v60  ;;  %v4123_v60 = vshll.u32 %v4015_v6, 16  ;;  %v5771_v47 = vld [vmem:[#allocation3 + $0x318] sm:$0xff]   ;;  %v4017_v22 = vld [vmem:[#allocation2 + $0x90] sm:$0x11] }
 0x1f0   : > { %5490 = vmatprep.subr.bf16.mxu1 %v5762_v17  ;;  %3898 = vmatmul.mubr.bf16.vlgmr.msra.gmra.mxu0 %v5058_v43  ;;  %v5067_v17 = vcombine.high %v6906_v14, %v6932_v42  ;;  %v5769_v43 = vld [vmem:[#allocation3 + $0x320] sm:$0xff]   ;;  %v4041_v8 = vrot.slane %v4039_v10, 5  ;;  %v4045_v45 = vshll.u32 %v4005_v50, 16  ;;  %v5773_v42 = vld [vmem:[#allocation3 + $0x310] sm:$0xff]   ;;  %v4097_v24 = vrot.slane %v4095_v25, 5 }
 0x1f1   : > { %5437 = vmatpush3.bf16.msra.mxu0 %v5761_v37  ;;  %3905 = vmatprep.mubr.bf16.mxu0 %v5063_v31  ;;  %v4069_v18 = vrot.slane %v4067_v56, 5  ;;  %v4227_v37 = vshll.u32 %v4030_v32, 16  ;;  %v4225_v4 = vrot.slane %v4224_v52, 4  ;;  %v4253_v12 = vrot.slane %v4252_v44, 4  ;;  %v4023_v56 = vld [vmem:[#allocation2 + $0xc0] sm:$0xff] }
 0x1f2   : > { %5438 = vmatprep.subr.bf16.mxu0 %v5764_v54  ;;  %v5770_v54 = vld [vmem:[#allocation3 + $0x358] sm:$0xff]   ;;  %v4042_v29 = vor.u32 %v4041_v8, %v4038_v27  ;;  %v4125_v14 = vrot.slane %v4123_v60, 5  ;;  %v4047_v32 = vrot.slane %v4045_v45, 5  ;;  %v4019_v10 = vld [vmem:[#allocation2 + $0xa0] sm:$0xff]  ;;  %v4176_v9 = vshrl.u32 %v4023_v56, 16 }
 0x1f3   : > { %5491 = vmatpush3.bf16.msra.mxu1 %v5763_v51  ;;  %v4174_v51 = vsel %vm6031_vm3, %v4169_v53, %v4173_v55  ;;  %v4070_v59 = vor.u32 %v4069_v18, %v4066_v35  ;;  %v4258_v63 = vsel %vm6031_vm3, %v4253_v12, %v4257_v36  ;;  %v4013_v55 = vld [vmem:[#allocation2 + $0x70] sm:$0x11]  ;;  %v4179_v44 = vshll.u32 %v4023_v56, 16  ;;  %v5775_v18 = vld [vmem:[#allocation3 + $0x308] sm:$0xff]   ;;  %v4027_v60 = vld [vmem:[#allocation2 + $0xe0] sm:$0xff] }
 0x1f4   : > { %v5117_v31 = vcombine.high %v4174_v51, %v7050_v7  ;;  %v5116_v53 = vcombine.low %v4174_v51, %v7050_v7  ;;  %v5070_v35 = vcombine.low %v6926_v34, %v7056_v48  ;;  %v4148_v51 = vshrl.u32 %v4019_v10, 16  ;;  %v5777_v34 = vld [vmem:[#allocation3 + $0x300] sm:$0xff]  }
 0x1f5   : > { %5439 = vmatpush3.bf16.msra.mxu0 %v5765_v33  ;;  %v4120_v33 = vshrl.u32 %v4015_v6, 16  ;;  %v4071_v41 = vrot.slane %v4070_v59, 4  ;;  %v4129_v6 = vshll.u32 %v4017_v22, 16  ;;  %v4101_v8 = vshll.u32 %v4013_v55, 16 }
 0x1f6   : > { %4677 = vmatmul.mubr.bf16.vlgmr.msra.gmra.mxu1 %v5108_v16  ;;  %5440 = vmatprep.subr.bf16.mxu0 %v5766_v11  ;;  %v4229_v16 = vrot.slane %v4227_v37, 5  ;;  %v4092_v11 = vshrl.u32 %v4011_v58, 16  ;;  %v5776_v37 = vld [vmem:[#allocation3 + $0x340] sm:$0xff]   ;;  %v4235_v25 = vshll.u32 %v7056_v48, 16  ;;  %v4207_v45 = vshll.u32 %v4027_v60, 16 }
 0x1f7   : > { %4684 = vmatprep.mubr.bf16.mxu1 %v5113_v23  ;;  %v4073_v23 = vshll.u32 %v4009_v5, 16  ;;  %v4122_v49 = vrot.slane %v4120_v33, 4  ;;  %v4131_v36 = vrot.slane %v4129_v6, 5  ;;  %v4150_v5 = vrot.slane %v4148_v51, 4  ;;  %v4025_v33 = vld [vmem:[#allocation2 + $0xd0] sm:$0x11] }
 0x1f8   : > { %3906 = vmatmul.mubr.bf16.gmra.mxu0 %v5062_v21  ;;  %v7064_v46 = vsel %vm6031_vm3, %v4225_v4, %v4229_v16  ;;  %v4094_v57 = vrot.slane %v4092_v11, 4  ;;  %v5774_v21 = vld [vmem:[#allocation3 + $0x348] sm:$0xff]   ;;  %v4103_v59 = vrot.slane %v4101_v8, 5  ;;  %v4232_v11 = vshrl.u32 %v7056_v48, 16 }
 0x1f9   : > { %5441 = vmatpush3.bf16.msra.mxu0 %v5767_v39  ;;  %3913 = vmatprep.mubr.bf16.mxu0 %v5067_v17  ;;  %v4043_v39 = vrot.slane %v4042_v29, 4  ;;  %v5121_v2 = vcombine.high %v7064_v46, %v4258_v63  ;;  %v4126_v52 = vor.u32 %v4125_v14, %v4122_v49  ;;  %v5120_v50 = vcombine.low %v7064_v46, %v4258_v63  ;;  %v4021_v29 = vld [vmem:[#allocation2 + $0xb0] sm:$0x11] }
 0x1fa   : > { %5442 = vmatprep.subr.bf16.mxu0 %v5768_v62  ;;  %v4075_v62 = vrot.slane %v4073_v23, 5  ;;  %v4204_v46 = vshrl.u32 %v4027_v60, 16  ;;  %v4234_v14 = vrot.slane %v4232_v11, 4  ;;  %v4209_v56 = vrot.slane %v4207_v45, 5 }
 0x1fb   : > { %v4048_v7 = vsel %vm6031_vm3, %v4043_v39, %v4047_v32  ;;  %v4127_v58 = vrot.slane %v4126_v52, 4 }
 0x1fc   : > { %v4076_v17 = vsel %vm6031_vm3, %v4071_v41, %v4075_v62  ;;  %v4157_v41 = vshll.u32 %v4021_v29, 16 }
 0x1fd   : > { %5443 = vmatpush3.bf16.msra.mxu0 %v5769_v43  ;;  %v4098_v43 = vor.u32 %v4097_v24, %v4094_v57  ;;  %v5107_v27 = vcombine.high %v4048_v7, %v4076_v17  ;;  %v4206_v24 = vrot.slane %v4204_v46, 4 }
 0x1fe   : > { %4685 = vmatmul.mubr.bf16.gmra.mxu1 %v5112_v28  ;;  %5444 = vmatprep.subr.bf16.mxu0 %v5770_v54  ;;  %v4151_v54 = vshll.u32 %v4019_v10, 16  ;;  %v4178_v28 = vrot.slane %v4176_v9, 4  ;;  %v4159_v39 = vrot.slane %v4157_v41, 5  ;;  %v4961_v41 = vld [vmem:[%s7356_s4] ss:$0 sm:$0xff] }
 0x1ff   : > { %4692 = vmatprep.mubr.bf16.mxu1 %v5117_v31  ;;  %v4181_v31 = vrot.slane %v4179_v44, 5  ;;  %v4099_v4 = vrot.slane %v4098_v43, 4  ;;  %v4210_v10 = vor.u32 %v4209_v56, %v4206_v24 }
 0x200   : > { %3914 = vmatmul.mubr.bf16.gmra.mxu0 %v5066_v15  ;;  %v4153_v12 = vrot.slane %v4151_v54, 5  ;;  %v5106_v15 = vcombine.low %v4048_v7, %v4076_v17  ;;  %v7091_v54 = vpop.f32.mrf.mxu1 }
 0x201   : > { %5445 = vmatpush3.bf16.msra.mxu0 %v5771_v47  ;;  %3921 = vmatprep.mubr.bf16.mxu0 %v5071_v38  ;;  %v4132_v47 = vsel %vm6031_vm3, %v4127_v58, %v4131_v36  ;;  %v4182_v16 = vor.u32 %v4181_v31, %v4178_v28  ;;  %v4185_v38 = vshll.u32 %v4025_v33, 16  ;;  %v4211_v44 = vrot.slane %v4210_v10, 4 }
 0x202   : > { %5446 = vmatprep.subr.bf16.mxu0 %v5772_v13  ;;  %v4104_v13 = vsel %vm6031_vm3, %v4099_v4, %v4103_v59  ;;  %v4154_v23 = vor.u32 %v4153_v12, %v4150_v5 }
 0x203   : > { %v5111_v63 = vcombine.high %v4104_v13, %v4132_v47  ;;  %v4183_v49 = vrot.slane %v4182_v16, 4  ;;  %v4187_v48 = vrot.slane %v4185_v38, 5  ;;  %v5110_v32 = vcombine.low %v4104_v13, %v4132_v47 }
 0x204   : > { %v4155_v57 = vrot.slane %v4154_v23, 4 }
 0x205   : > { %5447 = vmatpush3.bf16.msra.mxu0 %v5773_v42  ;;  %v4237_v42 = vrot.slane %v4235_v25, 5  ;;  %v4188_v62 = vsel %vm6031_vm3, %v4183_v49, %v4187_v48 }
 0x206   : > { %4693 = vmatmul.mubr.bf16.gmra.mxu1 %v5116_v53  ;;  %5448 = vmatprep.subr.bf16.mxu0 %v5774_v21  ;;  %v4033_v21 = vld [vmem:[#allocation2 + $0x110] sm:$0x11]  ;;  %v4160_v22 = vsel %vm6031_vm3, %v4155_v57, %v4159_v39 }
 0x207   : > { %4700 = vmatprep.mubr.bf16.mxu1 %v5121_v2  ;;  %v4238_v53 = vor.u32 %v4237_v42, %v4234_v14  ;;  %v4029_v2 = vld [vmem:[#allocation2 + $0xf0] sm:$0x11]  ;;  %v4241_v17 = vshll.u32 %v4033_v21, 16  ;;  %v5115_v55 = vcombine.high %v4160_v22, %v4188_v62  ;;  %v5114_v7 = vcombine.low %v4160_v22, %v4188_v62 }
 0x208   : > { %3922 = vmatmul.mubr.bf16.gmra.mxu0 %v5070_v35  ;;  %v4213_v52 = vshll.u32 %v4029_v2, 16  ;;  %v2301_v14 = vadd.f32 %v4961_v41, %v6745_v3  ;;  %v2302_v62 = vadd.f32 %v4961_v41, %v6765_v30 }
 0x209   : > { %5449 = vmatpush3.bf16.msra.mxu0 %v5775_v18  ;;  %4611 = vmatprep.mubr.bf16.mxu0 %v5107_v27  ;;  %v4239_v9 = vrot.slane %v4238_v53, 4  ;;  %v4243_v35 = vrot.slane %v4241_v17, 5 }
 0x20a   : > { %5450 = vmatprep.subr.bf16.mxu0 %v5776_v37  ;;  %v4215_v18 = vrot.slane %v4213_v52, 5 }
 0x20b   : > { %v4244_v43 = vsel %vm6031_vm3, %v4239_v9, %v4243_v35 }
 0x20c   : > { %v4216_v37 = vsel %vm6031_vm3, %v4211_v44, %v4215_v18 }
 0x20d   : > { %5451 = vmatpush3.bf16.msra.mxu0 %v5777_v34  ;;  %v5119_v6 = vcombine.high %v4216_v37, %v4244_v43  ;;  %v5118_v51 = vcombine.low %v4216_v37, %v4244_v43 }
 0x20e   : > { %4701 = vmatmul.mubr.bf16.gmra.mxu1 %v5120_v50 }
 0x210   : > { %4612 = vmatmul.mubr.bf16.vlgmr.msra.gmra.mxu0 %v5106_v15 }
 0x211   : > { %4619 = vmatprep.mubr.bf16.mxu0 %v5111_v63 }
 0x218   : > { %4620 = vmatmul.mubr.bf16.gmra.mxu0 %v5110_v32 }
 0x219   : > { %4627 = vmatprep.mubr.bf16.mxu0 %v5115_v55  ;;  %v2303_v55 = vadd.f32 %v4961_v41, %v6733_v1 }
 0x220   : > { %4628 = vmatmul.mubr.bf16.gmra.mxu0 %v5114_v7  ;;  %v2304_v7 = vadd.f32 %v4961_v41, %v6762_v19 }
 0x221   : > { %4635 = vmatprep.mubr.bf16.mxu0 %v5119_v6 }
 0x228   : > { %4636 = vmatmul.mubr.bf16.gmra.mxu0 %v5118_v51 }
 0x24c   : > { %v5252_v27 = vpop.f32.mrf.mxu1 }
 0x24e   : > { %v5253_v8 = vpop.f32.mrf.mxu1 }
 0x24f   : > { %v5254_v58 = vadd.f32 %v5253_v8, %v5252_v27 }
 0x250   : > { %v5255_v28 = vpop.f32.mrf.mxu1 }
 0x252   : > { %v5256_v31 = vpop.f32.mrf.mxu1 }
 0x253   : > { %v5257_v34 = vadd.f32 %v5256_v31, %v5255_v28  ;;  %v2305_v28 = vadd.f32 %v4961_v41, %v6784_v61  ;;  %v1661_v31 = vadd.f32 %v7091_v54, %v6718_v40  ;;  %v2307_v54 = vadd.f32 %v4961_v41, %v6780_v26 }
 0x256   : > { %v5258_v4 = vpop.f32.mrf.mxu1 }
 0x258   : > { %v5259_v36 = vpop.f32.mrf.mxu1 }
 0x259   : > { %v5260_v5 = vadd.f32 %v5259_v36, %v5258_v4 }
 0x25a   : > { %v5261_v12 = vpop.f32.mrf.mxu1 }
 0x25c   : > { %v5262_v50 = vpop.f32.mrf.mxu1 }
 0x25d   : > { %v5263_v0 = vadd.f32 %v5262_v50, %v5261_v12 }
 0x25e   : > { %v5264_v59 = vpop.f32.mrf.mxu1 }
 0x260   : > { %v5265_v33 = vpop.f32.mrf.mxu1 }
 0x261   : > { %v5266_v60 = vadd.f32 %v5265_v33, %v5264_v59 }
 0x262   : > { %v5267_v47 = vpop.f32.mrf.mxu1 }
 0x264   : > { %v5268_v16 = vpop.f32.mrf.mxu1 }
 0x265   : > { %v5269_v11 = vadd.f32 %v5268_v16, %v5267_v47 }
 0x266   : > { %v5270_v25 = vpop.f32.mrf.mxu1 }
 0x268   : > { %v5271_v15 = vpop.f32.mrf.mxu1 }
 0x269   : > { %v5272_v13 = vadd.f32 %v5271_v15, %v5270_v25 }
 0x26a   : > { %v5273_v29 = vpop.f32.mrf.mxu1 }
 0x26c   : > { %v5274_v23 = vpop.f32.mrf.mxu1 }
 0x26d   : > { %v7093_v38 = vadd.f32 %v5274_v23, %v5273_v29 }
 0x26f   : > { %v5212_v46 = vpop.f32.mrf.mxu0 }
 0x271   : > { %v5213_v45 = vpop.f32.mrf.mxu0 }
 0x272   : > { %v5214_v63 = vadd.f32 %v5213_v45, %v5212_v46 }
 0x273   : > { %v5215_v49 = vpop.f32.mrf.mxu0 }
 0x274   : > { %v2761_v42 = vadd.f32 %v5254_v58, %v5214_v63  ;;  %v2308_v63 = vadd.f32 %v4961_v41, %v6805_v20 }
 0x275   : > { %v5216_v48 = vpop.f32.mrf.mxu0 }
 0x276   : > { %v7099_v57 = vpop.f32.mrf.mxu1  ;;  %v7101_v24 = vadd.f32 %v2761_v42, %v2301_v14  ;;  %v5217_v56 = vadd.f32 %v5216_v48, %v5215_v49 }
 0x277   : > { %v5218_v39 = vpop.f32.mrf.mxu0 }
 0x278   : > { %v7103_v21 = vpop.f32.mrf.mxu1  ;;  %v2764_v53 = vadd.f32 %v5257_v34, %v5217_v56 }
 0x279   : > { %v5219_v32 = vpop.f32.mrf.mxu0 }
 0x27a   : > { %v7106_v2 = vpop.f32.mrf.mxu1  ;;  %v7108_v22 = vadd.f32 %v2764_v53, %v2302_v62  ;;  %v5220_v10 = vadd.f32 %v5219_v32, %v5218_v39 }
 0x27b   : > { %v5221_v17 = vpop.f32.mrf.mxu0 }
 0x27c   : > { %v7110_v3 = vpop.f32.mrf.mxu1  ;;  %v2769_v52 = vadd.f32 %v5260_v5, %v5220_v10 }
 0x27d   : > { %v5222_v44 = vpop.f32.mrf.mxu0 }
 0x27e   : > { %v7113_v9 = vpop.f32.mrf.mxu1  ;;  %v7115_v35 = vadd.f32 %v2769_v52, %v2303_v55  ;;  %v5223_v18 = vadd.f32 %v5222_v44, %v5221_v17 }
 0x27f   : > { %v5224_v43 = vpop.f32.mrf.mxu0 }
 0x280   : > { %v7117_v30 = vpop.f32.mrf.mxu1  ;;  %v2772_v37 = vadd.f32 %v5263_v0, %v5223_v18  ;;  %v2306_v0 = vadd.f32 %v4961_v41, %v1661_v31 }
 0x281   : > { %v5225_v51 = vpop.f32.mrf.mxu0 }
 0x282   : > { %v7120_v6 = vpop.f32.mrf.mxu1  ;;  %v7122_v27 = vadd.f32 %v2772_v37, %v2304_v7  ;;  %v5226_v8 = vadd.f32 %v5225_v51, %v5224_v43 }
 0x283   : > { %v5227_v58 = vpop.f32.mrf.mxu0 }
 0x284   : > { %v7124_v1 = vpop.f32.mrf.mxu1  ;;  %v2777_v34 = vadd.f32 %v5266_v60, %v5226_v8 }
 0x285   : > { %v5228_v36 = vpop.f32.mrf.mxu0 }
 0x286   : > { %v7129_v4 = vpop.f32.mrf.mxu1  ;;  %v7131_v19 = vadd.f32 %v2777_v34, %v2305_v28  ;;  %v5229_v5 = vadd.f32 %v5228_v36, %v5227_v58 }
 0x287   : > { %v5230_v50 = vpop.f32.mrf.mxu0 }
 0x288   : > { %7409 = vst [vmem:[#allocation10_spill] sm:$0xff] %v7131_v19  ;;  %v7133_v12 = vpop.f32.mrf.mxu1  ;;  %v2780_v59 = vadd.f32 %v5269_v11, %v5229_v5 }
 0x289   : > { %v5231_v47 = vpop.f32.mrf.mxu0 }
 0x28a   : > { %v7135_v33 = vpop.f32.mrf.mxu1  ;;  %v7137_v16 = vadd.f32 %v2780_v59, %v2306_v0  ;;  %v5232_v61 = vadd.f32 %v5231_v47, %v5230_v50 }
 0x28b   : > { %7410 = vst [vmem:[#allocation11_spill] sm:$0xff] %v7135_v33  ;;  %v5233_v40 = vpop.f32.mrf.mxu0 }
 0x28c   : > { %7411 = vst [vmem:[#allocation12_spill] sm:$0xff] %v7137_v16  ;;  %v7139_v25 = vpop.f32.mrf.mxu1  ;;  %v2785_v60 = vadd.f32 %v5272_v13, %v5232_v61 }
 0x28d   : > { %7412 = vst [vmem:[#allocation13_spill] sm:$0xff] %v7139_v25  ;;  %v5234_v29 = vpop.f32.mrf.mxu0 }
 0x28e   : > { %v7142_v15 = vpop.f32.mrf.mxu1  ;;  %v7144_v23 = vadd.f32 %v2785_v60, %v2307_v54  ;;  %v5235_v46 = vadd.f32 %v5234_v29, %v5233_v40 }
 0x28f   : > { %7413 = vst [vmem:[#allocation14_spill] sm:$0xff] %v7142_v15 }
 0x290   : > { %7414 = vst [vmem:[#allocation16_spill] sm:$0xff] %v7144_v23  ;;  %v7146_v45 = vpop.f32.mrf.mxu1  ;;  %v5292_v11 = vpop.f32.mrf.mxu0  ;;  %v2788_v49 = vadd.f32 %v7093_v38, %v5235_v46 }
 0x291   : > { %7415 = vst [vmem:[#allocation15_spill] sm:$0xff] %v7146_v45 }
 0x292   : > { %v7150_v14 = vpop.f32.mrf.mxu1  ;;  %v5293_v42 = vpop.f32.mrf.mxu0  ;;  %v7152_v48 = vadd.f32 %v2788_v49, %v2308_v63 }
 0x293   : > { %7416 = vst [vmem:[#allocation18_spill] sm:$0xff] %v7150_v14 }
 0x294   : > { %7417 = vst [vmem:[#allocation19_spill] sm:$0xff] %v7152_v48  ;;  %v7154_v26 = vpop.f32.mrf.mxu1  ;;  %v5295_v13 = vpop.f32.mrf.mxu0 }
 0x295   : > { %7418 = vst [vmem:[#allocation21_spill] sm:$0xff] %v7154_v26 }
 0x296   : > { %v5412_v56 = vpop.f32.mrf.mxu1  ;;  %v5296_v39 = vpop.f32.mrf.mxu0 }
 0x297   : > { %v5297_v25 = vadd.f32 %v5296_v39, %v5295_v13 }
 0x298   : > { %v5413_v62 = vpop.f32.mrf.mxu1  ;;  %v7156_v53 = vpop.f32.mrf.mxu0 }
 0x299   : > { %v5414_v33 = vadd.f32 %v5413_v62, %v5412_v56 }
 0x29a   : > { %v7158_v32 = vpop.f32.mrf.mxu1  ;;  %v5299_v10 = vpop.f32.mrf.mxu0 }
 0x29c   : > { %v7160_v17 = vpop.f32.mrf.mxu1  ;;  %v7162_v20 = vpop.f32.mrf.mxu0 }
 0x29d   : > { %v5417_v13 = vadd.f32 %v7160_v17, %v7158_v32 }
 0x29e   : > { %v7164_v38 = vpop.f32.mrf.mxu1  ;;  %v7166_v41 = vpop.f32.mrf.mxu0 }
 0x2a0   : > { %v7168_v55 = vpop.f32.mrf.mxu1  ;;  %v7170_v52 = vpop.f32.mrf.mxu0 }
 0x2a1   : > { %v5420_v32 = vadd.f32 %v7168_v55, %v7164_v38 }
 0x2a2   : > { %v7172_v44 = vpop.f32.mrf.mxu1  ;;  %v7174_v18 = vpop.f32.mrf.mxu0 }
 0x2a4   : > { %v7176_v43 = vpop.f32.mrf.mxu1  ;;  %v7178_v7 = vpop.f32.mrf.mxu0 }
 0x2a6   : > { %v7180_v37 = vpop.f32.mrf.mxu1  ;;  %v7182_v51 = vpop.f32.mrf.mxu0 }
 0x2a8   : > { %v7184_v8 = vpop.f32.mrf.mxu1  ;;  %v7186_v58 = vpop.f32.mrf.mxu0 }
 0x2a9   : > { %7419 = vst [vmem:[#allocation20_spill] sm:$0xff] %v7186_v58  ;;  %v5334_v58 = vadd.f32 %v7103_v21, %v7099_v57 }
 0x2aa   : > { %v7188_v28 = vpop.f32.mrf.mxu1  ;;  %v7190_v31 = vpop.f32.mrf.mxu0 }
 0x2ab   : > { %7420 = vst [vmem:[#allocation22_spill] sm:$0xff] %v7188_v28  ;;  %7421 = vst [vmem:[#allocation17_spill] sm:$0xff] %v7190_v31 }
 0x2ac   : > { %v7192_v34 = vpop.f32.mrf.mxu1  ;;  %v7194_v36 = vpop.f32.mrf.mxu0 }
 0x2ad   : > { %7422 = vst [vmem:[#allocation27_spill] sm:$0xff] %v7192_v34  ;;  %7423 = vst [vmem:[#allocation23_spill] sm:$0xff] %v7194_v36  ;;  %v5294_v34 = vadd.f32 %v5293_v42, %v5292_v11 }
 0x2ae   : > { %v7196_v5 = vpop.f32.mrf.mxu1  ;;  %v7198_v50 = vpop.f32.mrf.mxu0 }
 0x2af   : > { %7424 = vst [vmem:[#allocation24_spill] sm:$0xff] %v7196_v5  ;;  %7425 = vst [vmem:[#allocation25_spill] sm:$0xff] %v7198_v50 }
 0x2b0   : > { %v7200_v0 = vpop.f32.mrf.mxu1  ;;  %v5372_v59 = vpop.f32.mrf.mxu0 }
 0x2b1   : > { %7426 = vst [vmem:[#allocation26_spill] sm:$0xff] %v7200_v0 }
 0x2b2   : > { %v7202_v47 = vpop.f32.mrf.mxu1  ;;  %v5373_v61 = vpop.f32.mrf.mxu0 }
 0x2b3   : > { %7427 = vst [vmem:[#allocation9_spill] sm:$0xff] %v7202_v47  ;;  %v5374_v19 = vadd.f32 %v5373_v61, %v5372_v59 }
 0x2b4   : > { %v7204_v40 = vpop.f32.mrf.mxu1  ;;  %v5375_v54 = vpop.f32.mrf.mxu0 }
 0x2b5   : > { %7428 = vst [vmem:[#allocation28_spill] sm:$0xff] %v7204_v40  ;;  %v3965_v42 = vadd.f32 %v5414_v33, %v5374_v19 }
 0x2b6   : > { %v5492_v60 = vpop.f32.mrf.mxu1  ;;  %v5376_v29 = vpop.f32.mrf.mxu0 }
 0x2b8   : > { %v5493_v46 = vpop.f32.mrf.mxu1  ;;  %v5378_v63 = vpop.f32.mrf.mxu0 }
 0x2b9   : > { %v5494_v39 = vadd.f32 %v5493_v46, %v5492_v60 }
 0x2ba   : > { %v5495_v49 = vpop.f32.mrf.mxu1  ;;  %v5379_v48 = vpop.f32.mrf.mxu0 }
 0x2bc   : > { %v5496_v23 = vpop.f32.mrf.mxu1  ;;  %v5381_v26 = vpop.f32.mrf.mxu0 }
 0x2bd   : > { %v5497_v17 = vadd.f32 %v5496_v23, %v5495_v49  ;;  %v5306_v23 = vadd.f32 %v7174_v18, %v7170_v52  ;;  %v7438_v49 = vld [vmem:[#allocation11_spill] sm:$0xff] }
 0x2be   : > { %v5382_v14 = vpop.f32.mrf.mxu0  ;;  %v5498_v5 = vpop.f32.mrf.mxu1 }
 0x2bf   : > { %v5383_v61 = vadd.f32 %v5382_v14, %v5381_v26  ;;  %v5346_v14 = vadd.f32 %v7133_v12, %v7129_v4  ;;  %v5426_v4 = vadd.f32 %v7184_v8, %v7180_v37 }
 0x2c0   : > { %v7206_v50 = vpop.f32.mrf.mxu0  ;;  %v5499_v36 = vpop.f32.mrf.mxu1 }
 0x2c2   : > { %v7208_v0 = vpop.f32.mrf.mxu0  ;;  %v7214_v40 = vpop.f32.mrf.mxu1 }
 0x2c3   : > { %7431 = vst [vmem:[#allocation31_spill] sm:$0xff] %v7214_v40 }
 0x2c4   : > { %v7210_v47 = vpop.f32.mrf.mxu0  ;;  %v7220_v28 = vpop.f32.mrf.mxu1 }
 0x2c5   : > { %7429 = vst [vmem:[#allocation29_spill] sm:$0xff] %v7210_v47  ;;  %7434 = vst [vmem:[#allocation34_spill] sm:$0xff] %v7220_v28  ;;  %v5300_v28 = vadd.f32 %v5299_v10, %v7156_v53 }
 0x2c6   : > { %v7212_v16 = vpop.f32.mrf.mxu0  ;;  %v7230_v40 = vpop.f32.mrf.mxu1 }
 0x2c7   : > { %7430 = vst [vmem:[#allocation30_spill] sm:$0xff] %v7212_v16  ;;  %v3475_v16 = vadd.f32 %v5334_v58, %v5294_v34 }
 0x2c8   : > { %v7216_v45 = vpop.f32.mrf.mxu0 }
 0x2c9   : > { %7432 = vst [vmem:[#allocation32_spill] sm:$0xff] %v7216_v45  ;;  %v5337_v45 = vadd.f32 %v7110_v3, %v7106_v2  ;;  %v3505_v21 = vadd.f32 %v3475_v16, %v7101_v24  ;;  %v5340_v2 = vadd.f32 %v7117_v30, %v7113_v9  ;;  %v5505_v3 = vpop.f32.mrf.mxu1  ;;  %v5303_v24 = vadd.f32 %v7166_v41, %v7162_v20 }
 0x2ca   : > { %v7218_v15 = vpop.f32.mrf.mxu0  ;;  %v5343_v9 = vadd.f32 %v7124_v1, %v7120_v6  ;;  %v5423_v6 = vadd.f32 %v7176_v43, %v7172_v44  ;;  %v5500_v1 = vadd.f32 %v5499_v36, %v5498_v5  ;;  %v5309_v44 = vadd.f32 %v7182_v51, %v7178_v7  ;;  %v7436_v12 = vld [vmem:[#allocation31_spill] sm:$0xff]  ;;  %v7442_v51 = vld [vmem:[#allocation10_spill] sm:$0xff] }
 0x2cb   : > { %7433 = vst [vmem:[#allocation33_spill] sm:$0xff] %v7218_v15  ;;  %v5377_v15 = vadd.f32 %v5376_v29, %v5375_v54  ;;  %v3995_v19 = vadd.f32 %v3965_v42, %v3505_v21  ;;  %v3483_v10 = vadd.f32 %v5340_v2, %v5300_v28  ;;  %v5507_v30 = vpop.f32.mrf.mxu1  ;;  %v3491_v29 = vadd.f32 %v5346_v14, %v5306_v23  ;;  %v7444_v2 = vld [vmem:[#allocation17_spill] sm:$0xff] }
 0x2cc   : > { %v7222_v31 = vpop.f32.mrf.mxu0  ;;  %v3486_v38 = vadd.f32 %v5343_v9, %v5303_v24  ;;  %v3976_v60 = vadd.f32 %v5423_v6, %v5383_v61  ;;  %v7437_v36 = vld [vmem:[#allocation34_spill] sm:$0xff]  ;;  %v7440_v21 = vld [vmem:[#allocation29_spill] sm:$0xff] }
 0x2cd   : > { %7435 = vst [vmem:[#allocation35_spill] sm:$0xff] %v7222_v31  ;;  %v3478_v31 = vadd.f32 %v5337_v45, %v5297_v25  ;;  %v3968_v33 = vadd.f32 %v5417_v13, %v5377_v15  ;;  %v5380_v25 = vadd.f32 %v5379_v48, %v5378_v63  ;;  %v3507_v20 = vadd.f32 %v3483_v10, %v7115_v35  ;;  %v5508_v26 = vpop.f32.mrf.mxu1 }
 0x2ce   : > { %v7226_v47 = vpop.f32.mrf.mxu0  ;;  %v5386_v35 = vadd.f32 %v7208_v0, %v7206_v50  ;;  %v3508_v18 = vadd.f32 %v3486_v38, %v7122_v27  ;;  %v5503_v5 = vadd.f32 %v7437_v36, %v7436_v12  ;;  %v7439_v50 = vld [vmem:[#allocation13_spill] sm:$0xff]  ;;  %v7441_v13 = vld [vmem:[#allocation30_spill] sm:$0xff]  ;;  %v3509_v37 = vadd.f32 %v3491_v29, %v7442_v51  ;;  %v7462_v51 = vld [vmem:[#allocation19_spill] sm:$0xff] }
 0x2cf   : > { %v3506_v53 = vadd.f32 %v3478_v31, %v7108_v22  ;;  %v3973_v59 = vadd.f32 %v5420_v32, %v5380_v25  ;;  %v5349_v0 = vadd.f32 %v7439_v50, %v7438_v49  ;;  %v7446_v25 = vld [vmem:[#allocation27_spill] sm:$0xff]  ;;  %v5509_v14 = vadd.f32 %v5508_v26, %v5507_v30  ;;  %v7460_v30 = vld [vmem:[#allocation9_spill] sm:$0xff]  ;;  %v7461_v26 = vld [vmem:[#allocation28_spill] sm:$0xff] }
 0x2d0   : > { %v5452_v11 = vpop.f32.mrf.mxu0  ;;  %v3981_v27 = vadd.f32 %v5426_v4, %v5386_v35  ;;  %v7448_v32 = vld [vmem:[#allocation15_spill] sm:$0xff]  ;;  %v7457_v35 = vld [vmem:[#allocation21_spill] sm:$0xff]  ;;  %v5435_v50 = vadd.f32 %v7461_v26, %v7460_v30 }
 0x2d1   : > { %v3996_v48 = vadd.f32 %v3968_v33, %v3506_v53  ;;  %v3997_v54 = vadd.f32 %v3973_v59, %v3507_v20  ;;  %v3494_v8 = vadd.f32 %v5349_v0, %v5309_v44  ;;  %v7445_v33 = vld [vmem:[#allocation22_spill] sm:$0xff]  ;;  %v5506_v53 = vadd.f32 %v5505_v3, %v7230_v40  ;;  %v7451_v20 = vld [vmem:[#allocation12_spill] sm:$0xff]  ;;  %v7453_v40 = vld [vmem:[#allocation25_spill] sm:$0xff] }
 0x2d2   : > { %v5453_v57 = vpop.f32.mrf.mxu0  ;;  %v3999_v9 = vadd.f32 %v3981_v27, %v3509_v37  ;;  %v7450_v59 = vld [vmem:[#allocation33_spill] sm:$0xff] }
 0x2d3   : > { %v5454_v56 = vadd.f32 %v5453_v57, %v5452_v11  ;;  %v5510_v11 = vpop.f32.mrf.mxu1  ;;  %v3998_v57 = vadd.f32 %v3976_v60, %v3508_v18  ;;  %v3510_v38 = vadd.f32 %v3494_v8, %v7451_v20  ;;  %v7456_v60 = vld [vmem:[#allocation18_spill] sm:$0xff] }
 0x2d4   : > { %v5455_v62 = vpop.f32.mrf.mxu0  ;;  %v7458_v4 = vld [vmem:[#allocation35_spill] sm:$0xff] }
 0x2d5   : > { %v4679_v45 = vadd.f32 %v5494_v39, %v5454_v56  ;;  %v5389_v39 = vadd.f32 %v7441_v13, %v7440_v21  ;;  %v7443_v56 = vld [vmem:[#allocation20_spill] sm:$0xff]  ;;  %v5395_v12 = vadd.f32 %v7226_v47, %v7458_v4 }
 0x2d6   : > { %v5456_v16 = vpop.f32.mrf.mxu0 }
 0x2d7   : > { %v4709_v58 = vadd.f32 %v4679_v45, %v3995_v19  ;;  %v5457_v34 = vadd.f32 %v5456_v16, %v5455_v62  ;;  %v5312_v62 = vadd.f32 %v7444_v2, %v7443_v56  ;;  %v5429_v45 = vadd.f32 %v7446_v25, %v7445_v33  ;;  %v7447_v16 = vld [vmem:[#allocation14_spill] sm:$0xff] }
 0x2d8   : > { %v5458_v15 = vpop.f32.mrf.mxu0 }
 0x2d9   : > { %4717 = vst [vmem:[%s7248_s23] sm:$0xff] %v4709_v58  ;;  %v4682_v22 = vadd.f32 %v5497_v17, %v5457_v34  ;;  %v5352_v17 = vadd.f32 %v7448_v32, %v7447_v16  ;;  %v5511_v58 = vpop.f32.mrf.mxu1 }
 0x2da   : > { %v5459_v41 = vpop.f32.mrf.mxu0  ;;  %v5512_v0 = vadd.f32 %v5511_v58, %v5510_v11 }
 0x2db   : > { %v4710_v55 = vadd.f32 %v4682_v22, %v3996_v48  ;;  %v5460_v28 = vadd.f32 %v5459_v41, %v5458_v15  ;;  %v3984_v15 = vadd.f32 %v5429_v45, %v5389_v39  ;;  %v7449_v48 = vld [vmem:[#allocation32_spill] sm:$0xff]  ;;  %v3499_v23 = vadd.f32 %v5352_v17, %v5312_v62  ;;  %v7452_v41 = vld [vmem:[#allocation23_spill] sm:$0xff]  ;;  %v5513_v18 = vpop.f32.mrf.mxu1 }
 0x2dc   : > { %v5461_v31 = vpop.f32.mrf.mxu0  ;;  %v5392_v61 = vadd.f32 %v7450_v59, %v7449_v48  ;;  %v5315_v3 = vadd.f32 %v7453_v40, %v7452_v41  ;;  %v3992_v39 = vadd.f32 %v5435_v50, %v5395_v12 }
 0x2dd   : > { %4718 = vst [vmem:[%s7248_s23 + $0x8] sm:$0xff] %v4710_v55  ;;  %v4687_v52 = vadd.f32 %v5500_v1, %v5460_v28  ;;  %v7454_v1 = vld [vmem:[#allocation24_spill] sm:$0xff]  ;;  %v7455_v55 = vld [vmem:[#allocation26_spill] sm:$0xff]  ;;  %v4000_v44 = vadd.f32 %v3984_v15, %v3510_v38  ;;  %v5514_v27 = vpop.f32.mrf.mxu1 }
 0x2de   : > { %v5462_v43 = vpop.f32.mrf.mxu0  ;;  %v5432_v28 = vadd.f32 %v7455_v55, %v7454_v1  ;;  %v5515_v8 = vadd.f32 %v5514_v27, %v5513_v18 }
 0x2df   : > { %v4711_v46 = vadd.f32 %v4687_v52, %v3997_v54  ;;  %v5463_v63 = vadd.f32 %v5462_v43, %v5461_v31  ;;  %v5355_v52 = vadd.f32 %v7457_v35, %v7456_v60 }
 0x2e0   : > { %v5464_v42 = vpop.f32.mrf.mxu0  ;;  %v3989_v43 = vadd.f32 %v5432_v28, %v5392_v61 }
 0x2e1   : > { %4719 = vst [vmem:[%s7248_s23 + $0x10] sm:$0xff] %v4711_v46  ;;  %v4690_v7 = vadd.f32 %v5503_v5, %v5463_v63  ;;  %v7459_v5 = vld [vmem:[#allocation16_spill] sm:$0xff]  ;;  %v3502_v63 = vadd.f32 %v5355_v52, %v5315_v3 }
 0x2e2   : > { %v5465_v19 = vpop.f32.mrf.mxu0  ;;  %v3511_v46 = vadd.f32 %v3499_v23, %v7459_v5 }
 0x2e3   : > { %v4712_v10 = vadd.f32 %v4690_v7, %v3998_v57  ;;  %v5466_v24 = vadd.f32 %v5465_v19, %v5464_v42  ;;  %v3512_v37 = vadd.f32 %v3502_v63, %v7462_v51 }
 0x2e4   : > { %v5467_v34 = vpop.f32.mrf.mxu0  ;;  %v4001_v13 = vadd.f32 %v3989_v43, %v3511_v46 }
 0x2e5   : > { %4720 = vst [vmem:[%s7248_s23 + $0x18] sm:$0xff] %v4712_v10  ;;  %v4695_v22 = vadd.f32 %v5506_v53, %v5466_v24  ;;  %v4002_v11 = vadd.f32 %v3992_v39, %v3512_v37 }
 0x2e6   : > { %v5468_v6 = vpop.f32.mrf.mxu0 }
 0x2e7   : > { %v4713_v31 = vadd.f32 %v4695_v22, %v3999_v9  ;;  %v5469_v54 = vadd.f32 %v5468_v6, %v5467_v34 }
 0x2e8   : > { %v5470_v29 = vpop.f32.mrf.mxu0 }
 0x2e9   : > { %4721 = vst [vmem:[%s7248_s23 + $0x20] sm:$0xff] %v4713_v31  ;;  %v4698_v36 = vadd.f32 %v5509_v14, %v5469_v54 }
 0x2ea   : > { %v5471_v49 = vpop.f32.mrf.mxu0 }
 0x2eb   : > { %v4714_v42 = vadd.f32 %v4698_v36, %v4000_v44  ;;  %v5472_v57 = vadd.f32 %v5471_v49, %v5470_v29 }
 0x2ec   : > { %v5473_v21 = vpop.f32.mrf.mxu0 }
 0x2ed   : > { %4722 = vst [vmem:[%s7248_s23 + $0x28] sm:$0xff] %v4714_v42  ;;  %v4703_v47 = vadd.f32 %v5512_v0, %v5472_v57 }
 0x2ee   : > { %v5474_v7 = vpop.f32.mrf.mxu0 }
 0x2ef   : > { %v4715_v56 = vadd.f32 %v4703_v47, %v4001_v13  ;;  %v5475_v2 = vadd.f32 %v5474_v7, %v5473_v21 }
 0x2f1   : > { %4723 = vst [vmem:[%s7248_s23 + $0x30] sm:$0xff] %v4715_v56  ;;  %v4706_v62 = vadd.f32 %v5515_v8, %v5475_v2 }
 0x2f3   : > { %v4716_v19 = vadd.f32 %v4706_v62, %v4002_v11 }
 0x2f5   : > { %4724 = vst [vmem:[%s7248_s23 + $0x38] sm:$0xff] %v4716_v19 }
 0x2f6   : > { %5818 = shalt.err (!%p5815_p0)
}
 0x2f7   : > { %s5819_s11 = scalar_lea.hbm %s7305_s7, 1024  ;;  %s5823_s14 = scalar_lea.hbm %s7357_s5, 2048 }
 0x2f8   : > { %p5820_p1 = scmp.ne.s32.totalorder %s7305_s7, %s5819_s11  ;;  %p5824_p4 = scmp.lt.s32.totalorder %s7305_s7, %s7357_s5 }
 0x2f9   : > { %p5825_p7 = scmp.lt.s32.totalorder %s5823_s14, %s5819_s11 }
 0x2fa   : > { %p5821_p2 = pnand %p5820_p1, %p5946_p5 }
 0x2fb   : > { %p5826_p8 = por %p5825_p7, %p5824_p4 }
 0x2fc   : > { %p5822_p3 = pneg %p5821_p2 }
 0x2fe   : > { %p5827_p6 = pnand %p5826_p8, %p5822_p3 }
 0x300   : > { %5830 = shalt.err (!%p5827_p6)
}
 0x301   : > { %s5876_s23 = smov 128   ;;  %s5877_s25 = smov 8  }
 0x302   : > { %5563 = dma.vmem_to_hbm [thread:$0]  (%p5946_p5), %s7307_s26, 1024, %s7305_s7, %s7312_s8, %s5876_s23, %s5876_s23, %s5877_s25  }
 0x303 PF: > { %p5575_p9 = scmp.ge.s32.totalorder %s5869_s21, 2  ;;  %s4754_s30 = sand.u32 1, %s5857_s18  }
 0x304   : > { %p7463_p10 = scmp.ne.s32.totalorder %s7361_s29, 0  ;;  %s4755_s6 = scalar_lea.sflag [#allocation5], %s4754_s30 }
 0x306   : > { %p5570_p11 = pnand %p5575_p9, %p7463_p10 }
 0x308   : > { %p5571_p12 = pneg %p5570_p11 }
 0x30a   : > { %5852 = dma.done.wait (%p5571_p12), %s4755_s6, 1024  }
 0x30b   : > { %5854 = vsyncadd (%p5571_p12), %s4755_s6, 4294966272  ;;  %p16_p13 = scmp.ge.s32.totalorder %s5933_s24, 4   ;;  %s7464_s18 = smov %s5861_s19 }
 0x30c   : > { %s7465_s19 = smov %s5865_s20  ;;  %s7466_s20 = smov %s5944_s27 }
 0x30d   : > { %s7467_s21 = smov %s5933_s24  ;;  %18 = sbr.rel (!%p16_p13) target bundleno = 4 (0x4), region = 83 }
 0x312   :  { %4760 = vsyncpa [#allocation4], 1 }
 0x313   :  { %4762 = vsyncpa [#allocation4 + $0x1], 1 }
 0x314   :  { %4763 = vsyncpa [#allocation5], 1 }
 0x315   :  { %4765 = vsyncpa [#allocation5 + $0x1], 1 }

</bundles_post_ra>
